<compile_context>
chip_gen: v7x
topology: tpu7x:2x2x1
jax: 0.10.0
libtpu: 0.0.40
codegen_flags: <defaults>
</compile_context>

<pallas_src>
import functools

import numpy as np
import jax
import jax.numpy as jnp
from jax.experimental import pallas as pl
from jax.experimental.pallas import tpu as pltpu

NUM_CONV = 3          # num_conv_layers
BN_EPS = 1e-5
LANES = 128
VMEM_LIMIT = 32 * 1024 * 1024   # raises v5e default (16 MiB); fits v7x scoped budget


def _round_up(x, m):
    return (x + m - 1) // m * m


# ---------------------------------------------------------------------------
# Kernel 0: column sum / sum-of-squares prepass (only needed for the raw input
# x; every later layer gets its BN stats for free from the producing kernel).
# Grid over row tiles, accumulate into a single resident (2, C) output block.
# ---------------------------------------------------------------------------
def col_stats_kernel(x_ref, stats_ref):
    @pl.when(pl.program_id(0) == 0)
    def _():
        stats_ref[...] = jnp.zeros_like(stats_ref)

    x = x_ref[...].astype(jnp.float32)
    s1 = jnp.sum(x, axis=0, keepdims=True)
    s2 = jnp.sum(x * x, axis=0, keepdims=True)
    stats_ref[...] += jnp.concatenate([s1, s2], axis=0)


def col_stats(x, *, tm):
    n_pad, c = x.shape
    nrt = n_pad // tm
    return pl.pallas_call(
        col_stats_kernel,
        grid=(nrt,),
        in_specs=[pl.BlockSpec((tm, c), lambda i: (i, 0))],
        out_specs=pl.BlockSpec((2, c), lambda i: (0, 0)),
        out_shape=jax.ShapeDtypeStruct((2, c), jnp.float32),
        compiler_params=pltpu.CompilerParams(
            dimension_semantics=("arbitrary",), vmem_limit_bytes=VMEM_LIMIT),
    )(x)


# ---------------------------------------------------------------------------
# Kernel 1: fused BatchNorm (training batch stats, precomputed sums) + matmul
# (+ optional ReLU).  Gridded over row tiles (pipelined; no whole-slab VMEM
# residency requirement).  Also emits per-row-tile sum / sum-of-squares of its
# own output so a consumer can reuse them as BN stats (used by the first layer).
# ---------------------------------------------------------------------------
def bn_matmul_kernel(stats_ref, g_ref, b_ref, h_ref, w_ref, out_ref, ostats_ref,
                     *, n_true, tm, relu):
    i = pl.program_id(0)
    inv_n = 1.0 / n_true
    mean = stats_ref[0:1, :] * inv_n
    var = jnp.maximum(stats_ref[1:2, :] * inv_n - mean * mean, 0.0)
    scale = g_ref[...] * jax.lax.rsqrt(var + BN_EPS)          # EUP
    shift = b_ref[...] - mean * scale

    xn = h_ref[...].astype(jnp.float32) * scale + shift        # f32 VPU
    y = jnp.dot(xn.astype(jnp.bfloat16), w_ref[...],           # bf16 MXU, f32 acc
                preferred_element_type=jnp.float32)
    if relu:
        y = jnp.maximum(y, 0.0)
    rows = i * tm + jax.lax.broadcasted_iota(jnp.int32, (tm, 1), 0)
    y = jnp.where(rows < n_true, y, 0.0)                       # pad rows stay 0
    out_ref[...] = y.astype(out_ref.dtype)

    s1 = jnp.sum(y, axis=0, keepdims=True)                     # cheap XLU filler
    s2 = jnp.sum(y * y, axis=0, keepdims=True)
    ostats_ref[0] = jnp.concatenate([s1, s2], axis=0)


def bn_matmul(stats, gamma, beta, h, w_bf16, *, n_true, tm, relu):
    n_pad, cin = h.shape
    cout = w_bf16.shape[1]
    nrt = n_pad // tm
    y, stats_tiles = pl.pallas_call(
        functools.partial(bn_matmul_kernel, n_true=n_true, tm=tm, relu=relu),
        grid=(nrt,),
        in_specs=[
            pl.BlockSpec((2, cin), lambda i: (0, 0)),      # global BN sums (resident)
            pl.BlockSpec((1, cin), lambda i: (0, 0)),      # gamma
            pl.BlockSpec((1, cin), lambda i: (0, 0)),      # beta
            pl.BlockSpec((tm, cin), lambda i: (i, 0)),     # activation row tile
            pl.BlockSpec((cin, cout), lambda i: (0, 0)),   # weight (resident)
        ],
        out_specs=[
            pl.BlockSpec((tm, cout), lambda i: (i, 0)),
            pl.BlockSpec((1, 2, cout), lambda i: (i, 0, 0)),
        ],
        out_shape=[
            jax.ShapeDtypeStruct((n_pad, cout), jnp.bfloat16),   # bf16 slab to HBM
            jax.ShapeDtypeStruct((nrt, 2, cout), jnp.float32),
        ],
        compiler_params=pltpu.CompilerParams(
            dimension_semantics=("parallel",), vmem_limit_bytes=VMEM_LIMIT),
    )(stats, gamma, beta, h, w_bf16)
    return y, stats_tiles.sum(axis=0)


# ---------------------------------------------------------------------------
# Kernel 2: block-sparse SpMM  h_out = relu(A_norm @ m + bias)
# Grid = (row_tiles [parallel], block_slot [arbitrary]).  Scalar-prefetched
# bids/cols/cnt tables pick non-zero adjacency blocks out of the COMPACTED
# block-major (nnz, TM, TK) array; m is fully VMEM-resident and sliced with
# pl.ds.  Finalize also emits per-row-tile BN stats of the new h.
# ---------------------------------------------------------------------------
def spmm_kernel(bids_ref, cols_ref, cnt_ref, adj_ref, m_ref, bias_ref,
                out_ref, stats_ref, acc_ref, *, tm, tk, n_true):
    i = pl.program_id(0)
    k = pl.program_id(1)

    @pl.when(k == 0)
    def _():
        acc_ref[...] = jnp.zeros_like(acc_ref)

    @pl.when(k < cnt_ref[i])                 # skip padded block slots
    def _():
        start = pl.multiple_of(cols_ref[i, k] * tk, tk)
        acc_ref[...] += jnp.dot(adj_ref[0], m_ref[pl.ds(start, tk), :],
                                preferred_element_type=jnp.float32)

    @pl.when(k == pl.num_programs(1) - 1)
    def _():
        rows = i * tm + jax.lax.broadcasted_iota(jnp.int32, (tm, 1), 0)
        y = jnp.maximum(acc_ref[...] + bias_ref[...], 0.0)
        y = jnp.where(rows < n_true, y, 0.0)                 # pad rows -> 0
        out_ref[...] = y.astype(out_ref.dtype)
        s1 = jnp.sum(y, axis=0, keepdims=True)               # BN stats for next layer
        s2 = jnp.sum(y * y, axis=0, keepdims=True)
        stats_ref[0] = jnp.concatenate([s1, s2], axis=0)


def spmm_relu(adj_blocks, m, bias, bids, cols, cnt, *, n_true, n_pad, tm, tk):
    hp = m.shape[1]
    nrt = n_pad // tm
    maxb = bids.shape[1]
    nnz = adj_blocks.shape[0]
    cost = pl.CostEstimate(
        flops=2 * nnz * tm * tk * hp,
        transcendentals=0,
        bytes_accessed=nnz * tm * tk * 2 + 2 * n_pad * hp * 2 + nrt * 2 * hp * 4,
    )
    grid_spec = pltpu.PrefetchScalarGridSpec(
        num_scalar_prefetch=3,
        grid=(nrt, maxb),
        in_specs=[
            # compacted adjacency block: one contiguous (TM*TK*2)B DMA per step
            pl.BlockSpec((1, tm, tk),
                         lambda i, k, bids, cols, cnt: (bids[i, k], 0, 0)),
            # transformed features: resident in VMEM for the whole grid
            pl.BlockSpec((n_pad, hp), lambda i, k, *_: (0, 0)),
            # conv bias (resident)
            pl.BlockSpec((1, hp), lambda i, k, *_: (0, 0)),
        ],
        out_specs=[
            pl.BlockSpec((tm, hp), lambda i, k, *_: (i, 0)),
            pl.BlockSpec((1, 2, hp), lambda i, k, *_: (i, 0, 0)),
        ],
        scratch_shapes=[pltpu.VMEM((tm, hp), jnp.float32)],
    )
    h, stats_tiles = pl.pallas_call(
        functools.partial(spmm_kernel, tm=tm, tk=tk, n_true=n_true),
        grid_spec=grid_spec,
        out_shape=[jax.ShapeDtypeStruct((n_pad, hp), jnp.bfloat16),
                   jax.ShapeDtypeStruct((nrt, 2, hp), jnp.float32)],
        compiler_params=pltpu.CompilerParams(
            dimension_semantics=("parallel", "arbitrary"),
            vmem_limit_bytes=VMEM_LIMIT),
        cost_estimate=cost,
    )(bids, cols, cnt, adj_blocks, m, bias)
    return h, stats_tiles.sum(axis=0)


# ---------------------------------------------------------------------------
# Kernel 3: global_add_pool + fc block + bn_hidden.  Gridded over node row
# tiles: pool_tile @ h_tile accumulates into a resident (G_pad, Hp) block;
# the fc / BN tail runs once in the finalize.  G is padded to 8 sublanes.
# ---------------------------------------------------------------------------
def tail_kernel(pool_ref, h_ref, bnfc_g_ref, bnfc_b_ref, wlin_ref, blin_ref,
                bnh_g_ref, bnh_b_ref, out_ref, acc_ref, *, num_graphs):
    i = pl.program_id(0)

    @pl.when(i == 0)
    def _():
        acc_ref[...] = jnp.zeros_like(acc_ref)

    # global_add_pool (gating is None for 'sum'); pad-node pool columns are 0
    acc_ref[...] += jnp.dot(pool_ref[...], h_ref[...],
                            preferred_element_type=jnp.float32)

    @pl.when(i == pl.num_programs(0) - 1)
    def _():
        inv = 1.0 / num_graphs

        def bn(v, gamma, beta):
            mean = jnp.sum(v, axis=0, keepdims=True) * inv
            var = jnp.maximum(
                jnp.sum(v * v, axis=0, keepdims=True) * inv - mean * mean, 0.0)
            s = gamma * jax.lax.rsqrt(var + BN_EPS)
            return v * s + (beta - mean * s)

        rows = jax.lax.broadcasted_iota(jnp.int32, (acc_ref.shape[0], 1), 0)
        g = acc_ref[...]                                   # pad graph rows are 0
        # one fc block: relu(lin(bn_fc(g)))   (fc_residual=False)
        z = bn(g, bnfc_g_ref[...], bnfc_b_ref[...])
        z = jnp.dot(z.astype(jnp.bfloat16), wlin_ref[...],
                    preferred_element_type=jnp.float32) + blin_ref[...]
        z = jnp.maximum(z, 0.0)
        z = jnp.where(rows < num_graphs, z, 0.0)           # keep BN stats exact
        # bn_hidden; dropout=0 so it's a no-op
        out_ref[...] = bn(z, bnh_g_ref[...], bnh_b_ref[...])


def tail(pool_pad, h, params, *, num_graphs, tm, n_pad):
    gp = pool_pad.shape[0]
    hp = h.shape[1]
    nrt = n_pad // tm
    return pl.pallas_call(
        functools.partial(tail_kernel, num_graphs=num_graphs),
        grid=(nrt,),
        in_specs=[
            pl.BlockSpec((gp, tm), lambda i: (0, i)),
            pl.BlockSpec((tm, hp), lambda i: (i, 0)),
            pl.BlockSpec((1, hp), lambda i: (0, 0)),
            pl.BlockSpec((1, hp), lambda i: (0, 0)),
            pl.BlockSpec((hp, hp), lambda i: (0, 0)),
            pl.BlockSpec((1, hp), lambda i: (0, 0)),
            pl.BlockSpec((1, hp), lambda i: (0, 0)),
            pl.BlockSpec((1, hp), lambda i: (0, 0)),
        ],
        out_specs=pl.BlockSpec((gp, hp), lambda i: (0, 0)),
        out_shape=jax.ShapeDtypeStruct((gp, hp), jnp.float32),
        scratch_shapes=[pltpu.VMEM((gp, hp), jnp.float32)],
        compiler_params=pltpu.CompilerParams(
            dimension_semantics=("arbitrary",), vmem_limit_bytes=VMEM_LIMIT),
    )(pool_pad, h, params["bnfc_g"], params["bnfc_b"], params["w_lin"],
      params["b_lin"], params["bnh_g"], params["bnh_b"])


# ---------------------------------------------------------------------------
# Forward pass
# ---------------------------------------------------------------------------
def resgcn_forward(x_pad, adj_blocks, pool_pad, bids, cols, cnt, params,
                   *, n_true, num_graphs, tm, tk):
    n_pad = x_pad.shape[0]
    # x = relu(conv_feat(bn_feat(x)))   (gfn conv_feat: matmul only, no bias)
    stats = col_stats(x_pad, tm=tm)
    h, stats = bn_matmul(stats, params["bnf_g"], params["bnf_b"], x_pad,
                         params["w_feat"], n_true=n_true, tm=tm, relu=True)
    # ResGCNConv stack (conv_residual=False): h = relu(A_norm @ (bn(h) @ W) + b)
    for i in range(NUM_CONV):
        m, _ = bn_matmul(stats, params["bnc_g"][i], params["bnc_b"][i], h,
                         params["w_conv"][i], n_true=n_true, tm=tm, relu=False)
        h, stats = spmm_relu(adj_blocks, m, params["b_conv"][i], bids, cols, cnt,
                             n_true=n_true, n_pad=n_pad, tm=tm, tk=tk)
    local_rep = h
    graph_out = tail(pool_pad, h, params, num_graphs=num_graphs, tm=tm,
                     n_pad=n_pad)
    return graph_out, local_rep


# ---------------------------------------------------------------------------
# Plain-JAX / NumPy glue (graph preprocessing, not the hot path)
# ---------------------------------------------------------------------------
def gcn_norm_adj(edge_index, num_nodes):
    """ResGCNConv.norm() + 'add' propagation folded into a dense matrix."""
    src, dst = edge_index[0], edge_index[1]
    # remove_self_loops (weight 0 == removed), then add_self_loops with weight 1
    ew = jnp.where(src != dst, 1.0, 0.0).astype(jnp.float32)
    loop = jnp.arange(num_nodes, dtype=edge_index.dtype)
    row = jnp.concatenate([src, loop])
    col = jnp.concatenate([dst, loop])
    w = jnp.concatenate([ew, jnp.ones((num_nodes,), jnp.float32)])
    deg = jnp.zeros((num_nodes,), jnp.float32).at[row].add(w)
    dis = jnp.where(deg > 0, jax.lax.rsqrt(jnp.maximum(deg, 1e-12)), 0.0)
    norm = dis[row] * w * dis[col]
    # message x_j flows source(row) -> target(col): out[col] += norm * x[row]
    return jnp.zeros((num_nodes, num_nodes), jnp.float32).at[col, row].add(norm)


def build_sparse_adj(adj, n_true, n_pad, tm, tk):
    """Compact the padded adjacency to block-major (nnz_blocks, tm, tk) plus
    per-row-tile (flat block id, column block id, count) tables."""
    nrt, nkt = n_pad // tm, n_pad // tk
    a = np.zeros((n_pad, n_pad), np.float32)
    a[:n_true, :n_true] = np.asarray(adj)
    blocks4 = a.reshape(nrt, tm, nkt, tk).transpose(0, 2, 1, 3)   # (nrt,nkt,tm,tk)
    nz = blocks4.any(axis=(2, 3))
    for i in range(nrt):                      # keep every output row tile defined
        if not nz[i].any():
            nz[i, 0] = True
    cnt = nz.sum(axis=1).astype(np.int32)
    maxb = int(cnt.max())
    bids = np.zeros((nrt, maxb), np.int32)
    cols = np.zeros((nrt, maxb), np.int32)
    flat = []
    for i in range(nrt):
        nzi = np.nonzero(nz[i])[0]
        for k, c in enumerate(nzi):
            bids[i, k] = len(flat)
            cols[i, k] = c
            flat.append(blocks4[i, c])
        # padded slots repeat the last valid block: same block index => no
        # refetch, and the compute is skipped via cnt in the kernel.
        bids[i, len(nzi):] = bids[i, len(nzi) - 1]
        cols[i, len(nzi):] = cols[i, len(nzi) - 1]
    adj_blocks = jnp.asarray(np.stack(flat), dtype=jnp.bfloat16)
    return adj_blocks, jnp.asarray(bids), jnp.asarray(cols), jnp.asarray(cnt)


def glorot(key, fan_in, fan_out):
    a = (6.0 / (fan_in + fan_out)) ** 0.5
    return jax.random.uniform(key, (fan_in, fan_out), jnp.float32, -a, a)


def _pad2(a, rows, cols):
    return jnp.pad(a, ((0, rows - a.shape[0]), (0, cols - a.shape[1])))


def init_params(key, feat_dim, hidden, feat_pad, hidden_pad):
    ks = jax.random.split(key, NUM_CONV + 3)
    bn_g = lambda d, dp: _pad2(jnp.ones((1, d), jnp.float32), 1, dp)
    bn_b = lambda d, dp: _pad2(jnp.full((1, d), 1e-4, jnp.float32), 1, dp)
    w_conv = jnp.stack(
        [_pad2(glorot(ks[1 + i], hidden, hidden), hidden_pad, hidden_pad)
         for i in range(NUM_CONV)]).astype(jnp.bfloat16)
    return dict(
        bnf_g=bn_g(feat_dim, feat_pad), bnf_b=bn_b(feat_dim, feat_pad),
        w_feat=_pad2(glorot(ks[0], feat_dim, hidden),
                     feat_pad, hidden_pad).astype(jnp.bfloat16),
        bnc_g=jnp.stack([bn_g(hidden, hidden_pad)] * NUM_CONV),
        bnc_b=jnp.stack([bn_b(hidden, hidden_pad)] * NUM_CONV),
        w_conv=w_conv,
        b_conv=jnp.zeros((NUM_CONV, 1, hidden_pad), jnp.float32),  # zeros(self.bias)
        bnfc_g=bn_g(hidden, hidden_pad), bnfc_b=bn_b(hidden, hidden_pad),
        w_lin=_pad2(glorot(ks[NUM_CONV + 1], hidden, hidden),
                    hidden_pad, hidden_pad).astype(jnp.bfloat16),
        b_lin=_pad2(jax.random.uniform(ks[NUM_CONV + 2], (1, hidden),
                                       jnp.float32, -0.1, 0.1), 1, hidden_pad),
        bnh_g=bn_g(hidden, hidden_pad), bnh_b=bn_b(hidden, hidden_pad),
    )


if __name__ == "__main__":
    FEAT, HIDDEN = 16, 32
    TM = TK = 256                          # v6e/v7x MXU width; use 128 on v5e
    ring_sizes = (128, 128, 60)            # 3 graphs; last one exercises row padding
    N = sum(ring_sizes)                    # 316 nodes
    G = len(ring_sizes)
    nrt = -(-N // TM)
    nrt = _round_up(nrt, 2)                # v7x megacore balance: even row-tile count
    N_PAD = nrt * TM                       # 512
    FEAT_PAD = _round_up(FEAT, LANES)      # 128 lanes
    HIDDEN_PAD = _round_up(HIDDEN, LANES)
    G_PAD = _round_up(G, 8)                # pad graph rows to a full sublane

    key = jax.random.PRNGKey(0)
    kx, kp = jax.random.split(key)
    x = jax.random.normal(kx, (N, FEAT), jnp.float32)
    x_pad = (jnp.zeros((N_PAD, FEAT_PAD), jnp.bfloat16)
             .at[:N, :FEAT].set(x.astype(jnp.bfloat16)))

    # bidirectional ring graphs + one explicit self-loop (exercises remove_self_loops)
    edges, batch_list, off = [], [], 0
    for gidx, sz in enumerate(ring_sizes):
        for i in range(sz):
            a, b = off + i, off + (i + 1) % sz
            edges.append((a, b))
            edges.append((b, a))
        batch_list += [gidx] * sz
        off += sz
    edges.append((0, 0))
    edge_index = jnp.array(edges, dtype=jnp.int32).T          # (2, E)
    batch = jnp.array(batch_list, dtype=jnp.int32)             # (N,)

    adj = gcn_norm_adj(edge_index, N)                          # (N, N) f32
    adj_blocks, bids, cols, cnt = build_sparse_adj(adj, N, N_PAD, TM, TK)

    pool = (jnp.arange(G, dtype=jnp.int32)[:, None]
            == batch[None, :]).astype(jnp.float32)
    pool_pad = (jnp.zeros((G_PAD, N_PAD), jnp.bfloat16)
                .at[:G, :N].set(pool.astype(jnp.bfloat16)))

    params = init_params(kp, FEAT, HIDDEN, FEAT_PAD, HIDDEN_PAD)

    fwd = jax.jit(functools.partial(resgcn_forward, n_true=N, num_graphs=G,
                                    tm=TM, tk=TK))
    graph_out_p, local_rep_p = fwd(x_pad, adj_blocks, pool_pad, bids, cols, cnt,
                                   params)
    graph_out = graph_out_p[:G, :HIDDEN]
    local_rep = local_rep_p[:N, :HIDDEN].astype(jnp.float32)
    jax.block_until_ready((graph_out, local_rep))

    assert graph_out.shape == (G, HIDDEN) and local_rep.shape == (N, HIDDEN)
    assert bool(jnp.all(jnp.isfinite(graph_out)))
    assert bool(jnp.all(jnp.isfinite(local_rep)))
    print("KERNEL_OK")
</pallas_src>

<mosaic_0001>
module attributes {stable_mosaic.version = 11 : i64} {
  func.func @col_stats_kernel(%arg0: i32, %arg1: memref<256x128xbf16, #tpu.memory_space<vmem>>, %arg2: memref<2x128xf32, #tpu.memory_space<vmem>>) attributes {dimension_semantics = [#tpu.dimension_semantics<arbitrary>], iteration_bounds = array<i64: 2>, scalar_prefetch = 0 : i64, scratch_operands = 0 : i64, tpu.core_type = #tpu.core_type<tc>, window_params = [{transform_indices = @transform_0, window_bounds = array<i64: 256, 128>}, {pipeline_mode = #tpu.pipeline_mode<synchronous>, transform_indices = @transform_1, window_bounds = array<i64: 2, 128>}]} {
    %c0_i32 = arith.constant 0 : i32
    %0 = arith.cmpi eq, %arg0, %c0_i32 : i32
    %1 = arith.extui %0 : i1 to i32
    %c0_i32_0 = arith.constant 0 : i32
    %2 = arith.cmpi ne, %1, %c0_i32_0 : i32
    scf.if %2 {
      %cst_7 = arith.constant 0.000000e+00 : f32
      %14 = vector.broadcast %cst_7 : f32 to vector<2x128xf32>
      %c0_8 = arith.constant 0 : index
      %c0_9 = arith.constant 0 : index
      %15 = vector.load %arg2[%c0_8, %c0_9] : memref<2x128xf32, #tpu.memory_space<vmem>>, vector<2x128xf32>
      tpu.vector_store %arg2[%c0_8, %c0_9], %14 {strides = array<i32>} : memref<2x128xf32, #tpu.memory_space<vmem>>, vector<2x128xf32>,
    } else {
    }
    %c0 = arith.constant 0 : index
    %c0_1 = arith.constant 0 : index
    %3 = vector.load %arg1[%c0, %c0_1] : memref<256x128xbf16, #tpu.memory_space<vmem>>, vector<256x128xbf16>
    %4 = arith.extf %3 : vector<256x128xbf16> to vector<256x128xf32>
    %cst = arith.constant dense<0.000000e+00> : vector<128xf32>
    %5 = vector.multi_reduction <add>, %4, %cst [0] : vector<256x128xf32> to vector<128xf32>
    %6 = vector.shape_cast %5 : vector<128xf32> to vector<1x128xf32>
    %7 = arith.mulf %4, %4 : vector<256x128xf32>
    %cst_2 = arith.constant dense<0.000000e+00> : vector<128xf32>
    %8 = vector.multi_reduction <add>, %7, %cst_2 [0] : vector<256x128xf32> to vector<128xf32>
    %9 = vector.shape_cast %8 : vector<128xf32> to vector<1x128xf32>
    %c0_3 = arith.constant 0 : index
    %c0_4 = arith.constant 0 : index
    %10 = vector.load %arg2[%c0_3, %c0_4] : memref<2x128xf32, #tpu.memory_space<vmem>>, vector<2x128xf32>
    %11 = tpu.concatenate %6, %9 in 0 : vector<1x128xf32>, vector<1x128xf32> -> vector<2x128xf32>
    %12 = arith.addf %10, %11 : vector<2x128xf32>
    %c0_5 = arith.constant 0 : index
    %c0_6 = arith.constant 0 : index
    %13 = vector.load %arg2[%c0_5, %c0_6] : memref<2x128xf32, #tpu.memory_space<vmem>>, vector<2x128xf32>
    tpu.vector_store %arg2[%c0_5, %c0_6], %12 {strides = array<i32>} : memref<2x128xf32, #tpu.memory_space<vmem>>, vector<2x128xf32>,
    return
  }
  func.func @transform_0(%arg0: i32) -> (i32, i32) {
    %c0_i32 = arith.constant 0 : i32
    %c0_i32_0 = arith.constant 0 : i32
    return %arg0, %c0_i32 : i32, i32
  }
  func.func @transform_1(%arg0: i32) -> (i32, i32) {
    %c0_i32 = arith.constant 0 : i32
    %c0_i32_0 = arith.constant 0 : i32
    %c0_i32_1 = arith.constant 0 : i32
    return %c0_i32, %c0_i32_0 : i32, i32
  }
}

module attributes {stable_mosaic.version = 11 : i64} {
  func.func @bn_matmul_kernel(%arg0: i32, %arg1: memref<2x128xf32, #tpu.memory_space<vmem>>, %arg2: memref<1x128xf32, #tpu.memory_space<vmem>>, %arg3: memref<1x128xf32, #tpu.memory_space<vmem>>, %arg4: memref<256x128xbf16, #tpu.memory_space<vmem>>, %arg5: memref<128x128xbf16, #tpu.memory_space<vmem>>, %arg6: memref<256x128xbf16, #tpu.memory_space<vmem>>, %arg7: memref<1x2x128xf32, #tpu.memory_space<vmem>>) attributes {dimension_semantics = [#tpu.dimension_semantics<parallel>], iteration_bounds = array<i64: 2>, scalar_prefetch = 0 : i64, scratch_operands = 0 : i64, tpu.core_type = #tpu.core_type<tc>, window_params = [{pipeline_mode = #tpu.pipeline_mode<synchronous>, transform_indices = @transform_0, window_bounds = array<i64: 2, 128>}, {pipeline_mode = #tpu.pipeline_mode<synchronous>, transform_indices = @transform_1, window_bounds = array<i64: 1, 128>}, {pipeline_mode = #tpu.pipeline_mode<synchronous>, transform_indices = @transform_2, window_bounds = array<i64: 1, 128>}, {transform_indices = @transform_3, window_bounds = array<i64: 256, 128>}, {pipeline_mode = #tpu.pipeline_mode<synchronous>, transform_indices = @transform_4, window_bounds = array<i64: 128, 128>}, {transform_indices = @transform_5, window_bounds = array<i64: 256, 128>}, {transform_indices = @transform_6, window_bounds = array<i64: 1, 2, 128>}]} {
    %c0 = arith.constant 0 : index
    %c0_0 = arith.constant 0 : index
    %0 = vector.load %arg1[%c0, %c0_0] : memref<2x128xf32, #tpu.memory_space<vmem>>, vector<1x128xf32>
    %cst = arith.constant 0.00316455704 : f32
    %1 = vector.broadcast %cst : f32 to vector<1x128xf32>
    %2 = arith.mulf %0, %1 : vector<1x128xf32>
    %c1 = arith.constant 1 : index
    %c0_1 = arith.constant 0 : index
    %3 = vector.load %arg1[%c1, %c0_1] : memref<2x128xf32, #tpu.memory_space<vmem>>, vector<1x128xf32>
    %cst_2 = arith.constant 0.00316455704 : f32
    %4 = vector.broadcast %cst_2 : f32 to vector<1x128xf32>
    %5 = arith.mulf %3, %4 : vector<1x128xf32>
    %6 = arith.mulf %2, %2 : vector<1x128xf32>
    %7 = arith.subf %5, %6 : vector<1x128xf32>
    %cst_3 = arith.constant 0.000000e+00 : f32
    %8 = vector.broadcast %cst_3 : f32 to vector<1x128xf32>
    %9 = arith.maximumf %7, %8 : vector<1x128xf32>
    %c0_4 = arith.constant 0 : index
    %c0_5 = arith.constant 0 : index
    %10 = vector.load %arg2[%c0_4, %c0_5] : memref<1x128xf32, #tpu.memory_space<vmem>>, vector<1x128xf32>
    %cst_6 = arith.constant 9.99999974E-6 : f32
    %11 = vector.broadcast %cst_6 : f32 to vector<1x128xf32>
    %12 = arith.addf %9, %11 : vector<1x128xf32>
    %13 = math.rsqrt %12 : vector<1x128xf32>
    %14 = arith.mulf %10, %13 : vector<1x128xf32>
    %c0_7 = arith.constant 0 : index
    %c0_8 = arith.constant 0 : index
    %15 = vector.load %arg3[%c0_7, %c0_8] : memref<1x128xf32, #tpu.memory_space<vmem>>, vector<1x128xf32>
    %16 = arith.mulf %2, %14 : vector<1x128xf32>
    %17 = arith.subf %15, %16 : vector<1x128xf32>
    %c0_9 = arith.constant 0 : index
    %c0_10 = arith.constant 0 : index
    %18 = vector.load %arg4[%c0_9, %c0_10] : memref<256x128xbf16, #tpu.memory_space<vmem>>, vector<256x128xbf16>
    %19 = arith.extf %18 : vector<256x128xbf16> to vector<256x128xf32>
    %20 = vector.broadcast %14 : vector<1x128xf32> to vector<256x128xf32>
    %21 = arith.mulf %19, %20 : vector<256x128xf32>
    %22 = vector.broadcast %17 : vector<1x128xf32> to vector<256x128xf32>
    %23 = arith.addf %21, %22 : vector<256x128xf32>
    %24 = arith.truncf %23 : vector<256x128xf32> to vector<256x128xbf16>
    %c0_11 = arith.constant 0 : index
    %c0_12 = arith.constant 0 : index
    %25 = vector.load %arg5[%c0_11, %c0_12] : memref<128x128xbf16, #tpu.memory_space<vmem>>, vector<128x128xbf16>
    %cst_13 = arith.constant dense<0.000000e+00> : vector<256x128xf32>
    %26 = tpu.matmul %24, %25, %cst_13 {dimension_numbers = #tpu.dot_dimension_numbers<[1], [0], [0], [1], [0, 0, 1, 1], [], []>} : vector<256x128xbf16>, vector<128x128xbf16>, vector<256x128xf32> -> vector<256x128xf32>
    %cst_14 = arith.constant 0.000000e+00 : f32
    %27 = vector.broadcast %cst_14 : f32 to vector<256x128xf32>
    %28 = arith.maximumf %26, %27 : vector<256x128xf32>
    %c256_i32 = arith.constant 256 : i32
    %29 = arith.muli %arg0, %c256_i32 : i32
    %30 = tpu.iota {dimensions = array<i32: 0>} : vector<256x1xi32>
    %31 = vector.broadcast %29 : i32 to vector<256x1xi32>
    %32 = arith.addi %31, %30 : vector<256x1xi32>
    %c316_i32 = arith.constant 316 : i32
    %33 = vector.broadcast %c316_i32 : i32 to vector<256x1xi32>
    %34 = arith.cmpi slt, %32, %33 : vector<256x1xi32>
    %cst_15 = arith.constant 0.000000e+00 : f32
    %35 = vector.shape_cast %34 : vector<256x1xi1> to vector<256x1xi1>
    %36 = vector.broadcast %35 : vector<256x1xi1> to vector<256x128xi1>
    %37 = vector.broadcast %cst_15 : f32 to vector<256x128xf32>
    %38 = arith.select %36, %28, %37 : vector<256x128xi1>, vector<256x128xf32>
    %39 = arith.truncf %38 : vector<256x128xf32> to vector<256x128xbf16>
    %c0_16 = arith.constant 0 : index
    %c0_17 = arith.constant 0 : index
    %40 = vector.load %arg6[%c0_16, %c0_17] : memref<256x128xbf16, #tpu.memory_space<vmem>>, vector<256x128xbf16>
    tpu.vector_store %arg6[%c0_16, %c0_17], %39 {strides = array<i32>} : memref<256x128xbf16, #tpu.memory_space<vmem>>, vector<256x128xbf16>,
    %cst_18 = arith.constant dense<0.000000e+00> : vector<128xf32>
    %41 = vector.multi_reduction <add>, %38, %cst_18 [0] : vector<256x128xf32> to vector<128xf32>
    %42 = vector.shape_cast %41 : vector<128xf32> to vector<1x128xf32>
    %43 = arith.mulf %38, %38 : vector<256x128xf32>
    %cst_19 = arith.constant dense<0.000000e+00> : vector<128xf32>
    %44 = vector.multi_reduction <add>, %43, %cst_19 [0] : vector<256x128xf32> to vector<128xf32>
    %45 = vector.shape_cast %44 : vector<128xf32> to vector<1x128xf32>
    %46 = tpu.concatenate %42, %45 in 0 : vector<1x128xf32>, vector<1x128xf32> -> vector<2x128xf32>
    %c0_20 = arith.constant 0 : index
    %c0_21 = arith.constant 0 : index
    %c0_22 = arith.constant 0 : index
    %47 = vector.load %arg7[%c0_20, %c0_21, %c0_22] : memref<1x2x128xf32, #tpu.memory_space<vmem>>, vector<1x2x128xf32>
    %48 = vector.shape_cast %47 : vector<1x2x128xf32> to vector<2x128xf32>
    %49 = vector.shape_cast %46 : vector<2x128xf32> to vector<1x2x128xf32>
    tpu.vector_store %arg7[%c0_20, %c0_21, %c0_22], %49 {strides = array<i32>} : memref<1x2x128xf32, #tpu.memory_space<vmem>>, vector<1x2x128xf32>,
    return
  }
  func.func @transform_0(%arg0: i32) -> (i32, i32) {
    %c0_i32 = arith.constant 0 : i32
    %c0_i32_0 = arith.constant 0 : i32
    %c0_i32_1 = arith.constant 0 : i32
    return %c0_i32, %c0_i32_0 : i32, i32
  }
  func.func @transform_1(%arg0: i32) -> (i32, i32) {
    %c0_i32 = arith.constant 0 : i32
    %c0_i32_0 = arith.constant 0 : i32
    %c0_i32_1 = arith.constant 0 : i32
    return %c0_i32, %c0_i32_0 : i32, i32
  }
  func.func @transform_2(%arg0: i32) -> (i32, i32) {
    %c0_i32 = arith.constant 0 : i32
    %c0_i32_0 = arith.constant 0 : i32
    %c0_i32_1 = arith.constant 0 : i32
    return %c0_i32, %c0_i32_0 : i32, i32
  }
  func.func @transform_3(%arg0: i32) -> (i32, i32) {
    %c0_i32 = arith.constant 0 : i32
    %c0_i32_0 = arith.constant 0 : i32
    return %arg0, %c0_i32 : i32, i32
  }
  func.func @transform_4(%arg0: i32) -> (i32, i32) {
    %c0_i32 = arith.constant 0 : i32
    %c0_i32_0 = arith.constant 0 : i32
    %c0_i32_1 = arith.constant 0 : i32
    return %c0_i32, %c0_i32_0 : i32, i32
  }
  func.func @transform_5(%arg0: i32) -> (i32, i32) {
    %c0_i32 = arith.constant 0 : i32
    %c0_i32_0 = arith.constant 0 : i32
    return %arg0, %c0_i32 : i32, i32
  }
  func.func @transform_6(%arg0: i32) -> (i32, i32, i32) {
    %c0_i32 = arith.constant 0 : i32
    %c0_i32_0 = arith.constant 0 : i32
    %c0_i32_1 = arith.constant 0 : i32
    return %arg0, %c0_i32, %c0_i32_0 : i32, i32, i32
  }
}

module attributes {stable_mosaic.version = 11 : i64} {
  func.func @bn_matmul_kernel(%arg0: i32, %arg1: memref<2x128xf32, #tpu.memory_space<vmem>>, %arg2: memref<1x128xf32, #tpu.memory_space<vmem>>, %arg3: memref<1x128xf32, #tpu.memory_space<vmem>>, %arg4: memref<256x128xbf16, #tpu.memory_space<vmem>>, %arg5: memref<128x128xbf16, #tpu.memory_space<vmem>>, %arg6: memref<256x128xbf16, #tpu.memory_space<vmem>>, %arg7: memref<1x2x128xf32, #tpu.memory_space<vmem>>) attributes {dimension_semantics = [#tpu.dimension_semantics<parallel>], iteration_bounds = array<i64: 2>, scalar_prefetch = 0 : i64, scratch_operands = 0 : i64, tpu.core_type = #tpu.core_type<tc>, window_params = [{pipeline_mode = #tpu.pipeline_mode<synchronous>, transform_indices = @transform_0, window_bounds = array<i64: 2, 128>}, {pipeline_mode = #tpu.pipeline_mode<synchronous>, transform_indices = @transform_1, window_bounds = array<i64: 1, 128>}, {pipeline_mode = #tpu.pipeline_mode<synchronous>, transform_indices = @transform_2, window_bounds = array<i64: 1, 128>}, {transform_indices = @transform_3, window_bounds = array<i64: 256, 128>}, {pipeline_mode = #tpu.pipeline_mode<synchronous>, transform_indices = @transform_4, window_bounds = array<i64: 128, 128>}, {transform_indices = @transform_5, window_bounds = array<i64: 256, 128>}, {transform_indices = @transform_6, window_bounds = array<i64: 1, 2, 128>}]} {
    %c0 = arith.constant 0 : index
    %c0_0 = arith.constant 0 : index
    %0 = vector.load %arg1[%c0, %c0_0] : memref<2x128xf32, #tpu.memory_space<vmem>>, vector<1x128xf32>
    %cst = arith.constant 0.00316455704 : f32
    %1 = vector.broadcast %cst : f32 to vector<1x128xf32>
    %2 = arith.mulf %0, %1 : vector<1x128xf32>
    %c1 = arith.constant 1 : index
    %c0_1 = arith.constant 0 : index
    %3 = vector.load %arg1[%c1, %c0_1] : memref<2x128xf32, #tpu.memory_space<vmem>>, vector<1x128xf32>
    %cst_2 = arith.constant 0.00316455704 : f32
    %4 = vector.broadcast %cst_2 : f32 to vector<1x128xf32>
    %5 = arith.mulf %3, %4 : vector<1x128xf32>
    %6 = arith.mulf %2, %2 : vector<1x128xf32>
    %7 = arith.subf %5, %6 : vector<1x128xf32>
    %cst_3 = arith.constant 0.000000e+00 : f32
    %8 = vector.broadcast %cst_3 : f32 to vector<1x128xf32>
    %9 = arith.maximumf %7, %8 : vector<1x128xf32>
    %c0_4 = arith.constant 0 : index
    %c0_5 = arith.constant 0 : index
    %10 = vector.load %arg2[%c0_4, %c0_5] : memref<1x128xf32, #tpu.memory_space<vmem>>, vector<1x128xf32>
    %cst_6 = arith.constant 9.99999974E-6 : f32
    %11 = vector.broadcast %cst_6 : f32 to vector<1x128xf32>
    %12 = arith.addf %9, %11 : vector<1x128xf32>
    %13 = math.rsqrt %12 : vector<1x128xf32>
    %14 = arith.mulf %10, %13 : vector<1x128xf32>
    %c0_7 = arith.constant 0 : index
    %c0_8 = arith.constant 0 : index
    %15 = vector.load %arg3[%c0_7, %c0_8] : memref<1x128xf32, #tpu.memory_space<vmem>>, vector<1x128xf32>
    %16 = arith.mulf %2, %14 : vector<1x128xf32>
    %17 = arith.subf %15, %16 : vector<1x128xf32>
    %c0_9 = arith.constant 0 : index
    %c0_10 = arith.constant 0 : index
    %18 = vector.load %arg4[%c0_9, %c0_10] : memref<256x128xbf16, #tpu.memory_space<vmem>>, vector<256x128xbf16>
    %19 = arith.extf %18 : vector<256x128xbf16> to vector<256x128xf32>
    %20 = vector.broadcast %14 : vector<1x128xf32> to vector<256x128xf32>
    %21 = arith.mulf %19, %20 : vector<256x128xf32>
    %22 = vector.broadcast %17 : vector<1x128xf32> to vector<256x128xf32>
    %23 = arith.addf %21, %22 : vector<256x128xf32>
    %24 = arith.truncf %23 : vector<256x128xf32> to vector<256x128xbf16>
    %c0_11 = arith.constant 0 : index
    %c0_12 = arith.constant 0 : index
    %25 = vector.load %arg5[%c0_11, %c0_12] : memref<128x128xbf16, #tpu.memory_space<vmem>>, vector<128x128xbf16>
    %cst_13 = arith.constant dense<0.000000e+00> : vector<256x128xf32>
    %26 = tpu.matmul %24, %25, %cst_13 {dimension_numbers = #tpu.dot_dimension_numbers<[1], [0], [0], [1], [0, 0, 1, 1], [], []>} : vector<256x128xbf16>, vector<128x128xbf16>, vector<256x128xf32> -> vector<256x128xf32>
    %c256_i32 = arith.constant 256 : i32
    %27 = arith.muli %arg0, %c256_i32 : i32
    %28 = tpu.iota {dimensions = array<i32: 0>} : vector<256x1xi32>
    %29 = vector.broadcast %27 : i32 to vector<256x1xi32>
    %30 = arith.addi %29, %28 : vector<256x1xi32>
    %c316_i32 = arith.constant 316 : i32
    %31 = vector.broadcast %c316_i32 : i32 to vector<256x1xi32>
    %32 = arith.cmpi slt, %30, %31 : vector<256x1xi32>
    %cst_14 = arith.constant 0.000000e+00 : f32
    %33 = vector.shape_cast %32 : vector<256x1xi1> to vector<256x1xi1>
    %34 = vector.broadcast %33 : vector<256x1xi1> to vector<256x128xi1>
    %35 = vector.broadcast %cst_14 : f32 to vector<256x128xf32>
    %36 = arith.select %34, %26, %35 : vector<256x128xi1>, vector<256x128xf32>
    %37 = arith.truncf %36 : vector<256x128xf32> to vector<256x128xbf16>
    %c0_15 = arith.constant 0 : index
    %c0_16 = arith.constant 0 : index
    %38 = vector.load %arg6[%c0_15, %c0_16] : memref<256x128xbf16, #tpu.memory_space<vmem>>, vector<256x128xbf16>
    tpu.vector_store %arg6[%c0_15, %c0_16], %37 {strides = array<i32>} : memref<256x128xbf16, #tpu.memory_space<vmem>>, vector<256x128xbf16>,
    %cst_17 = arith.constant dense<0.000000e+00> : vector<128xf32>
    %39 = vector.multi_reduction <add>, %36, %cst_17 [0] : vector<256x128xf32> to vector<128xf32>
    %40 = vector.shape_cast %39 : vector<128xf32> to vector<1x128xf32>
    %41 = arith.mulf %36, %36 : vector<256x128xf32>
    %cst_18 = arith.constant dense<0.000000e+00> : vector<128xf32>
    %42 = vector.multi_reduction <add>, %41, %cst_18 [0] : vector<256x128xf32> to vector<128xf32>
    %43 = vector.shape_cast %42 : vector<128xf32> to vector<1x128xf32>
    %44 = tpu.concatenate %40, %43 in 0 : vector<1x128xf32>, vector<1x128xf32> -> vector<2x128xf32>
    %c0_19 = arith.constant 0 : index
    %c0_20 = arith.constant 0 : index
    %c0_21 = arith.constant 0 : index
    %45 = vector.load %arg7[%c0_19, %c0_20, %c0_21] : memref<1x2x128xf32, #tpu.memory_space<vmem>>, vector<1x2x128xf32>
    %46 = vector.shape_cast %45 : vector<1x2x128xf32> to vector<2x128xf32>
    %47 = vector.shape_cast %44 : vector<2x128xf32> to vector<1x2x128xf32>
    tpu.vector_store %arg7[%c0_19, %c0_20, %c0_21], %47 {strides = array<i32>} : memref<1x2x128xf32, #tpu.memory_space<vmem>>, vector<1x2x128xf32>,
    return
  }
  func.func @transform_0(%arg0: i32) -> (i32, i32) {
    %c0_i32 = arith.constant 0 : i32
    %c0_i32_0 = arith.constant 0 : i32
    %c0_i32_1 = arith.constant 0 : i32
    return %c0_i32, %c0_i32_0 : i32, i32
  }
  func.func @transform_1(%arg0: i32) -> (i32, i32) {
    %c0_i32 = arith.constant 0 : i32
    %c0_i32_0 = arith.constant 0 : i32
    %c0_i32_1 = arith.constant 0 : i32
    return %c0_i32, %c0_i32_0 : i32, i32
  }
  func.func @transform_2(%arg0: i32) -> (i32, i32) {
    %c0_i32 = arith.constant 0 : i32
    %c0_i32_0 = arith.constant 0 : i32
    %c0_i32_1 = arith.constant 0 : i32
    return %c0_i32, %c0_i32_0 : i32, i32
  }
  func.func @transform_3(%arg0: i32) -> (i32, i32) {
    %c0_i32 = arith.constant 0 : i32
    %c0_i32_0 = arith.constant 0 : i32
    return %arg0, %c0_i32 : i32, i32
  }
  func.func @transform_4(%arg0: i32) -> (i32, i32) {
    %c0_i32 = arith.constant 0 : i32
    %c0_i32_0 = arith.constant 0 : i32
    %c0_i32_1 = arith.constant 0 : i32
    return %c0_i32, %c0_i32_0 : i32, i32
  }
  func.func @transform_5(%arg0: i32) -> (i32, i32) {
    %c0_i32 = arith.constant 0 : i32
    %c0_i32_0 = arith.constant 0 : i32
    return %arg0, %c0_i32 : i32, i32
  }
  func.func @transform_6(%arg0: i32) -> (i32, i32, i32) {
    %c0_i32 = arith.constant 0 : i32
    %c0_i32_0 = arith.constant 0 : i32
    %c0_i32_1 = arith.constant 0 : i32
    return %arg0, %c0_i32, %c0_i32_0 : i32, i32, i32
  }
}

module attributes {stable_mosaic.version = 11 : i64} {
  func.func @spmm_kernel(%arg0: i32, %arg1: i32, %arg2: memref<2x1xi32, #tpu.memory_space<smem>>, %arg3: memref<2x1xi32, #tpu.memory_space<smem>>, %arg4: memref<2xi32, #tpu.memory_space<smem>>, %arg5: memref<1x256x256xbf16, #tpu.memory_space<vmem>>, %arg6: memref<512x128xbf16, #tpu.memory_space<vmem>>, %arg7: memref<1x128xf32, #tpu.memory_space<vmem>>, %arg8: memref<256x128xbf16, #tpu.memory_space<vmem>>, %arg9: memref<1x2x128xf32, #tpu.memory_space<vmem>>, %arg10: memref<256x128xf32, #tpu.memory_space<vmem>>) attributes {dimension_semantics = [#tpu.dimension_semantics<parallel>, #tpu.dimension_semantics<arbitrary>], iteration_bounds = array<i64: 2, 1>, scalar_prefetch = 3 : i64, scratch_operands = 1 : i64, tpu.core_type = #tpu.core_type<tc>, window_params = [{transform_indices = @transform_0, window_bounds = array<i64: 1, 256, 256>}, {pipeline_mode = #tpu.pipeline_mode<synchronous>, transform_indices = @transform_1, window_bounds = array<i64: 512, 128>}, {pipeline_mode = #tpu.pipeline_mode<synchronous>, transform_indices = @transform_2, window_bounds = array<i64: 1, 128>}, {transform_indices = @transform_3, window_bounds = array<i64: 256, 128>}, {transform_indices = @transform_4, window_bounds = array<i64: 1, 2, 128>}]} {
    %c0_i32 = arith.constant 0 : i32
    %0 = arith.cmpi eq, %arg1, %c0_i32 : i32
    %1 = arith.extui %0 : i1 to i32
    %c0_i32_0 = arith.constant 0 : i32
    %2 = arith.cmpi ne, %1, %c0_i32_0 : i32
    scf.if %2 {
      %cst = arith.constant 0.000000e+00 : f32
      %11 = vector.broadcast %cst : f32 to vector<256x128xf32>
      %c0 = arith.constant 0 : index
      %c0_4 = arith.constant 0 : index
      %12 = vector.load %arg10[%c0, %c0_4] : memref<256x128xf32, #tpu.memory_space<vmem>>, vector<256x128xf32>
      tpu.vector_store %arg10[%c0, %c0_4], %11 {strides = array<i32>} : memref<256x128xf32, #tpu.memory_space<vmem>>, vector<256x128xf32>,
    } else {
    }
    %3 = arith.index_cast %arg0 : i32 to index
    %4 = memref.load %arg4[%3] : memref<2xi32, #tpu.memory_space<smem>>
    %5 = arith.cmpi slt, %arg1, %4 : i32
    %6 = arith.extui %5 : i1 to i32
    %c0_i32_1 = arith.constant 0 : i32
    %7 = arith.cmpi ne, %6, %c0_i32_1 : i32
    scf.if %7 {
      %11 = arith.index_cast %arg0 : i32 to index
      %12 = arith.index_cast %arg1 : i32 to index
      %13 = memref.load %arg3[%11, %12] : memref<2x1xi32, #tpu.memory_space<smem>>
      %c256_i32 = arith.constant 256 : i32
      %14 = arith.muli %13, %c256_i32 : i32
      %15 = tpu.assume_multiple %14, 256 : i32
      %c0 = arith.constant 0 : index
      %c0_4 = arith.constant 0 : index
      %16 = vector.load %arg10[%c0, %c0_4] : memref<256x128xf32, #tpu.memory_space<vmem>>, vector<256x128xf32>
      %c0_5 = arith.constant 0 : index
      %c0_6 = arith.constant 0 : index
      %c0_7 = arith.constant 0 : index
      %17 = vector.load %arg5[%c0_5, %c0_6, %c0_7] : memref<1x256x256xbf16, #tpu.memory_space<vmem>>, vector<1x256x256xbf16>
      %18 = vector.shape_cast %17 : vector<1x256x256xbf16> to vector<256x256xbf16>
      %19 = arith.index_cast %15 : i32 to index
      %c0_8 = arith.constant 0 : index
      %20 = vector.load %arg6[%19, %c0_8] : memref<512x128xbf16, #tpu.memory_space<vmem>>, vector<256x128xbf16>
      %cst = arith.constant dense<0.000000e+00> : vector<256x128xf32>
      %21 = tpu.matmul %18, %20, %cst {dimension_numbers = #tpu.dot_dimension_numbers<[1], [0], [0], [1], [0, 0, 1, 1], [], []>} : vector<256x256xbf16>, vector<256x128xbf16>, vector<256x128xf32> -> vector<256x128xf32>
      %22 = arith.addf %16, %21 : vector<256x128xf32>
      %c0_9 = arith.constant 0 : index
      %c0_10 = arith.constant 0 : index
      %23 = vector.load %arg10[%c0_9, %c0_10] : memref<256x128xf32, #tpu.memory_space<vmem>>, vector<256x128xf32>
      tpu.vector_store %arg10[%c0_9, %c0_10], %22 {strides = array<i32>} : memref<256x128xf32, #tpu.memory_space<vmem>>, vector<256x128xf32>,
    } else {
    }
    %c0_i32_2 = arith.constant 0 : i32
    %8 = arith.cmpi eq, %arg1, %c0_i32_2 : i32
    %9 = arith.extui %8 : i1 to i32
    %c0_i32_3 = arith.constant 0 : i32
    %10 = arith.cmpi ne, %9, %c0_i32_3 : i32
    scf.if %10 {
      %c256_i32 = arith.constant 256 : i32
      %11 = arith.muli %arg0, %c256_i32 : i32
      %12 = tpu.iota {dimensions = array<i32: 0>} : vector<256x1xi32>
      %13 = vector.broadcast %11 : i32 to vector<256x1xi32>
      %14 = arith.addi %13, %12 : vector<256x1xi32>
      %c0 = arith.constant 0 : index
      %c0_4 = arith.constant 0 : index
      %15 = vector.load %arg10[%c0, %c0_4] : memref<256x128xf32, #tpu.memory_space<vmem>>, vector<256x128xf32>
      %c0_5 = arith.constant 0 : index
      %c0_6 = arith.constant 0 : index
      %16 = vector.load %arg7[%c0_5, %c0_6] : memref<1x128xf32, #tpu.memory_space<vmem>>, vector<1x128xf32>
      %17 = vector.broadcast %16 : vector<1x128xf32> to vector<256x128xf32>
      %18 = arith.addf %15, %17 : vector<256x128xf32>
      %cst = arith.constant 0.000000e+00 : f32
      %19 = vector.broadcast %cst : f32 to vector<256x128xf32>
      %20 = arith.maximumf %18, %19 : vector<256x128xf32>
      %c316_i32 = arith.constant 316 : i32
      %21 = vector.broadcast %c316_i32 : i32 to vector<256x1xi32>
      %22 = arith.cmpi slt, %14, %21 : vector<256x1xi32>
      %cst_7 = arith.constant 0.000000e+00 : f32
      %23 = vector.shape_cast %22 : vector<256x1xi1> to vector<256x1xi1>
      %24 = vector.broadcast %23 : vector<256x1xi1> to vector<256x128xi1>
      %25 = vector.broadcast %cst_7 : f32 to vector<256x128xf32>
      %26 = arith.select %24, %20, %25 : vector<256x128xi1>, vector<256x128xf32>
      %27 = arith.truncf %26 : vector<256x128xf32> to vector<256x128xbf16>
      %c0_8 = arith.constant 0 : index
      %c0_9 = arith.constant 0 : index
      %28 = vector.load %arg8[%c0_8, %c0_9] : memref<256x128xbf16, #tpu.memory_space<vmem>>, vector<256x128xbf16>
      tpu.vector_store %arg8[%c0_8, %c0_9], %27 {strides = array<i32>} : memref<256x128xbf16, #tpu.memory_space<vmem>>, vector<256x128xbf16>,
      %cst_10 = arith.constant dense<0.000000e+00> : vector<128xf32>
      %29 = vector.multi_reduction <add>, %26, %cst_10 [0] : vector<256x128xf32> to vector<128xf32>
      %30 = vector.shape_cast %29 : vector<128xf32> to vector<1x128xf32>
      %31 = arith.mulf %26, %26 : vector<256x128xf32>
      %cst_11 = arith.constant dense<0.000000e+00> : vector<128xf32>
      %32 = vector.multi_reduction <add>, %31, %cst_11 [0] : vector<256x128xf32> to vector<128xf32>
      %33 = vector.shape_cast %32 : vector<128xf32> to vector<1x128xf32>
      %34 = tpu.concatenate %30, %33 in 0 : vector<1x128xf32>, vector<1x128xf32> -> vector<2x128xf32>
      %c0_12 = arith.constant 0 : index
      %c0_13 = arith.constant 0 : index
      %c0_14 = arith.constant 0 : index
      %35 = vector.load %arg9[%c0_12, %c0_13, %c0_14] : memref<1x2x128xf32, #tpu.memory_space<vmem>>, vector<1x2x128xf32>
      %36 = vector.shape_cast %35 : vector<1x2x128xf32> to vector<2x128xf32>
      %37 = vector.shape_cast %34 : vector<2x128xf32> to vector<1x2x128xf32>
      tpu.vector_store %arg9[%c0_12, %c0_13, %c0_14], %37 {strides = array<i32>} : memref<1x2x128xf32, #tpu.memory_space<vmem>>, vector<1x2x128xf32>,
    } else {
    }
    return
  }
  func.func @transform_0(%arg0: i32, %arg1: i32, %arg2: memref<2x1xi32, #tpu.memory_space<smem>>, %arg3: memref<2x1xi32, #tpu.memory_space<smem>>, %arg4: memref<2xi32, #tpu.memory_space<smem>>) -> (i32, i32, i32) {
    %0 = arith.index_cast %arg0 : i32 to index
    %1 = arith.index_cast %arg1 : i32 to index
    %2 = memref.load %arg2[%0, %1] : memref<2x1xi32, #tpu.memory_space<smem>>
    %c0_i32 = arith.constant 0 : i32
    %c0_i32_0 = arith.constant 0 : i32
    %c0_i32_1 = arith.constant 0 : i32
    return %2, %c0_i32, %c0_i32_0 : i32, i32, i32
  }
  func.func @transform_1(%arg0: i32, %arg1: i32, %arg2: memref<2x1xi32, #tpu.memory_space<smem>>, %arg3: memref<2x1xi32, #tpu.memory_space<smem>>, %arg4: memref<2xi32, #tpu.memory_space<smem>>) -> (i32, i32) {
    %c0_i32 = arith.constant 0 : i32
    %c0_i32_0 = arith.constant 0 : i32
    %c0_i32_1 = arith.constant 0 : i32
    return %c0_i32, %c0_i32_0 : i32, i32
  }
  func.func @transform_2(%arg0: i32, %arg1: i32, %arg2: memref<2x1xi32, #tpu.memory_space<smem>>, %arg3: memref<2x1xi32, #tpu.memory_space<smem>>, %arg4: memref<2xi32, #tpu.memory_space<smem>>) -> (i32, i32) {
    %c0_i32 = arith.constant 0 : i32
    %c0_i32_0 = arith.constant 0 : i32
    %c0_i32_1 = arith.constant 0 : i32
    return %c0_i32, %c0_i32_0 : i32, i32
  }
  func.func @transform_3(%arg0: i32, %arg1: i32, %arg2: memref<2x1xi32, #tpu.memory_space<smem>>, %arg3: memref<2x1xi32, #tpu.memory_space<smem>>, %arg4: memref<2xi32, #tpu.memory_space<smem>>) -> (i32, i32) {
    %c0_i32 = arith.constant 0 : i32
    %c0_i32_0 = arith.constant 0 : i32
    return %arg0, %c0_i32 : i32, i32
  }
  func.func @transform_4(%arg0: i32, %arg1: i32, %arg2: memref<2x1xi32, #tpu.memory_space<smem>>, %arg3: memref<2x1xi32, #tpu.memory_space<smem>>, %arg4: memref<2xi32, #tpu.memory_space<smem>>) -> (i32, i32, i32) {
    %c0_i32 = arith.constant 0 : i32
    %c0_i32_0 = arith.constant 0 : i32
    %c0_i32_1 = arith.constant 0 : i32
    return %arg0, %c0_i32, %c0_i32_0 : i32, i32, i32
  }
}

module attributes {stable_mosaic.version = 11 : i64} {
  func.func @spmm_kernel(%arg0: i32, %arg1: i32, %arg2: memref<2x1xi32, #tpu.memory_space<smem>>, %arg3: memref<2x1xi32, #tpu.memory_space<smem>>, %arg4: memref<2xi32, #tpu.memory_space<smem>>, %arg5: memref<1x256x256xbf16, #tpu.memory_space<vmem>>, %arg6: memref<512x128xbf16, #tpu.memory_space<vmem>>, %arg7: memref<1x128xf32, #tpu.memory_space<vmem>>, %arg8: memref<256x128xbf16, #tpu.memory_space<vmem>>, %arg9: memref<1x2x128xf32, #tpu.memory_space<vmem>>, %arg10: memref<256x128xf32, #tpu.memory_space<vmem>>) attributes {dimension_semantics = [#tpu.dimension_semantics<parallel>, #tpu.dimension_semantics<arbitrary>], iteration_bounds = array<i64: 2, 1>, scalar_prefetch = 3 : i64, scratch_operands = 1 : i64, tpu.core_type = #tpu.core_type<tc>, window_params = [{transform_indices = @transform_0, window_bounds = array<i64: 1, 256, 256>}, {pipeline_mode = #tpu.pipeline_mode<synchronous>, transform_indices = @transform_1, window_bounds = array<i64: 512, 128>}, {pipeline_mode = #tpu.pipeline_mode<synchronous>, transform_indices = @transform_2, window_bounds = array<i64: 1, 128>}, {transform_indices = @transform_3, window_bounds = array<i64: 256, 128>}, {transform_indices = @transform_4, window_bounds = array<i64: 1, 2, 128>}]} {
    %c0_i32 = arith.constant 0 : i32
    %0 = arith.cmpi eq, %arg1, %c0_i32 : i32
    %1 = arith.extui %0 : i1 to i32
    %c0_i32_0 = arith.constant 0 : i32
    %2 = arith.cmpi ne, %1, %c0_i32_0 : i32
    scf.if %2 {
      %cst = arith.constant 0.000000e+00 : f32
      %11 = vector.broadcast %cst : f32 to vector<256x128xf32>
      %c0 = arith.constant 0 : index
      %c0_4 = arith.constant 0 : index
      %12 = vector.load %arg10[%c0, %c0_4] : memref<256x128xf32, #tpu.memory_space<vmem>>, vector<256x128xf32>
      tpu.vector_store %arg10[%c0, %c0_4], %11 {strides = array<i32>} : memref<256x128xf32, #tpu.memory_space<vmem>>, vector<256x128xf32>,
    } else {
    }
    %3 = arith.index_cast %arg0 : i32 to index
    %4 = memref.load %arg4[%3] : memref<2xi32, #tpu.memory_space<smem>>
    %5 = arith.cmpi slt, %arg1, %4 : i32
    %6 = arith.extui %5 : i1 to i32
    %c0_i32_1 = arith.constant 0 : i32
    %7 = arith.cmpi ne, %6, %c0_i32_1 : i32
    scf.if %7 {
      %11 = arith.index_cast %arg0 : i32 to index
      %12 = arith.index_cast %arg1 : i32 to index
      %13 = memref.load %arg3[%11, %12] : memref<2x1xi32, #tpu.memory_space<smem>>
      %c256_i32 = arith.constant 256 : i32
      %14 = arith.muli %13, %c256_i32 : i32
      %15 = tpu.assume_multiple %14, 256 : i32
      %c0 = arith.constant 0 : index
      %c0_4 = arith.constant 0 : index
      %16 = vector.load %arg10[%c0, %c0_4] : memref<256x128xf32, #tpu.memory_space<vmem>>, vector<256x128xf32>
      %c0_5 = arith.constant 0 : index
      %c0_6 = arith.constant 0 : index
      %c0_7 = arith.constant 0 : index
      %17 = vector.load %arg5[%c0_5, %c0_6, %c0_7] : memref<1x256x256xbf16, #tpu.memory_space<vmem>>, vector<1x256x256xbf16>
      %18 = vector.shape_cast %17 : vector<1x256x256xbf16> to vector<256x256xbf16>
      %19 = arith.index_cast %15 : i32 to index
      %c0_8 = arith.constant 0 : index
      %20 = vector.load %arg6[%19, %c0_8] : memref<512x128xbf16, #tpu.memory_space<vmem>>, vector<256x128xbf16>
      %cst = arith.constant dense<0.000000e+00> : vector<256x128xf32>
      %21 = tpu.matmul %18, %20, %cst {dimension_numbers = #tpu.dot_dimension_numbers<[1], [0], [0], [1], [0, 0, 1, 1], [], []>} : vector<256x256xbf16>, vector<256x128xbf16>, vector<256x128xf32> -> vector<256x128xf32>
      %22 = arith.addf %16, %21 : vector<256x128xf32>
      %c0_9 = arith.constant 0 : index
      %c0_10 = arith.constant 0 : index
      %23 = vector.load %arg10[%c0_9, %c0_10] : memref<256x128xf32, #tpu.memory_space<vmem>>, vector<256x128xf32>
      tpu.vector_store %arg10[%c0_9, %c0_10], %22 {strides = array<i32>} : memref<256x128xf32, #tpu.memory_space<vmem>>, vector<256x128xf32>,
    } else {
    }
    %c0_i32_2 = arith.constant 0 : i32
    %8 = arith.cmpi eq, %arg1, %c0_i32_2 : i32
    %9 = arith.extui %8 : i1 to i32
    %c0_i32_3 = arith.constant 0 : i32
    %10 = arith.cmpi ne, %9, %c0_i32_3 : i32
    scf.if %10 {
      %c256_i32 = arith.constant 256 : i32
      %11 = arith.muli %arg0, %c256_i32 : i32
      %12 = tpu.iota {dimensions = array<i32: 0>} : vector<256x1xi32>
      %13 = vector.broadcast %11 : i32 to vector<256x1xi32>
      %14 = arith.addi %13, %12 : vector<256x1xi32>
      %c0 = arith.constant 0 : index
      %c0_4 = arith.constant 0 : index
      %15 = vector.load %arg10[%c0, %c0_4] : memref<256x128xf32, #tpu.memory_space<vmem>>, vector<256x128xf32>
      %c0_5 = arith.constant 0 : index
      %c0_6 = arith.constant 0 : index
      %16 = vector.load %arg7[%c0_5, %c0_6] : memref<1x128xf32, #tpu.memory_space<vmem>>, vector<1x128xf32>
      %17 = vector.broadcast %16 : vector<1x128xf32> to vector<256x128xf32>
      %18 = arith.addf %15, %17 : vector<256x128xf32>
      %cst = arith.constant 0.000000e+00 : f32
      %19 = vector.broadcast %cst : f32 to vector<256x128xf32>
      %20 = arith.maximumf %18, %19 : vector<256x128xf32>
      %c316_i32 = arith.constant 316 : i32
      %21 = vector.broadcast %c316_i32 : i32 to vector<256x1xi32>
      %22 = arith.cmpi slt, %14, %21 : vector<256x1xi32>
      %cst_7 = arith.constant 0.000000e+00 : f32
      %23 = vector.shape_cast %22 : vector<256x1xi1> to vector<256x1xi1>
      %24 = vector.broadcast %23 : vector<256x1xi1> to vector<256x128xi1>
      %25 = vector.broadcast %cst_7 : f32 to vector<256x128xf32>
      %26 = arith.select %24, %20, %25 : vector<256x128xi1>, vector<256x128xf32>
      %27 = arith.truncf %26 : vector<256x128xf32> to vector<256x128xbf16>
      %c0_8 = arith.constant 0 : index
      %c0_9 = arith.constant 0 : index
      %28 = vector.load %arg8[%c0_8, %c0_9] : memref<256x128xbf16, #tpu.memory_space<vmem>>, vector<256x128xbf16>
      tpu.vector_store %arg8[%c0_8, %c0_9], %27 {strides = array<i32>} : memref<256x128xbf16, #tpu.memory_space<vmem>>, vector<256x128xbf16>,
      %cst_10 = arith.constant dense<0.000000e+00> : vector<128xf32>
      %29 = vector.multi_reduction <add>, %26, %cst_10 [0] : vector<256x128xf32> to vector<128xf32>
      %30 = vector.shape_cast %29 : vector<128xf32> to vector<1x128xf32>
      %31 = arith.mulf %26, %26 : vector<256x128xf32>
      %cst_11 = arith.constant dense<0.000000e+00> : vector<128xf32>
      %32 = vector.multi_reduction <add>, %31, %cst_11 [0] : vector<256x128xf32> to vector<128xf32>
      %33 = vector.shape_cast %32 : vector<128xf32> to vector<1x128xf32>
      %34 = tpu.concatenate %30, %33 in 0 : vector<1x128xf32>, vector<1x128xf32> -> vector<2x128xf32>
      %c0_12 = arith.constant 0 : index
      %c0_13 = arith.constant 0 : index
      %c0_14 = arith.constant 0 : index
      %35 = vector.load %arg9[%c0_12, %c0_13, %c0_14] : memref<1x2x128xf32, #tpu.memory_space<vmem>>, vector<1x2x128xf32>
      %36 = vector.shape_cast %35 : vector<1x2x128xf32> to vector<2x128xf32>
      %37 = vector.shape_cast %34 : vector<2x128xf32> to vector<1x2x128xf32>
      tpu.vector_store %arg9[%c0_12, %c0_13, %c0_14], %37 {strides = array<i32>} : memref<1x2x128xf32, #tpu.memory_space<vmem>>, vector<1x2x128xf32>,
    } else {
    }
    return
  }
  func.func @transform_0(%arg0: i32, %arg1: i32, %arg2: memref<2x1xi32, #tpu.memory_space<smem>>, %arg3: memref<2x1xi32, #tpu.memory_space<smem>>, %arg4: memref<2xi32, #tpu.memory_space<smem>>) -> (i32, i32, i32) {
    %0 = arith.index_cast %arg0 : i32 to index
    %1 = arith.index_cast %arg1 : i32 to index
    %2 = memref.load %arg2[%0, %1] : memref<2x1xi32, #tpu.memory_space<smem>>
    %c0_i32 = arith.constant 0 : i32
    %c0_i32_0 = arith.constant 0 : i32
    %c0_i32_1 = arith.constant 0 : i32
    return %2, %c0_i32, %c0_i32_0 : i32, i32, i32
  }
  func.func @transform_1(%arg0: i32, %arg1: i32, %arg2: memref<2x1xi32, #tpu.memory_space<smem>>, %arg3: memref<2x1xi32, #tpu.memory_space<smem>>, %arg4: memref<2xi32, #tpu.memory_space<smem>>) -> (i32, i32) {
    %c0_i32 = arith.constant 0 : i32
    %c0_i32_0 = arith.constant 0 : i32
    %c0_i32_1 = arith.constant 0 : i32
    return %c0_i32, %c0_i32_0 : i32, i32
  }
  func.func @transform_2(%arg0: i32, %arg1: i32, %arg2: memref<2x1xi32, #tpu.memory_space<smem>>, %arg3: memref<2x1xi32, #tpu.memory_space<smem>>, %arg4: memref<2xi32, #tpu.memory_space<smem>>) -> (i32, i32) {
    %c0_i32 = arith.constant 0 : i32
    %c0_i32_0 = arith.constant 0 : i32
    %c0_i32_1 = arith.constant 0 : i32
    return %c0_i32, %c0_i32_0 : i32, i32
  }
  func.func @transform_3(%arg0: i32, %arg1: i32, %arg2: memref<2x1xi32, #tpu.memory_space<smem>>, %arg3: memref<2x1xi32, #tpu.memory_space<smem>>, %arg4: memref<2xi32, #tpu.memory_space<smem>>) -> (i32, i32) {
    %c0_i32 = arith.constant 0 : i32
    %c0_i32_0 = arith.constant 0 : i32
    return %arg0, %c0_i32 : i32, i32
  }
  func.func @transform_4(%arg0: i32, %arg1: i32, %arg2: memref<2x1xi32, #tpu.memory_space<smem>>, %arg3: memref<2x1xi32, #tpu.memory_space<smem>>, %arg4: memref<2xi32, #tpu.memory_space<smem>>) -> (i32, i32, i32) {
    %c0_i32 = arith.constant 0 : i32
    %c0_i32_0 = arith.constant 0 : i32
    %c0_i32_1 = arith.constant 0 : i32
    return %arg0, %c0_i32, %c0_i32_0 : i32, i32, i32
  }
}

module attributes {stable_mosaic.version = 11 : i64} {
  func.func @tail_kernel(%arg0: i32, %arg1: memref<8x256xbf16, #tpu.memory_space<vmem>>, %arg2: memref<256x128xbf16, #tpu.memory_space<vmem>>, %arg3: memref<1x128xf32, #tpu.memory_space<vmem>>, %arg4: memref<1x128xf32, #tpu.memory_space<vmem>>, %arg5: memref<128x128xbf16, #tpu.memory_space<vmem>>, %arg6: memref<1x128xf32, #tpu.memory_space<vmem>>, %arg7: memref<1x128xf32, #tpu.memory_space<vmem>>, %arg8: memref<1x128xf32, #tpu.memory_space<vmem>>, %arg9: memref<8x128xf32, #tpu.memory_space<vmem>>, %arg10: memref<8x128xf32, #tpu.memory_space<vmem>>) attributes {dimension_semantics = [#tpu.dimension_semantics<arbitrary>], iteration_bounds = array<i64: 2>, scalar_prefetch = 0 : i64, scratch_operands = 1 : i64, tpu.core_type = #tpu.core_type<tc>, window_params = [{transform_indices = @transform_0, window_bounds = array<i64: 8, 256>}, {transform_indices = @transform_1, window_bounds = array<i64: 256, 128>}, {pipeline_mode = #tpu.pipeline_mode<synchronous>, transform_indices = @transform_2, window_bounds = array<i64: 1, 128>}, {pipeline_mode = #tpu.pipeline_mode<synchronous>, transform_indices = @transform_3, window_bounds = array<i64: 1, 128>}, {pipeline_mode = #tpu.pipeline_mode<synchronous>, transform_indices = @transform_4, window_bounds = array<i64: 128, 128>}, {pipeline_mode = #tpu.pipeline_mode<synchronous>, transform_indices = @transform_5, window_bounds = array<i64: 1, 128>}, {pipeline_mode = #tpu.pipeline_mode<synchronous>, transform_indices = @transform_6, window_bounds = array<i64: 1, 128>}, {pipeline_mode = #tpu.pipeline_mode<synchronous>, transform_indices = @transform_7, window_bounds = array<i64: 1, 128>}, {pipeline_mode = #tpu.pipeline_mode<synchronous>, transform_indices = @transform_8, window_bounds = array<i64: 8, 128>}]} {
    %c0_i32 = arith.constant 0 : i32
    %0 = arith.cmpi eq, %arg0, %c0_i32 : i32
    %1 = arith.extui %0 : i1 to i32
    %c0_i32_0 = arith.constant 0 : i32
    %2 = arith.cmpi ne, %1, %c0_i32_0 : i32
    scf.if %2 {
      %cst_9 = arith.constant 0.000000e+00 : f32
      %12 = vector.broadcast %cst_9 : f32 to vector<8x128xf32>
      %c0_10 = arith.constant 0 : index
      %c0_11 = arith.constant 0 : index
      %13 = vector.load %arg10[%c0_10, %c0_11] : memref<8x128xf32, #tpu.memory_space<vmem>>, vector<8x128xf32>
      tpu.vector_store %arg10[%c0_10, %c0_11], %12 {strides = array<i32>} : memref<8x128xf32, #tpu.memory_space<vmem>>, vector<8x128xf32>,
    } else {
    }
    %c0 = arith.constant 0 : index
    %c0_1 = arith.constant 0 : index
    %3 = vector.load %arg10[%c0, %c0_1] : memref<8x128xf32, #tpu.memory_space<vmem>>, vector<8x128xf32>
    %c0_2 = arith.constant 0 : index
    %c0_3 = arith.constant 0 : index
    %4 = vector.load %arg1[%c0_2, %c0_3] : memref<8x256xbf16, #tpu.memory_space<vmem>>, vector<8x256xbf16>
    %c0_4 = arith.constant 0 : index
    %c0_5 = arith.constant 0 : index
    %5 = vector.load %arg2[%c0_4, %c0_5] : memref<256x128xbf16, #tpu.memory_space<vmem>>, vector<256x128xbf16>
    %cst = arith.constant dense<0.000000e+00> : vector<8x128xf32>
    %6 = tpu.matmul %4, %5, %cst {dimension_numbers = #tpu.dot_dimension_numbers<[1], [0], [0], [1], [0, 0, 1, 1], [], []>} : vector<8x256xbf16>, vector<256x128xbf16>, vector<8x128xf32> -> vector<8x128xf32>
    %7 = arith.addf %3, %6 : vector<8x128xf32>
    %c0_6 = arith.constant 0 : index
    %c0_7 = arith.constant 0 : index
    %8 = vector.load %arg10[%c0_6, %c0_7] : memref<8x128xf32, #tpu.memory_space<vmem>>, vector<8x128xf32>
    tpu.vector_store %arg10[%c0_6, %c0_7], %7 {strides = array<i32>} : memref<8x128xf32, #tpu.memory_space<vmem>>, vector<8x128xf32>,
    %c1_i32 = arith.constant 1 : i32
    %9 = arith.cmpi eq, %arg0, %c1_i32 : i32
    %10 = arith.extui %9 : i1 to i32
    %c0_i32_8 = arith.constant 0 : i32
    %11 = arith.cmpi ne, %10, %c0_i32_8 : i32
    scf.if %11 {
      %12 = tpu.iota {dimensions = array<i32: 0>} : vector<8x1xi32>
      %c0_9 = arith.constant 0 : index
      %c0_10 = arith.constant 0 : index
      %13 = vector.load %arg10[%c0_9, %c0_10] : memref<8x128xf32, #tpu.memory_space<vmem>>, vector<8x128xf32>
      %c0_11 = arith.constant 0 : index
      %c0_12 = arith.constant 0 : index
      %14 = vector.load %arg3[%c0_11, %c0_12] : memref<1x128xf32, #tpu.memory_space<vmem>>, vector<1x128xf32>
      %c0_13 = arith.constant 0 : index
      %c0_14 = arith.constant 0 : index
      %15 = vector.load %arg4[%c0_13, %c0_14] : memref<1x128xf32, #tpu.memory_space<vmem>>, vector<1x128xf32>
      %cst_15 = arith.constant dense<0.000000e+00> : vector<128xf32>
      %16 = vector.multi_reduction <add>, %13, %cst_15 [0] : vector<8x128xf32> to vector<128xf32>
      %17 = vector.shape_cast %16 : vector<128xf32> to vector<1x128xf32>
      %cst_16 = arith.constant 0.333333343 : f32
      %18 = vector.broadcast %cst_16 : f32 to vector<1x128xf32>
      %19 = arith.mulf %17, %18 : vector<1x128xf32>
      %20 = arith.mulf %13, %13 : vector<8x128xf32>
      %cst_17 = arith.constant dense<0.000000e+00> : vector<128xf32>
      %21 = vector.multi_reduction <add>, %20, %cst_17 [0] : vector<8x128xf32> to vector<128xf32>
      %22 = vector.shape_cast %21 : vector<128xf32> to vector<1x128xf32>
      %cst_18 = arith.constant 0.333333343 : f32
      %23 = vector.broadcast %cst_18 : f32 to vector<1x128xf32>
      %24 = arith.mulf %22, %23 : vector<1x128xf32>
      %25 = arith.mulf %19, %19 : vector<1x128xf32>
      %26 = arith.subf %24, %25 : vector<1x128xf32>
      %cst_19 = arith.constant 0.000000e+00 : f32
      %27 = vector.broadcast %cst_19 : f32 to vector<1x128xf32>
      %28 = arith.maximumf %26, %27 : vector<1x128xf32>
      %cst_20 = arith.constant 9.99999974E-6 : f32
      %29 = vector.broadcast %cst_20 : f32 to vector<1x128xf32>
      %30 = arith.addf %28, %29 : vector<1x128xf32>
      %31 = math.rsqrt %30 : vector<1x128xf32>
      %32 = arith.mulf %14, %31 : vector<1x128xf32>
      %33 = vector.broadcast %32 : vector<1x128xf32> to vector<8x128xf32>
      %34 = arith.mulf %13, %33 : vector<8x128xf32>
      %35 = arith.mulf %19, %32 : vector<1x128xf32>
      %36 = arith.subf %15, %35 : vector<1x128xf32>
      %37 = vector.broadcast %36 : vector<1x128xf32> to vector<8x128xf32>
      %38 = arith.addf %34, %37 : vector<8x128xf32>
      %39 = arith.truncf %38 : vector<8x128xf32> to vector<8x128xbf16>
      %c0_21 = arith.constant 0 : index
      %c0_22 = arith.constant 0 : index
      %40 = vector.load %arg5[%c0_21, %c0_22] : memref<128x128xbf16, #tpu.memory_space<vmem>>, vector<128x128xbf16>
      %cst_23 = arith.constant dense<0.000000e+00> : vector<8x128xf32>
      %41 = tpu.matmul %39, %40, %cst_23 {dimension_numbers = #tpu.dot_dimension_numbers<[1], [0], [0], [1], [0, 0, 1, 1], [], []>} : vector<8x128xbf16>, vector<128x128xbf16>, vector<8x128xf32> -> vector<8x128xf32>
      %c0_24 = arith.constant 0 : index
      %c0_25 = arith.constant 0 : index
      %42 = vector.load %arg6[%c0_24, %c0_25] : memref<1x128xf32, #tpu.memory_space<vmem>>, vector<1x128xf32>
      %43 = vector.broadcast %42 : vector<1x128xf32> to vector<8x128xf32>
      %44 = arith.addf %41, %43 : vector<8x128xf32>
      %cst_26 = arith.constant 0.000000e+00 : f32
      %45 = vector.broadcast %cst_26 : f32 to vector<8x128xf32>
      %46 = arith.maximumf %44, %45 : vector<8x128xf32>
      %c3_i32 = arith.constant 3 : i32
      %47 = vector.broadcast %c3_i32 : i32 to vector<8x1xi32>
      %48 = arith.cmpi slt, %12, %47 : vector<8x1xi32>
      %cst_27 = arith.constant 0.000000e+00 : f32
      %49 = vector.shape_cast %48 : vector<8x1xi1> to vector<8x1xi1>
      %50 = vector.broadcast %49 : vector<8x1xi1> to vector<8x128xi1>
      %51 = vector.broadcast %cst_27 : f32 to vector<8x128xf32>
      %52 = arith.select %50, %46, %51 : vector<8x128xi1>, vector<8x128xf32>
      %c0_28 = arith.constant 0 : index
      %c0_29 = arith.constant 0 : index
      %53 = vector.load %arg7[%c0_28, %c0_29] : memref<1x128xf32, #tpu.memory_space<vmem>>, vector<1x128xf32>
      %c0_30 = arith.constant 0 : index
      %c0_31 = arith.constant 0 : index
      %54 = vector.load %arg8[%c0_30, %c0_31] : memref<1x128xf32, #tpu.memory_space<vmem>>, vector<1x128xf32>
      %cst_32 = arith.constant dense<0.000000e+00> : vector<128xf32>
      %55 = vector.multi_reduction <add>, %52, %cst_32 [0] : vector<8x128xf32> to vector<128xf32>
      %56 = vector.shape_cast %55 : vector<128xf32> to vector<1x128xf32>
      %cst_33 = arith.constant 0.333333343 : f32
      %57 = vector.broadcast %cst_33 : f32 to vector<1x128xf32>
      %58 = arith.mulf %56, %57 : vector<1x128xf32>
      %59 = arith.mulf %52, %52 : vector<8x128xf32>
      %cst_34 = arith.constant dense<0.000000e+00> : vector<128xf32>
      %60 = vector.multi_reduction <add>, %59, %cst_34 [0] : vector<8x128xf32> to vector<128xf32>
      %61 = vector.shape_cast %60 : vector<128xf32> to vector<1x128xf32>
      %cst_35 = arith.constant 0.333333343 : f32
      %62 = vector.broadcast %cst_35 : f32 to vector<1x128xf32>
      %63 = arith.mulf %61, %62 : vector<1x128xf32>
      %64 = arith.mulf %58, %58 : vector<1x128xf32>
      %65 = arith.subf %63, %64 : vector<1x128xf32>
      %cst_36 = arith.constant 0.000000e+00 : f32
      %66 = vector.broadcast %cst_36 : f32 to vector<1x128xf32>
      %67 = arith.maximumf %65, %66 : vector<1x128xf32>
      %cst_37 = arith.constant 9.99999974E-6 : f32
      %68 = vector.broadcast %cst_37 : f32 to vector<1x128xf32>
      %69 = arith.addf %67, %68 : vector<1x128xf32>
      %70 = math.rsqrt %69 : vector<1x128xf32>
      %71 = arith.mulf %53, %70 : vector<1x128xf32>
      %72 = vector.broadcast %71 : vector<1x128xf32> to vector<8x128xf32>
      %73 = arith.mulf %52, %72 : vector<8x128xf32>
      %74 = arith.mulf %58, %71 : vector<1x128xf32>
      %75 = arith.subf %54, %74 : vector<1x128xf32>
      %76 = vector.broadcast %75 : vector<1x128xf32> to vector<8x128xf32>
      %77 = arith.addf %73, %76 : vector<8x128xf32>
      %c0_38 = arith.constant 0 : index
      %c0_39 = arith.constant 0 : index
      %78 = vector.load %arg9[%c0_38, %c0_39] : memref<8x128xf32, #tpu.memory_space<vmem>>, vector<8x128xf32>
      tpu.vector_store %arg9[%c0_38, %c0_39], %77 {strides = array<i32>} : memref<8x128xf32, #tpu.memory_space<vmem>>, vector<8x128xf32>,
    } else {
    }
    return
  }
  func.func @transform_0(%arg0: i32) -> (i32, i32) {
    %c0_i32 = arith.constant 0 : i32
    %c0_i32_0 = arith.constant 0 : i32
    return %c0_i32, %arg0 : i32, i32
  }
  func.func @transform_1(%arg0: i32) -> (i32, i32) {
    %c0_i32 = arith.constant 0 : i32
    %c0_i32_0 = arith.constant 0 : i32
    return %arg0, %c0_i32 : i32, i32
  }
  func.func @transform_2(%arg0: i32) -> (i32, i32) {
    %c0_i32 = arith.constant 0 : i32
    %c0_i32_0 = arith.constant 0 : i32
    %c0_i32_1 = arith.constant 0 : i32
    return %c0_i32, %c0_i32_0 : i32, i32
  }
  func.func @transform_3(%arg0: i32) -> (i32, i32) {
    %c0_i32 = arith.constant 0 : i32
    %c0_i32_0 = arith.constant 0 : i32
    %c0_i32_1 = arith.constant 0 : i32
    return %c0_i32, %c0_i32_0 : i32, i32
  }
  func.func @transform_4(%arg0: i32) -> (i32, i32) {
    %c0_i32 = arith.constant 0 : i32
    %c0_i32_0 = arith.constant 0 : i32
    %c0_i32_1 = arith.constant 0 : i32
    return %c0_i32, %c0_i32_0 : i32, i32
  }
  func.func @transform_5(%arg0: i32) -> (i32, i32) {
    %c0_i32 = arith.constant 0 : i32
    %c0_i32_0 = arith.constant 0 : i32
    %c0_i32_1 = arith.constant 0 : i32
    return %c0_i32, %c0_i32_0 : i32, i32
  }
  func.func @transform_6(%arg0: i32) -> (i32, i32) {
    %c0_i32 = arith.constant 0 : i32
    %c0_i32_0 = arith.constant 0 : i32
    %c0_i32_1 = arith.constant 0 : i32
    return %c0_i32, %c0_i32_0 : i32, i32
  }
  func.func @transform_7(%arg0: i32) -> (i32, i32) {
    %c0_i32 = arith.constant 0 : i32
    %c0_i32_0 = arith.constant 0 : i32
    %c0_i32_1 = arith.constant 0 : i32
    return %c0_i32, %c0_i32_0 : i32, i32
  }
  func.func @transform_8(%arg0: i32) -> (i32, i32) {
    %c0_i32 = arith.constant 0 : i32
    %c0_i32_0 = arith.constant 0 : i32
    %c0_i32_1 = arith.constant 0 : i32
    return %c0_i32, %c0_i32_0 : i32, i32
  }
}

</mosaic_0001>

<bundles_post_ra>
// kernel: resgcn_forward.9
= control target key start
LH: loop header
LB: loop body
LE: loop exit
PB: predicated region body
PF: predicated region fallthrough
CT: control target
= control target key end

     0   :  { %s428_s6 = smov 0   ;;  %s469_s0 = inlined_call_operand.vmem [shape: bf16[512,128], index: 0, kind: input, shape index: {}]   ;;  %s470_s1 = inlined_call_operand.vmem [shape: f32[2,128], index: 1, kind: output, shape index: {}]  }
   0x1 LB: > { %s312_s7 = sadd.s32 4294967295, %s415_s6   ;;  %p315_p0 = scmp.ge.s32.totalorder %s415_s6, 1  ;;  %s415_s6 = sphi %s428_s6, %s11_s6  }
   0x2   : > { %p83_p1 = scmp.lt.s32.totalorder %s415_s6, 3 }
   0x4   : > { %p84_p2 = pnand %p315_p0, %p83_p1 }
   0x5   : > { %s316_s8 = sshll.u32 (!%p84_p2), %s312_s7, 5  ;;  %p318_p4 = scmp.ne.s32.totalorder (!%p84_p2), %s312_s7, 0 }
   0x6   : > { %87 = sbr.rel (%p84_p2) target bundleno = 103 (0x67), region = 24  ;;  %p99_p3 = scmp.lt.s32.totalorder (!%p84_p2), %s316_s8, 63 }
   0xd   : > { %s472_s8 = smov (!%p99_p3, %s316_s8), 63  ;;  %107 = sbr.rel (%p318_p4) target bundleno = 20 (0x14), region = 28 }
   0xe   : > { %s317_s9 = sshll.u32 %s472_s8, 2  ;;  %v417_v0 = vmov (!%p318_p4), 0.0  }
   0xf   : > { %s439_s12 = scalar_lea.vmem %s469_s0, %s317_s9  ;;  %108 = vst [vmem:[%s470_s1] sm:$0x3] (!%p318_p4), %v417_v0 }
  0x14 PF: > { %v322_v1 = vld [vmem:[%s439_s12] sm:$0xff]   ;;  %v385_v2 = vld [vmem:[%s439_s12 + $0x8] sm:$0xff]   ;;  %v386_v7 = vld [vmem:[%s439_s12 + $0x10] sm:$0xff]   ;;  %vm280_vm0 = vcmask 1040384  }
  0x15   : > { %v323_v3 = vunpack.c.l.bf16 %v322_v1  ;;  %v324_v4 = vunpack.c.h.bf16 %v322_v1  ;;  %v327_v5 = vunpack.c.l.bf16 %v385_v2  ;;  %v328_v8 = vunpack.c.h.bf16 %v385_v2  ;;  %v387_v12 = vld [vmem:[%s439_s12 + $0x18] sm:$0xff]   ;;  %v388_v20 = vld [vmem:[%s439_s12 + $0x20] sm:$0xff]   ;;  %v389_v29 = vld [vmem:[%s439_s12 + $0x28] sm:$0xff]  }
  0x16   : > { %v331_v10 = vunpack.c.l.bf16 %v386_v7  ;;  %v332_v15 = vunpack.c.h.bf16 %v386_v7  ;;  %v335_v18 = vunpack.c.l.bf16 %v387_v12  ;;  %v336_v23 = vunpack.c.h.bf16 %v387_v12  ;;  %v390_v38 = vld [vmem:[%s439_s12 + $0x30] sm:$0xff]   ;;  %v391_v47 = vld [vmem:[%s439_s12 + $0x38] sm:$0xff]   ;;  %v392_v56 = vld [vmem:[%s439_s12 + $0x40] sm:$0xff]  }
  0x17   : > { %v173_v6 = vadd.f32 %v324_v4, %v323_v3  ;;  %v210_v13 = vmul.f32 %v323_v3, %v323_v3  ;;  %v211_v14 = vmul.f32 %v324_v4, %v324_v4  ;;  %v212_v17 = vmul.f32 %v327_v5, %v327_v5  ;;  %v393_v1 = vld [vmem:[%s439_s12 + $0x48] sm:$0xff]  }
  0x18   : > { %v213_v21 = vmul.f32 %v328_v8, %v328_v8  ;;  %v214_v25 = vmul.f32 %v331_v10, %v331_v10  ;;  %v339_v27 = vunpack.c.l.bf16 %v388_v20  ;;  %v215_v30 = vmul.f32 %v332_v15, %v332_v15 }
  0x19   : > { %v174_v9 = vadd.f32 %v327_v5, %v173_v6  ;;  %v242_v22 = vadd.f32 %v211_v14, %v210_v13  ;;  %v340_v32 = vunpack.c.h.bf16 %v388_v20  ;;  %v216_v34 = vmul.f32 %v335_v18, %v335_v18 }
  0x1a   : > { %v343_v36 = vunpack.c.l.bf16 %v389_v29  ;;  %v217_v39 = vmul.f32 %v336_v23, %v336_v23  ;;  %v344_v41 = vunpack.c.h.bf16 %v389_v29  ;;  %v218_v43 = vmul.f32 %v339_v27, %v339_v27 }
  0x1b   : > { %v175_v11 = vadd.f32 %v328_v8, %v174_v9  ;;  %v243_v26 = vadd.f32 %v242_v22, %v212_v17  ;;  %v347_v45 = vunpack.c.l.bf16 %v390_v38  ;;  %v219_v48 = vmul.f32 %v340_v32, %v340_v32 }
  0x1c   : > { %v348_v50 = vunpack.c.h.bf16 %v390_v38  ;;  %v220_v52 = vmul.f32 %v343_v36, %v343_v36  ;;  %v351_v54 = vunpack.c.l.bf16 %v391_v47  ;;  %v221_v57 = vmul.f32 %v344_v41, %v344_v41 }
  0x1d   : > { %v176_v16 = vadd.f32 %v331_v10, %v175_v11  ;;  %v244_v31 = vadd.f32 %v243_v26, %v213_v21  ;;  %v352_v59 = vunpack.c.h.bf16 %v391_v47  ;;  %v222_v61 = vmul.f32 %v347_v45, %v347_v45  ;;  %v394_v10 = vld [vmem:[%s439_s12 + $0x50] sm:$0xff]  }
  0x1e   : > { %v355_v63 = vunpack.c.l.bf16 %v392_v56  ;;  %v223_v2 = vmul.f32 %v348_v50, %v348_v50  ;;  %v356_v4 = vunpack.c.h.bf16 %v392_v56  ;;  %v224_v6 = vmul.f32 %v351_v54, %v351_v54 }
  0x1f   : > { %v177_v19 = vadd.f32 %v332_v15, %v176_v16  ;;  %v245_v35 = vadd.f32 %v244_v31, %v214_v25  ;;  %v359_v8 = vunpack.c.l.bf16 %v393_v1  ;;  %v225_v11 = vmul.f32 %v352_v59, %v352_v59 }
  0x20   : > { %v360_v13 = vunpack.c.h.bf16 %v393_v1  ;;  %v226_v15 = vmul.f32 %v355_v63, %v355_v63  ;;  %v363_v17 = vunpack.c.l.bf16 %v394_v10  ;;  %v227_v20 = vmul.f32 %v356_v4, %v356_v4 }
  0x21   : > { %v178_v24 = vadd.f32 %v335_v18, %v177_v19  ;;  %v246_v40 = vadd.f32 %v245_v35, %v215_v30  ;;  %v395_v19 = vld [vmem:[%s439_s12 + $0x58] sm:$0xff]   ;;  %v364_v22 = vunpack.c.h.bf16 %v394_v10 }
  0x22   : > { %v367_v26 = vunpack.c.l.bf16 %v395_v19  ;;  %v229_v29 = vmul.f32 %v360_v13, %v360_v13  ;;  %v368_v31 = vunpack.c.h.bf16 %v395_v19 }
  0x23   : > { %v179_v28 = vadd.f32 %v336_v23, %v178_v24  ;;  %v247_v44 = vadd.f32 %v246_v40, %v216_v34  ;;  %v228_v24 = vmul.f32 %v359_v8, %v359_v8  ;;  %v231_v38 = vmul.f32 %v364_v22, %v364_v22 }
  0x24   : > { %v233_v47 = vmul.f32 %v368_v31, %v368_v31 }
  0x25   : > { %v180_v33 = vadd.f32 %v339_v27, %v179_v28  ;;  %v248_v49 = vadd.f32 %v247_v44, %v217_v39  ;;  %v396_v28 = vld [vmem:[%s439_s12 + $0x60] sm:$0xff]  }
  0x26   : > { %v371_v35 = vunpack.c.l.bf16 %v396_v28  ;;  %v372_v40 = vunpack.c.h.bf16 %v396_v28 }
  0x27   : > { %v181_v37 = vadd.f32 %v340_v32, %v180_v33  ;;  %v249_v53 = vadd.f32 %v248_v49, %v218_v43  ;;  %v230_v33 = vmul.f32 %v363_v17, %v363_v17 }
  0x28   : > { %v235_v56 = vmul.f32 %v372_v40, %v372_v40 }
  0x29   : > { %v182_v42 = vadd.f32 %v343_v36, %v181_v37  ;;  %v250_v58 = vadd.f32 %v249_v53, %v219_v48  ;;  %v397_v37 = vld [vmem:[%s439_s12 + $0x68] sm:$0xff]  }
  0x2a   : > { %v375_v44 = vunpack.c.l.bf16 %v397_v37  ;;  %v376_v49 = vunpack.c.h.bf16 %v397_v37 }
  0x2b   : > { %v183_v46 = vadd.f32 %v344_v41, %v182_v42  ;;  %v251_v62 = vadd.f32 %v250_v58, %v220_v52  ;;  %v232_v42 = vmul.f32 %v367_v26, %v367_v26 }
  0x2d   : > { %v184_v51 = vadd.f32 %v347_v45, %v183_v46  ;;  %v252_v3 = vadd.f32 %v251_v62, %v221_v57  ;;  %v398_v46 = vld [vmem:[%s439_s12 + $0x70] sm:$0xff]  }
  0x2e   : > { %v379_v53 = vunpack.c.l.bf16 %v398_v46  ;;  %v380_v58 = vunpack.c.h.bf16 %v398_v46 }
  0x2f   : > { %v185_v55 = vadd.f32 %v348_v50, %v184_v51  ;;  %v253_v7 = vadd.f32 %v252_v3, %v222_v61  ;;  %v234_v51 = vmul.f32 %v371_v35, %v371_v35 }
  0x31   : > { %v186_v60 = vadd.f32 %v351_v54, %v185_v55  ;;  %v254_v12 = vadd.f32 %v253_v7, %v223_v2  ;;  %v399_v55 = vld [vmem:[%s439_s12 + $0x78] sm:$0xff]   ;;  %v239_v7 = vmul.f32 %v380_v58, %v380_v58 }
  0x32   : > { %v383_v62 = vunpack.c.l.bf16 %v399_v55  ;;  %v384_v2 = vunpack.c.h.bf16 %v399_v55 }
  0x33   : > { %v187_v0 = vadd.f32 %v352_v59, %v186_v60  ;;  %v255_v16 = vadd.f32 %v254_v12, %v224_v6  ;;  %v236_v60 = vmul.f32 %v375_v44, %v375_v44 }
  0x34   : > { %v240_v10 = vmul.f32 %v383_v62, %v383_v62 }
  0x35   : > { %v188_v5 = vadd.f32 %v355_v63, %v187_v0  ;;  %v256_v21 = vadd.f32 %v255_v16, %v225_v11  ;;  %v237_v0 = vmul.f32 %v376_v49, %v376_v49 }
  0x37   : > { %v189_v9 = vadd.f32 %v356_v4, %v188_v5  ;;  %v257_v25 = vadd.f32 %v256_v21, %v226_v15  ;;  %v238_v4 = vmul.f32 %v379_v53, %v379_v53 }
  0x39   : > { %v190_v14 = vadd.f32 %v359_v8, %v189_v9  ;;  %v258_v30 = vadd.f32 %v257_v25, %v227_v20 }
  0x3b   : > { %v191_v18 = vadd.f32 %v360_v13, %v190_v14  ;;  %v259_v34 = vadd.f32 %v258_v30, %v228_v24  ;;  %v241_v13 = vmul.f32 %v384_v2, %v384_v2 }
  0x3d   : > { %v192_v23 = vadd.f32 %v363_v17, %v191_v18  ;;  %v260_v39 = vadd.f32 %v259_v34, %v229_v29 }
  0x3f   : > { %v193_v27 = vadd.f32 %v364_v22, %v192_v23  ;;  %v261_v43 = vadd.f32 %v260_v39, %v230_v33 }
  0x41   : > { %v194_v32 = vadd.f32 %v367_v26, %v193_v27  ;;  %v262_v48 = vadd.f32 %v261_v43, %v231_v38  ;;  %v279_v27 = vld [vmem:[%s470_s1] sm:$0x3] }
  0x43   : > { %v195_v36 = vadd.f32 %v368_v31, %v194_v32  ;;  %v263_v52 = vadd.f32 %v262_v48, %v232_v42 }
  0x45   : > { %v196_v41 = vadd.f32 %v371_v35, %v195_v36  ;;  %v264_v57 = vadd.f32 %v263_v52, %v233_v47 }
  0x47   : > { %v197_v45 = vadd.f32 %v372_v40, %v196_v41  ;;  %v265_v61 = vadd.f32 %v264_v57, %v234_v51 }
  0x49   : > { %v198_v50 = vadd.f32 %v375_v44, %v197_v45  ;;  %v266_v1 = vadd.f32 %v265_v61, %v235_v56 }
  0x4b   : > { %v199_v54 = vadd.f32 %v376_v49, %v198_v50  ;;  %v267_v5 = vadd.f32 %v266_v1, %v236_v60 }
  0x4d   : > { %v200_v59 = vadd.f32 %v379_v53, %v199_v54  ;;  %v268_v8 = vadd.f32 %v267_v5, %v237_v0 }
  0x4f   : > { %v201_v63 = vadd.f32 %v380_v58, %v200_v59  ;;  %v269_v11 = vadd.f32 %v268_v8, %v238_v4 }
  0x51   : > { %v202_v3 = vadd.f32 %v383_v62, %v201_v63  ;;  %v270_v14 = vadd.f32 %v269_v11, %v239_v7 }
  0x53   : > { %v203_v6 = vadd.f32 %v384_v2, %v202_v3  ;;  %v271_v16 = vadd.f32 %v270_v14, %v240_v10 }
  0x55   : > { %v204_v9 = vrot.slane %v203_v6, 4  ;;  %v272_v17 = vadd.f32 %v271_v16, %v241_v13 }
  0x57   : > { %v205_v12 = vadd.f32 %v204_v9, %v203_v6  ;;  %v273_v19 = vrot.slane %v272_v17, 4 }
  0x59   : > { %v206_v15 = vrot.slane %v205_v12, 2  ;;  %v274_v20 = vadd.f32 %v273_v19, %v272_v17 }
  0x5b   : > { %v207_v18 = vadd.f32 %v206_v15, %v205_v12  ;;  %v275_v22 = vrot.slane %v274_v20, 2 }
  0x5d   : > { %v208_v21 = vrot.slane %v207_v18, 1  ;;  %v276_v23 = vadd.f32 %v275_v22, %v274_v20 }
  0x5f   : > { %v209_v24 = vadd.f32 %v208_v21, %v207_v18  ;;  %v277_v25 = vrot.slane %v276_v23, 1 }
  0x61   : > { %v278_v26 = vadd.f32 %v277_v25, %v276_v23 }
  0x63   : > { %v281_v28 = vsel %vm280_vm0, %v209_v24, %v278_v26 }
  0x64   : > { %v282_v29 = vadd.f32 %v281_v28, %v279_v27 }
  0x66   : > { %283 = vst [vmem:[%s470_s1] sm:$0x3] %v282_v29 }
  0x67 PF: > { %s11_s6 = sadd.s32 1, %s415_s6  }
  0x68   : > { %p8_p5 = scmp.ge.s32.totalorder %s11_s6, 4  }
  0x6a   :  { %10 = sbr.rel (!%p8_p5) target bundleno = 1 (0x1), region = 54 }

// kernel: resgcn_forward.10
= control target key start
LH: loop header
LB: loop body
LE: loop exit
PB: predicated region body
PF: predicated region fallthrough
CT: control target
= control target key end

     0   :  { %s1653_s21 = smov 0   ;;  %s2134_s0 = inlined_call_operand.vmem [shape: f32[2,128], index: 0, kind: input, shape index: {}]   ;;  %s2135_s1 = inlined_call_operand.vmem [shape: f32[1,128], index: 1, kind: input, shape index: {}]   ;;  %s2136_s2 = inlined_call_operand.vmem [shape: f32[1,128], index: 2, kind: input, shape index: {}]   ;;  %s2137_s3 = inlined_call_operand.vmem [shape: bf16[512,128], index: 3, kind: input, shape index: {}]   ;;  %s2138_s4 = inlined_call_operand.vmem [shape: bf16[128,128], index: 4, kind: input, shape index: {}]   ;;  %s2139_s5 = inlined_call_operand.vmem [shape: bf16[512,128], index: 5, kind: output, shape index: {0}]   ;;  %s2140_s6 = inlined_call_operand.vmem [shape: f32[2,2,128], index: 6, kind: output, shape index: {1}]  }
   0x1 LB: > { %s1659_s22 = sadd.s32 4294967295, %s1616_s21   ;;  %p1249_p0 = scmp.ge.s32.totalorder %s1616_s21, 1  ;;  %s1616_s21 = sphi %s1653_s21, %s17_s21  }
   0x2   : > { %p216_p1 = scmp.lt.s32.totalorder %s1616_s21, 3 }
   0x4   : > { %p217_p2 = pnand %p1249_p0, %p216_p1 }
   0x5   : > { %v1600_v0 = vld [vmem:[%s2138_s4] sm:$0xff] (!%p217_p2)   ;;  %v1601_v1 = vld [vmem:[%s2138_s4 + $0x8] sm:$0xff] (!%p217_p2)   ;;  %v1602_v2 = vld [vmem:[%s2138_s4 + $0x10] sm:$0xff] (!%p217_p2)   ;;  %s1250_s11 = sshll.u32 (!%p217_p2), %s1659_s22, 5  ;;  %v346_v15 = vlaneseq (!%p217_p2)  ;;  %s1263_s30 = sshll.u32 (!%p217_p2), %s1659_s22, 8 }
   0x6   : > { %220 = sbr.rel (%p217_p2) target bundleno = 337 (0x151), region = 40  ;;  %1528 = vmatprep.subr.bf16.mxu0 (!%p217_p2), %v1600_v0  ;;  %1576 = vmatprep.subr.bf16.mxu1 (!%p217_p2), %v1600_v0  ;;  %v1603_v3 = vld [vmem:[%s2138_s4 + $0x18] sm:$0xff] (!%p217_p2)   ;;  %v267_v4 = vld [vmem:[%s2134_s0] sm:$0x1] (!%p217_p2)  ;;  %v269_v5 = vld [vmem:[%s2134_s0 + $0x1] sm:$0x1] (!%p217_p2) }
   0x7   : > { %1529 = vmatpush3.bf16.msra.mxu0 (!%p217_p2), %v1600_v0  ;;  %1584 = vmatpush3.bf16.msra.mxu1 (!%p217_p2), %v1600_v0  ;;  %v268_v6 = vmul.f32 (!%p217_p2), 0.003164557, %v267_v4  ;;  %v270_v7 = vmul.f32 (!%p217_p2), 0.003164557, %v269_v5  ;;  %v1604_v9 = vld [vmem:[%s2138_s4 + $0x20] sm:$0xff] (!%p217_p2)   ;;  %p251_p3 = scmp.lt.s32.totalorder (!%p217_p2), %s1250_s11, 63 }
   0x8   : > { %1530 = vmatprep.subr.bf16.mxu0 (!%p217_p2), %v1601_v1  ;;  %1577 = vmatprep.subr.bf16.mxu1 (!%p217_p2), %v1601_v1  ;;  %v1605_v12 = vld [vmem:[%s2138_s4 + $0x28] sm:$0xff] (!%p217_p2)   ;;  %v1606_v14 = vld [vmem:[%s2138_s4 + $0x30] sm:$0xff] (!%p217_p2)   ;;  %v1607_v16 = vld [vmem:[%s2138_s4 + $0x38] sm:$0xff] (!%p217_p2)   ;;  %v1704_v17 = vshrl.u32 (!%p217_p2), %v346_v15, 7  ;;  %p262_p4 = scmp.lt.s32.totalorder (!%p217_p2), %s1659_s22, 1 }
   0x9   : > { %v271_v8 = vmul.f32 (!%p217_p2), %v268_v6, %v268_v6  ;;  %v274_v19 = vld [vmem:[%s2135_s1] sm:$0x1] (!%p217_p2) }
   0xa   : > { %v348_v21 = vsub.s32 (!%p217_p2), 0, %v1704_v17  ;;  %v278_v33 = vld [vmem:[%s2136_s2] sm:$0x1] (!%p217_p2) }
   0xb   : > { %1531 = vmatpush3.bf16.msra.mxu0 (!%p217_p2), %v1601_v1  ;;  %1585 = vmatpush3.bf16.msra.mxu1 (!%p217_p2), %v1601_v1  ;;  %v272_v10 = vsub.f32 (!%p217_p2), %v270_v7, %v271_v8 }
   0xc   : > { %1532 = vmatprep.subr.bf16.mxu0 (!%p217_p2), %v1602_v2  ;;  %1578 = vmatprep.subr.bf16.mxu1 (!%p217_p2), %v1602_v2 }
   0xd   : > { %v273_v11 = vmax.f32 %v272_v10, 0.0  ;;  %s2142_s11 = smov (!%p251_p3, %s1250_s11), 63  ;;  %s2144_s22 = smov (!%p262_p4, %s1659_s22), 1 }
   0xe   : > { %s1251_s18 = sshll.u32 %s2142_s11, 2  ;;  %s1254_s10 = sshll.u32 %s2144_s22, 1 }
   0xf   : > { %1533 = vmatpush3.bf16.msra.mxu0 %v1602_v2  ;;  %1586 = vmatpush3.bf16.msra.mxu1 %v1602_v2  ;;  %v275_v13 = vadd.f32 1e-05, %v273_v11  ;;  %s1699_s23 = scalar_lea.vmem %s2137_s3, %s1251_s18  ;;  %s1920_s9 = scalar_lea.vmem %s2139_s5, %s1251_s18 }
  0x10   : > { %1534 = vmatprep.subr.bf16.mxu0 %v1603_v3  ;;  %1579 = vmatprep.subr.bf16.mxu1 %v1603_v3  ;;  %v1331_v18 = vld [vmem:[%s1699_s23] sm:$0xff]   ;;  %v1474_v20 = vld [vmem:[%s1699_s23 + $0x8] sm:$0xff]   ;;  %v1475_v22 = vld [vmem:[%s1699_s23 + $0x10] sm:$0xff]   ;;  %s265_s13 = scalar_lea.vmem %s2140_s6, %s1254_s10 }
  0x11   : > { %1608 = vrsqrt.f32 %v275_v13  ;;  %v1476_v23 = vld [vmem:[%s1699_s23 + $0x18] sm:$0xff]   ;;  %v1332_v25 = vunpack.c.l.bf16 %v1331_v18  ;;  %v1477_v26 = vld [vmem:[%s1699_s23 + $0x20] sm:$0xff]   ;;  %v1333_v28 = vunpack.c.h.bf16 %v1331_v18  ;;  %v1336_v29 = vunpack.c.l.bf16 %v1474_v20  ;;  %v1478_v31 = vld [vmem:[%s1699_s23 + $0x28] sm:$0xff]  }
  0x12   : > { %v1337_v30 = vunpack.c.h.bf16 %v1474_v20  ;;  %v1717_v32 = vld [vmem:[%s1699_s23 + $0x30] sm:$0xff]   ;;  %v1340_v34 = vunpack.c.l.bf16 %v1475_v22  ;;  %v1341_v35 = vunpack.c.h.bf16 %v1475_v22  ;;  %v1344_v36 = vunpack.c.l.bf16 %v1476_v23  ;;  %v1725_v42 = vld [vmem:[%s1699_s23 + $0x38] sm:$0xff]   ;;  %v1481_v47 = vld [vmem:[%s1699_s23 + $0x40] sm:$0xff]  }
  0x13   : > { %1535 = vmatpush3.bf16.msra.mxu0 %v1603_v3  ;;  %1587 = vmatpush3.bf16.msra.mxu1 %v1603_v3  ;;  %v1345_v37 = vunpack.c.h.bf16 %v1476_v23  ;;  %v1348_v40 = vunpack.c.l.bf16 %v1477_v26  ;;  %v1349_v41 = vunpack.c.h.bf16 %v1477_v26  ;;  %v1352_v43 = vunpack.c.l.bf16 %v1478_v31  ;;  %v1482_v52 = vld [vmem:[%s1699_s23 + $0x48] sm:$0xff]   ;;  %v1483_v53 = vld [vmem:[%s1699_s23 + $0x50] sm:$0xff]   ;;  %v1485_v7 = vld [vmem:[%s1699_s23 + $0x60] sm:$0xff]  }
  0x14   : > { %1536 = vmatprep.subr.bf16.mxu0 %v1604_v9  ;;  %1580 = vmatprep.subr.bf16.mxu1 %v1604_v9  ;;  %v1353_v44 = vunpack.c.h.bf16 %v1478_v31  ;;  %v1356_v45 = vunpack.c.l.bf16 %v1717_v32  ;;  %v1357_v46 = vunpack.c.h.bf16 %v1717_v32  ;;  %v1360_v57 = vunpack.c.l.bf16 %v1725_v42 }
  0x15   : > { %v1361_v59 = vunpack.c.h.bf16 %v1725_v42  ;;  %v1364_v60 = vunpack.c.l.bf16 %v1481_v47  ;;  %v1365_v61 = vunpack.c.h.bf16 %v1481_v47  ;;  %v1368_v62 = vunpack.c.l.bf16 %v1482_v52 }
  0x16   : > { %v1369_v63 = vunpack.c.h.bf16 %v1482_v52  ;;  %v1372_v0 = vunpack.c.l.bf16 %v1483_v53  ;;  %v1373_v1 = vunpack.c.h.bf16 %v1483_v53  ;;  %v1380_v20 = vunpack.c.l.bf16 %v1485_v7  ;;  %v1487_v52 = vld [vmem:[%s1699_s23 + $0x70] sm:$0xff]  }
  0x17   : > { %1537 = vmatpush3.bf16.msra.mxu0 %v1604_v9  ;;  %1588 = vmatpush3.bf16.msra.mxu1 %v1604_v9 }
  0x18   : > { %1538 = vmatprep.subr.bf16.mxu0 %v1605_v12  ;;  %1581 = vmatprep.subr.bf16.mxu1 %v1605_v12 }
  0x1b   : > { %1539 = vmatpush3.bf16.msra.mxu0 %v1605_v12  ;;  %1589 = vmatpush3.bf16.msra.mxu1 %v1605_v12  ;;  %v1609_v24 = vpop.eup %1608 }
  0x1c   : > { %1540 = vmatprep.subr.bf16.mxu0 %v1606_v14  ;;  %1582 = vmatprep.subr.bf16.mxu1 %v1606_v14  ;;  %v277_v27 = vmul.f32 %v1609_v24, %v274_v19  ;;  %v1381_v24 = vunpack.c.h.bf16 %v1485_v7 }
  0x1e   : > { %v279_v38 = vmul.f32 %v277_v27, %v268_v6  ;;  %v1722_v39 = vrot.slane %v277_v27, %v348_v21  ;;  %v1484_v6 = vld [vmem:[%s1699_s23 + $0x58] sm:$0xff]  }
  0x1f   : > { %1541 = vmatpush3.bf16.msra.mxu0 %v1606_v14  ;;  %1590 = vmatpush3.bf16.msra.mxu1 %v1606_v14  ;;  %v1376_v18 = vunpack.c.l.bf16 %v1484_v6  ;;  %v1377_v19 = vunpack.c.h.bf16 %v1484_v6 }
  0x20   : > { %1542 = vmatprep.subr.bf16.mxu0 %v1607_v16  ;;  %1583 = vmatprep.subr.bf16.mxu1 %v1607_v16  ;;  %v280_v48 = vsub.f32 %v278_v33, %v279_v38  ;;  %v351_v49 = vmul.f32 %v1332_v25, %v1722_v39  ;;  %v352_v50 = vmul.f32 %v1333_v28, %v1722_v39 }
  0x21   : > { %v353_v51 = vmul.f32 %v1336_v29, %v1722_v39  ;;  %v354_v54 = vmul.f32 %v1337_v30, %v1722_v39  ;;  %v355_v55 = vmul.f32 %v1340_v34, %v1722_v39  ;;  %v356_v56 = vmul.f32 %v1341_v35, %v1722_v39 }
  0x22   : > { %v1739_v58 = vrot.slane %v280_v48, %v348_v21  ;;  %v357_v10 = vmul.f32 %v1344_v36, %v1722_v39  ;;  %v358_v11 = vmul.f32 %v1345_v37, %v1722_v39  ;;  %v359_v14 = vmul.f32 %v1348_v40, %v1722_v39 }
  0x23   : > { %1543 = vmatpush3.bf16.msra.mxu0 %v1607_v16  ;;  %1591 = vmatpush3.bf16.msra.mxu1 %v1607_v16  ;;  %v360_v15 = vmul.f32 %v1349_v41, %v1722_v39  ;;  %v361_v21 = vmul.f32 %v1352_v43, %v1722_v39  ;;  %v362_v22 = vmul.f32 %v1353_v44, %v1722_v39  ;;  %v1486_v43 = vld [vmem:[%s1699_s23 + $0x68] sm:$0xff]  }
  0x24   : > { %v389_v2 = vadd.f32 %v1739_v58, %v351_v49  ;;  %v390_v3 = vadd.f32 %v1739_v58, %v352_v50  ;;  %v391_v4 = vadd.f32 %v1739_v58, %v353_v51  ;;  %v392_v5 = vadd.f32 %v1739_v58, %v354_v54 }
  0x25   : > { %v393_v8 = vadd.f32 %v1739_v58, %v355_v55  ;;  %v394_v9 = vadd.f32 %v1739_v58, %v356_v56  ;;  %v363_v23 = vmul.f32 %v1356_v45, %v1722_v39  ;;  %v395_v25 = vadd.f32 %v1739_v58, %v357_v10 }
  0x26   : > { %v421_v12 = vpack.c.bf16 %v390_v3, %v389_v2  ;;  %v422_v13 = vpack.c.bf16 %v392_v5, %v391_v4  ;;  %v396_v26 = vadd.f32 %v1739_v58, %v358_v11  ;;  %v367_v27 = vmul.f32 %v1364_v60, %v1722_v39  ;;  %v1488_v11 = vld [vmem:[%s1699_s23 + $0x78] sm:$0xff]  }
  0x27   : > { %v423_v16 = vpack.c.bf16 %v394_v9, %v393_v8  ;;  %v368_v28 = vmul.f32 %v1365_v61, %v1722_v39  ;;  %v397_v29 = vadd.f32 %v1739_v58, %v359_v14  ;;  %v398_v30 = vadd.f32 %v1739_v58, %v360_v15 }
  0x28   : > { %1544 = vmatprep.mubr.bf16.mxu0 %v421_v12  ;;  %v369_v31 = vmul.f32 %v1368_v62, %v1722_v39  ;;  %v370_v32 = vmul.f32 %v1369_v63, %v1722_v39  ;;  %v364_v33 = vmul.f32 %v1357_v46, %v1722_v39  ;;  %v405_v34 = vadd.f32 %v1739_v58, %v367_v27 }
  0x29   : > { %1545 = vmatmul.mubr.bf16.vlgmr.msra.gmra.mrb[0].mxu0 %v422_v13  ;;  %v406_v35 = vadd.f32 %v1739_v58, %v368_v28  ;;  %v371_v36 = vmul.f32 %v1372_v0, %v1722_v39  ;;  %v372_v40 = vmul.f32 %v1373_v1, %v1722_v39  ;;  %v373_v41 = vmul.f32 %v1376_v18, %v1722_v39 }
  0x2a   : > { %1548 = vmatprep.mubr.bf16.mxu0 %v423_v16  ;;  %v407_v37 = vadd.f32 %v1739_v58, %v369_v31  ;;  %v408_v38 = vadd.f32 %v1739_v58, %v370_v32  ;;  %v424_v44 = vpack.c.bf16 %v396_v26, %v395_v25  ;;  %v374_v47 = vmul.f32 %v1377_v19, %v1722_v39 }
  0x2b   : > { %v429_v45 = vpack.c.bf16 %v406_v35, %v405_v34  ;;  %v409_v46 = vadd.f32 %v1739_v58, %v371_v36  ;;  %v425_v48 = vpack.c.bf16 %v398_v30, %v397_v29  ;;  %v410_v50 = vadd.f32 %v1739_v58, %v372_v40 }
  0x2c   : > { %v430_v49 = vpack.c.bf16 %v408_v38, %v407_v37  ;;  %v375_v51 = vmul.f32 %v1380_v20, %v1722_v39  ;;  %v399_v53 = vadd.f32 %v1739_v58, %v361_v21  ;;  %v376_v54 = vmul.f32 %v1381_v24, %v1722_v39 }
  0x2d   : > { %1560 = vmatprep.mubr.bf16.mxu1 %v429_v45  ;;  %v1384_v55 = vunpack.c.l.bf16 %v1486_v43  ;;  %v1385_v56 = vunpack.c.h.bf16 %v1486_v43  ;;  %v400_v60 = vadd.f32 %v1739_v58, %v362_v22  ;;  %v431_v61 = vpack.c.bf16 %v410_v50, %v409_v46 }
  0x2e   : > { %1561 = vmatmul.mubr.bf16.vlgmr.msra.gmra.mrb[0].mxu1 %v430_v49  ;;  %v411_v62 = vadd.f32 %v1739_v58, %v373_v41  ;;  %v412_v63 = vadd.f32 %v1739_v58, %v374_v47  ;;  %v413_v0 = vadd.f32 %v1739_v58, %v375_v51  ;;  %v414_v1 = vadd.f32 %v1739_v58, %v376_v54 }
  0x2f   : > { %v1388_v2 = vunpack.c.l.bf16 %v1487_v52  ;;  %v1389_v3 = vunpack.c.h.bf16 %v1487_v52  ;;  %v401_v4 = vadd.f32 %v1739_v58, %v363_v23  ;;  %v402_v5 = vadd.f32 %v1739_v58, %v364_v33  ;;  %1564 = vmatprep.mubr.bf16.mxu1 %v431_v61 }
  0x30   : > { %v365_v6 = vmul.f32 %v1360_v57, %v1722_v39  ;;  %v426_v7 = vpack.c.bf16 %v400_v60, %v399_v53  ;;  %v432_v8 = vpack.c.bf16 %v412_v63, %v411_v62  ;;  %v377_v9 = vmul.f32 %v1384_v55, %v1722_v39 }
  0x31   : > { %1549 = vmatmul.mubr.bf16.gmra.mrb[4].mxu0 %v424_v44  ;;  %v378_v10 = vmul.f32 %v1385_v56, %v1722_v39  ;;  %v366_v12 = vmul.f32 %v1361_v59, %v1722_v39  ;;  %v433_v13 = vpack.c.bf16 %v414_v1, %v413_v0  ;;  %v379_v14 = vmul.f32 %v1388_v2, %v1722_v39 }
  0x32   : > { %1552 = vmatprep.mubr.bf16.mxu0 %v425_v48  ;;  %v380_v15 = vmul.f32 %v1389_v3, %v1722_v39  ;;  %v427_v16 = vpack.c.bf16 %v402_v5, %v401_v4  ;;  %v1392_v18 = vunpack.c.l.bf16 %v1488_v11  ;;  %v403_v57 = vadd.f32 %v1739_v58, %v365_v6 }
  0x33   : > { %v415_v19 = vadd.f32 %v1739_v58, %v377_v9  ;;  %v416_v20 = vadd.f32 %v1739_v58, %v378_v10  ;;  %v1393_v21 = vunpack.c.h.bf16 %v1488_v11  ;;  %v404_v22 = vadd.f32 %v1739_v58, %v366_v12 }
  0x34   : > { %v417_v42 = vadd.f32 %v1739_v58, %v379_v14  ;;  %v418_v59 = vadd.f32 %v1739_v58, %v380_v15  ;;  %v381_v24 = vmul.f32 %v1392_v18, %v1722_v39  ;;  %v698_v31 = vadd.s32 16, %v1704_v17 }
  0x35   : > { %v434_v23 = vpack.c.bf16 %v416_v20, %v415_v19  ;;  %v382_v25 = vmul.f32 %v1393_v21, %v1722_v39  ;;  %v428_v26 = vpack.c.bf16 %v404_v22, %v403_v57  ;;  %v1811_v32 = vstv %s1263_s30 }
  0x36   : > { %1565 = vmatmul.mubr.bf16.gmra.mrb[4].mxu1 %v432_v8  ;;  %v435_v27 = vpack.c.bf16 %v418_v59, %v417_v42  ;;  %v419_v28 = vadd.f32 %v1739_v58, %v381_v24  ;;  %v699_v33 = vadd.s32 24, %v1704_v17  ;;  %v697_v39 = vadd.s32 8, %v1704_v17 }
  0x37   : > { %1568 = vmatprep.mubr.bf16.mxu1 %v433_v13  ;;  %v420_v29 = vadd.f32 %v1739_v58, %v382_v25  ;;  %v729_v34 = vadd.s32 %v1811_v32, %v1704_v17  ;;  %v1818_v35 = vadd.s32 %v1811_v32, %v698_v31  ;;  %v702_v37 = vadd.s32 48, %v1704_v17 }
  0x38   : > { %v1821_v58 = vadd.s32 %v1811_v32, %v699_v33  ;;  %v1824_v36 = vadd.s32 %v1811_v32, %v697_v39  ;;  %v700_v38 = vadd.s32 32, %v1704_v17  ;;  %v703_v40 = vadd.s32 56, %v1704_v17 }
  0x39   : > { %1553 = vmatmul.mubr.bf16.gmra.mrb[8].mxu0 %v426_v7  ;;  %v436_v30 = vpack.c.bf16 %v420_v29, %v419_v28  ;;  %vm761_vm0 = vcmp.lt.s32.totalorder %v729_v34, 316  ;;  %v701_v41 = vadd.s32 40, %v1704_v17  ;;  %v706_v43 = vadd.s32 80, %v1704_v17 }
  0x3a   : > { %1556 = vmatprep.mubr.bf16.mxu0 %v427_v16  ;;  %vm763_vm1 = vcmp.lt.s32.totalorder %v1818_v35, 316  ;;  %vm764_vm2 = vcmp.lt.s32.totalorder %v1821_v58, 316  ;;  %v704_v44 = vadd.s32 64, %v1704_v17  ;;  %v707_v45 = vadd.s32 88, %v1704_v17 }
  0x3b   : > { %v705_v46 = vadd.s32 72, %v1704_v17  ;;  %vm762_vm3 = vcmp.lt.s32.totalorder %v1824_v36, 316  ;;  %v1838_v47 = vadd.s32 %v1811_v32, %v702_v37  ;;  %v1841_v48 = vadd.s32 %v1811_v32, %v700_v38 }
  0x3c   : > { %v710_v49 = vadd.s32 112, %v1704_v17  ;;  %v714_v50 = vadd.s32 144, %v1704_v17  ;;  %v708_v51 = vadd.s32 96, %v1704_v17  ;;  %v711_v52 = vadd.s32 120, %v1704_v17 }
  0x3d   : > { %v709_v53 = vadd.s32 104, %v1704_v17  ;;  %v712_v54 = vadd.s32 128, %v1704_v17  ;;  %v1850_v55 = vadd.s32 %v1811_v32, %v703_v40  ;;  %v1853_v56 = vadd.s32 %v1811_v32, %v701_v41 }
  0x3e   : > { %1569 = vmatmul.mubr.bf16.gmra.mrb[8].mxu1 %v434_v23  ;;  %v1856_v60 = vadd.s32 %v1811_v32, %v706_v43  ;;  %v715_v61 = vadd.s32 152, %v1704_v17  ;;  %v1860_v62 = vadd.s32 %v1811_v32, %v704_v44  ;;  %v1863_v63 = vadd.s32 %v1811_v32, %v707_v45 }
  0x3f   : > { %1572 = vmatprep.mubr.bf16.mxu1 %v435_v27  ;;  %v1866_v0 = vadd.s32 %v1811_v32, %v705_v46  ;;  %v713_v1 = vadd.s32 136, %v1704_v17  ;;  %v1870_v2 = vadd.s32 %v1811_v32, %v710_v49  ;;  %v1873_v3 = vadd.s32 %v1811_v32, %v714_v50 }
  0x40   : > { %v718_v4 = vadd.s32 176, %v1704_v17  ;;  %v716_v5 = vadd.s32 160, %v1704_v17  ;;  %v1878_v7 = vadd.s32 %v1811_v32, %v708_v51  ;;  %v1881_v8 = vadd.s32 %v1811_v32, %v711_v52 }
  0x41   : > { %1557 = vmatmul.mubr.bf16.gmra.mrb[12].mxu0 %v428_v26  ;;  %v1884_v9 = vadd.s32 %v1811_v32, %v709_v53  ;;  %v1887_v10 = vadd.s32 %v1811_v32, %v712_v54  ;;  %vm767_vm4 = vcmp.lt.s32.totalorder %v1838_v47, 316  ;;  %vm765_vm5 = vcmp.lt.s32.totalorder %v1841_v48, 316 }
  0x42   : > { %v1892_v13 = vadd.s32 %v1811_v32, %v715_v61  ;;  %v719_v14 = vadd.s32 184, %v1704_v17  ;;  %v717_v15 = vadd.s32 168, %v1704_v17  ;;  %vm768_vm6 = vcmp.lt.s32.totalorder %v1850_v55, 316 }
  0x43   : > { %v1898_v57 = vadd.s32 %v1811_v32, %v713_v1  ;;  %v722_v19 = vadd.s32 208, %v1704_v17  ;;  %v720_v20 = vadd.s32 192, %v1704_v17  ;;  %vm766_vm7 = vcmp.lt.s32.totalorder %v1853_v56, 316 }
  0x44   : > { %vm779_vm8 = vcmp.lt.s32.totalorder %v1873_v3, 316  ;;  %v1905_v42 = vadd.s32 %v1811_v32, %v718_v4  ;;  %v1908_v59 = vadd.s32 %v1811_v32, %v716_v5  ;;  %v723_v25 = vadd.s32 216, %v1704_v17 }
  0x45   : > { %v721_v26 = vadd.s32 200, %v1704_v17  ;;  %vm777_vm9 = vcmp.lt.s32.totalorder %v1887_v10, 316  ;;  %vm780_vm10 = vcmp.lt.s32.totalorder %v1892_v13, 316  ;;  %v1927_v29 = vadd.s32 %v1811_v32, %v719_v14 }
  0x46   : > { %1573 = vmatmul.mubr.bf16.gmra.mrb[12].mxu1 %v436_v30  ;;  %v1930_v30 = vadd.s32 %v1811_v32, %v717_v15  ;;  %v1935_v39 = vadd.s32 %v1811_v32, %v722_v19  ;;  %v1938_v34 = vadd.s32 %v1811_v32, %v720_v20  ;;  %vm778_vm11 = vcmp.lt.s32.totalorder %v1898_v57, 316 }
  0x47   : > { %v1943_v36 = vadd.s32 %v1811_v32, %v723_v25  ;;  %v1946_v44 = vadd.s32 %v1811_v32, %v721_v26  ;;  %v1949_v45 = vadd.s32 240, %v1704_v17  ;;  %v1952_v46 = vadd.s32 224, %v1704_v17 }
  0x48   : > { %vm771_vm12 = vcmp.lt.s32.totalorder %v1856_v60, 316  ;;  %vm769_vm13 = vcmp.lt.s32.totalorder %v1860_v62, 316  ;;  %vm772_vm14 = vcmp.lt.s32.totalorder %v1863_v63, 316  ;;  %vm770_vm15 = vcmp.lt.s32.totalorder %v1866_v0, 316 }
  0x49   : > { %v1975_v48 = vadd.s32 232, %v1704_v17 }
  0xfc   : > { %v1546_v6 = vpop.f32.mrb[0].mxu0 }
  0xfd   : > { %v664_v11 = vmax.f32 %v1546_v6, 0.0  ;;  %v535_v12 = vpop.f32.mrb[1].mxu0 }
  0xfe   : > { %v662_v16 = vmax.f32 %v535_v12, 0.0  ;;  %v1547_v18 = vpop.f32.mrb[2].mxu0 }
  0xff   : > { %v665_v21 = vmax.f32 %v1547_v18, 0.0  ;;  %v538_v22 = vpop.f32.mrb[3].mxu0  ;;  %v859_v27 = vsel %vm763_vm1, %v664_v11, 0.0  ;;  %v1959_v11 = vadd.s32 248, %v1704_v17  ;;  %vm781_vm1 = vcmp.lt.s32.totalorder %v1908_v59, 316 }
 0x100   : > { %v857_v23 = vsel %vm761_vm0, %v662_v16, 0.0  ;;  %v663_v24 = vmax.f32 %v538_v22, 0.0  ;;  %v1088_v49 = vmul.f32 %v859_v27, %v859_v27  ;;  %vm783_vm0 = vcmp.lt.s32.totalorder %v1905_v42, 316 }
 0x101   : > { %v860_v28 = vsel %vm764_vm2, %v665_v21, 0.0  ;;  %v1086_v35 = vmul.f32 %v857_v23, %v857_v23  ;;  %v1562_v40 = vpop.f32.mrb[0].mxu1  ;;  %vm784_vm2 = vcmp.lt.s32.totalorder %v1927_v29, 316  ;;  %v2030_v62 = vadd.s32 %v1811_v32, %v1959_v11 }
 0x102   : > { %v1402_v31 = vpack.c.bf16 %v860_v28, %v859_v27  ;;  %v858_v33 = vsel %vm762_vm3, %v663_v24, 0.0  ;;  %v599_v43 = vpop.f32.mrb[1].mxu1  ;;  %v1089_v61 = vmul.f32 %v860_v28, %v860_v28  ;;  %v680_v5 = vmax.f32 %v1562_v40, 0.0 }
 0x103   : > { %v1397_v58 = vpack.c.bf16 %v858_v33, %v857_v23  ;;  %v1049_v37 = vadd.f32 %v858_v33, %v857_v23  ;;  %v1087_v38 = vmul.f32 %v858_v33, %v858_v33  ;;  %v1563_v54 = vpop.f32.mrb[2].mxu1  ;;  %v678_v18 = vmax.f32 %v599_v43, 0.0 }
 0x104   : > { %1489 = vst [vmem:[%s1920_s9 + $0x8] sm:$0xff] %v1402_v31   ;;  %v1550_v41 = vpop.f32.mrb[4].mxu0  ;;  %v602_v6 = vpop.f32.mrb[3].mxu1  ;;  %v681_v22 = vmax.f32 %v1563_v54, 0.0  ;;  %v1972_v47 = vsel %vm779_vm8, %v680_v5, 0.0  ;;  %vm775_vm3 = vcmp.lt.s32.totalorder %v1870_v2, 316  ;;  %v2043_v11 = vadd.s32 %v1811_v32, %v1975_v48 }
 0x105   : > { %1398 = vst [vmem:[%s1920_s9] sm:$0xff] %v1397_v58   ;;  %v1050_v50 = vadd.f32 %v1049_v37, %v859_v27  ;;  %v1118_v51 = vadd.f32 %v1087_v38, %v1086_v35  ;;  %v668_v52 = vmax.f32 %v1550_v41, 0.0  ;;  %v551_v53 = vpop.f32.mrb[5].mxu0  ;;  %v1984_v3 = vsel %vm777_vm9, %v678_v18, 0.0 }
 0x106   : > { %v666_v1 = vmax.f32 %v551_v53, 0.0  ;;  %v1551_v4 = vpop.f32.mrb[6].mxu0  ;;  %v1988_v17 = vsel %vm780_vm10, %v681_v22, 0.0  ;;  %v679_v38 = vmax.f32 %v602_v6, 0.0  ;;  %vm787_vm8 = vcmp.lt.s32.totalorder %v1935_v39, 316 }
 0x107   : > { %v1119_v12 = vadd.f32 %v1118_v51, %v1088_v49  ;;  %v1051_v14 = vadd.f32 %v1050_v50, %v860_v28  ;;  %v669_v15 = vmax.f32 %v1551_v4, 0.0  ;;  %v554_v16 = vpop.f32.mrb[7].mxu0  ;;  %v863_v19 = vsel %vm767_vm4, %v668_v52, 0.0 }
 0x108   : > { %v861_v20 = vsel %vm765_vm5, %v666_v1, 0.0  ;;  %v667_v21 = vmax.f32 %v554_v16, 0.0  ;;  %v1092_v55 = vmul.f32 %v863_v19, %v863_v19  ;;  %vm773_vm4 = vcmp.lt.s32.totalorder %v1878_v7, 316 }
 0x109   : > { %v1052_v23 = vadd.f32 %v1051_v14, %v861_v20  ;;  %v1090_v24 = vmul.f32 %v861_v20, %v861_v20  ;;  %v1120_v25 = vadd.f32 %v1119_v12, %v1089_v61  ;;  %v864_v26 = vsel %vm768_vm6, %v669_v15, 0.0  ;;  %v1977_v37 = vpop.f32.mrb[4].mxu1 }
 0x10a   : > { %v1412_v27 = vpack.c.bf16 %v864_v26, %v863_v19  ;;  %v862_v28 = vsel %vm766_vm7, %v667_v21, 0.0  ;;  %v1990_v40 = vpop.f32.mrb[5].mxu1  ;;  %v1442_v10 = vpack.c.bf16 %v1988_v17, %v1972_v47  ;;  %vm782_vm5 = vcmp.lt.s32.totalorder %v1930_v30, 316 }
 0x10b   : > { %v1121_v31 = vadd.f32 %v1120_v25, %v1090_v24  ;;  %v1407_v33 = vpack.c.bf16 %v862_v28, %v861_v20  ;;  %v1053_v35 = vadd.f32 %v1052_v23, %v862_v28  ;;  %v1091_v58 = vmul.f32 %v862_v28, %v862_v28  ;;  %v1998_v13 = vpop.f32.mrb[6].mxu1 }
 0x10c   : > { %1491 = vst [vmem:[%s1920_s9 + $0x18] sm:$0xff] %v1412_v27   ;;  %v1554_v56 = vpop.f32.mrb[8].mxu0  ;;  %vm776_vm6 = vcmp.lt.s32.totalorder %v1881_v8, 316  ;;  %v2004_v53 = vsel %vm778_vm11, %v679_v38, 0.0  ;;  %v618_v54 = vpop.f32.mrb[7].mxu1  ;;  %v2008_v61 = vadd.s32 %v1811_v32, %v1949_v45  ;;  %v2012_v1 = vadd.s32 %v1811_v32, %v1952_v46  ;;  %1497 = vst [vmem:[%s1920_s9 + $0x48] sm:$0xff] %v1442_v10  }
 0x10d   : > { %1490 = vst [vmem:[%s1920_s9 + $0x10] sm:$0xff] %v1407_v33   ;;  %v1054_v41 = vadd.f32 %v1053_v35, %v863_v19  ;;  %v1122_v43 = vadd.f32 %v1121_v31, %v1091_v58  ;;  %v672_v49 = vmax.f32 %v1554_v56, 0.0  ;;  %v567_v50 = vpop.f32.mrb[9].mxu0  ;;  %v1093_v4 = vmul.f32 %v864_v26, %v864_v26 }
 0x10e   : > { %v670_v51 = vmax.f32 %v567_v50, 0.0  ;;  %v1555_v52 = vpop.f32.mrb[10].mxu0  ;;  %vm774_vm7 = vcmp.lt.s32.totalorder %v1884_v9, 316  ;;  %v1437_v46 = vpack.c.bf16 %v2004_v53, %v1984_v3  ;;  %v684_v60 = vmax.f32 %v1977_v37, 0.0 }
 0x10f   : > { %v1123_v5 = vadd.f32 %v1122_v43, %v1092_v55  ;;  %v1055_v6 = vadd.f32 %v1054_v41, %v864_v26  ;;  %v673_v12 = vmax.f32 %v1555_v52, 0.0  ;;  %v570_v14 = vpop.f32.mrb[11].mxu0  ;;  %v867_v57 = vsel %vm771_vm12, %v672_v49, 0.0 }
 0x110   : > { %v865_v45 = vsel %vm769_vm13, %v670_v51, 0.0  ;;  %v671_v15 = vmax.f32 %v570_v14, 0.0  ;;  %1496 = vst [vmem:[%s1920_s9 + $0x40] sm:$0xff] %v1437_v46   ;;  %v682_v0 = vmax.f32 %v1990_v40, 0.0  ;;  %v685_v28 = vmax.f32 %v1998_v13, 0.0 }
 0x111   : > { %v1056_v16 = vadd.f32 %v1055_v6, %v865_v45  ;;  %v1094_v18 = vmul.f32 %v865_v45, %v865_v45  ;;  %v1124_v19 = vadd.f32 %v1123_v5, %v1093_v4  ;;  %v868_v20 = vsel %vm772_vm14, %v673_v12, 0.0  ;;  %v2032_v27 = vpop.f32.mrb[8].mxu1 }
 0x112   : > { %v1422_v21 = vpack.c.bf16 %v868_v20, %v867_v57  ;;  %v866_v22 = vsel %vm770_vm15, %v671_v15, 0.0  ;;  %v683_v31 = vmax.f32 %v618_v54, 0.0  ;;  %v2038_v33 = vpop.f32.mrb[9].mxu1  ;;  %vm785_vm9 = vcmp.lt.s32.totalorder %v1938_v34, 316 }
 0x113   : > { %v1125_v23 = vadd.f32 %v1124_v19, %v1094_v18  ;;  %v1417_v24 = vpack.c.bf16 %v866_v22, %v865_v45  ;;  %v1057_v25 = vadd.f32 %v1056_v16, %v866_v22  ;;  %v1095_v26 = vmul.f32 %v866_v22, %v866_v22  ;;  %v1571_v38 = vpop.f32.mrb[10].mxu1 }
 0x114   : > { %1493 = vst [vmem:[%s1920_s9 + $0x28] sm:$0xff] %v1422_v21   ;;  %v1558_v63 = vpop.f32.mrb[12].mxu0  ;;  %v1096_v35 = vmul.f32 %v867_v57, %v867_v57  ;;  %vm788_vm10 = vcmp.lt.s32.totalorder %v1943_v36, 316  ;;  %vm786_vm11 = vcmp.lt.s32.totalorder %v1946_v44, 316  ;;  %v1097_v40 = vmul.f32 %v868_v20, %v868_v20  ;;  %v634_v48 = vpop.f32.mrb[11].mxu1 }
 0x115   : > { %1492 = vst [vmem:[%s1920_s9 + $0x20] sm:$0xff] %v1417_v24   ;;  %v1058_v58 = vadd.f32 %v1057_v25, %v867_v57  ;;  %v1126_v37 = vadd.f32 %v1125_v23, %v1095_v26  ;;  %v676_v55 = vmax.f32 %v1558_v63, 0.0  ;;  %v583_v56 = vpop.f32.mrb[13].mxu0  ;;  %v2050_v49 = vsel %vm783_vm0, %v684_v60, 0.0 }
 0x116   : > { %v674_v41 = vmax.f32 %v583_v56, 0.0  ;;  %v1559_v43 = vpop.f32.mrb[14].mxu0  ;;  %v2054_v32 = vsel %vm781_vm1, %v682_v0, 0.0  ;;  %vm791_vm12 = vcmp.lt.s32.totalorder %v2008_v61, 316  ;;  %v2059_v52 = vsel %vm784_vm2, %v685_v28, 0.0 }
 0x117   : > { %v1127_v50 = vadd.f32 %v1126_v37, %v1096_v35  ;;  %v1059_v10 = vadd.f32 %v1058_v58, %v868_v20  ;;  %v677_v13 = vmax.f32 %v1559_v43, 0.0  ;;  %v586_v51 = vpop.f32.mrb[15].mxu0  ;;  %v871_v42 = vsel %vm775_vm3, %v676_v55, 0.0 }
 0x118   : > { %v869_v54 = vsel %vm773_vm4, %v674_v41, 0.0  ;;  %v675_v59 = vmax.f32 %v586_v51, 0.0  ;;  %v2067_v4 = vsel %vm782_vm5, %v683_v31, 0.0  ;;  %v1452_v7 = vpack.c.bf16 %v2059_v52, %v2050_v49 }
 0x119   : > { %v1060_v5 = vadd.f32 %v1059_v10, %v869_v54  ;;  %v1098_v6 = vmul.f32 %v869_v54, %v869_v54  ;;  %v1128_v12 = vadd.f32 %v1127_v50, %v1097_v40  ;;  %v872_v29 = vsel %vm776_vm6, %v677_v13, 0.0  ;;  %v1574_v16 = vpop.f32.mrb[12].mxu1 }
 0x11a   : > { %v1432_v14 = vpack.c.bf16 %v872_v29, %v871_v42  ;;  %v870_v2 = vsel %vm774_vm7, %v675_v59, 0.0  ;;  %v688_v30 = vmax.f32 %v2032_v27, 0.0  ;;  %v1100_v18 = vmul.f32 %v871_v42, %v871_v42  ;;  %1499 = vst [vmem:[%s1920_s9 + $0x58] sm:$0xff] %v1452_v7   ;;  %v647_v19 = vpop.f32.mrb[13].mxu1 }
 0x11b   : > { %v1129_v57 = vadd.f32 %v1128_v12, %v1098_v6  ;;  %v1427_v45 = vpack.c.bf16 %v870_v2, %v869_v54  ;;  %v1061_v15 = vadd.f32 %v1060_v5, %v870_v2  ;;  %v1099_v46 = vmul.f32 %v870_v2, %v870_v2  ;;  %v1575_v23 = vpop.f32.mrb[14].mxu1 }
 0x11c   : > { %1495 = vst [vmem:[%s1920_s9 + $0x38] sm:$0xff] %v1432_v14   ;;  %v1102_v8 = vmul.f32 %v1984_v3, %v1984_v3  ;;  %v1447_v9 = vpack.c.bf16 %v2067_v4, %v2054_v32  ;;  %vm789_vm13 = vcmp.lt.s32.totalorder %v2012_v1, 316  ;;  %v1101_v20 = vmul.f32 %v872_v29, %v872_v29  ;;  %v650_v63 = vpop.f32.mrb[15].mxu1 }
 0x11d   : > { %1494 = vst [vmem:[%s1920_s9 + $0x30] sm:$0xff] %v1427_v45   ;;  %v1062_v21 = vadd.f32 %v1061_v15, %v871_v42  ;;  %v1130_v22 = vadd.f32 %v1129_v57, %v1099_v46  ;;  %v686_v60 = vmax.f32 %v2038_v33, 0.0  ;;  %v883_v24 = vsel %vm787_vm8, %v688_v30, 0.0 }
 0x11e   : > { %1498 = vst [vmem:[%s1920_s9 + $0x50] sm:$0xff] %v1447_v9   ;;  %v689_v25 = vmax.f32 %v1571_v38, 0.0  ;;  %v687_v26 = vmax.f32 %v634_v48, 0.0  ;;  %v692_v27 = vmax.f32 %v1574_v16, 0.0  ;;  %v693_v35 = vmax.f32 %v1575_v23, 0.0 }
 0x11f   : > { %v1131_v0 = vadd.f32 %v1130_v22, %v1100_v18  ;;  %v1063_v28 = vadd.f32 %v1062_v21, %v872_v29  ;;  %v881_v31 = vsel %vm785_vm9, %v686_v60, 0.0  ;;  %v690_v39 = vmax.f32 %v647_v19, 0.0 }
 0x120   : > { %v884_v33 = vsel %vm788_vm10, %v689_v25, 0.0  ;;  %v882_v58 = vsel %vm786_vm11, %v687_v26, 0.0  ;;  %vm792_vm14 = vcmp.lt.s32.totalorder %v2030_v62, 316  ;;  %v887_v34 = vsel %vm791_vm12, %v692_v27, 0.0 }
 0x121   : > { %v1064_v37 = vadd.f32 %v1063_v28, %v1984_v3  ;;  %v1132_v55 = vadd.f32 %v1131_v0, %v1101_v20  ;;  %v1462_v56 = vpack.c.bf16 %v884_v33, %v883_v24  ;;  %v1457_v38 = vpack.c.bf16 %v882_v58, %v881_v31 }
 0x122   : > { %vm790_vm15 = vcmp.lt.s32.totalorder %v2043_v11, 316  ;;  %v1103_v44 = vmul.f32 %v2004_v53, %v2004_v53  ;;  %v888_v41 = vsel %vm792_vm14, %v693_v35, 0.0  ;;  %v885_v3 = vsel %vm789_vm13, %v690_v39, 0.0 }
 0x123   : > { %v1133_v36 = vadd.f32 %v1132_v55, %v1102_v8  ;;  %v1065_v40 = vadd.f32 %v1064_v37, %v2004_v53  ;;  %1501 = vst [vmem:[%s1920_s9 + $0x68] sm:$0xff] %v1462_v56   ;;  %1500 = vst [vmem:[%s1920_s9 + $0x60] sm:$0xff] %v1457_v38   ;;  %v1472_v62 = vpack.c.bf16 %v888_v41, %v887_v34  ;;  %v691_v61 = vmax.f32 %v650_v63, 0.0 }
 0x124   : > { %v1104_v43 = vmul.f32 %v1972_v47, %v1972_v47  ;;  %v1105_v50 = vmul.f32 %v1988_v17, %v1988_v17  ;;  %v1106_v1 = vmul.f32 %v2054_v32, %v2054_v32  ;;  %v1107_v5 = vmul.f32 %v2067_v4, %v2067_v4 }
 0x125   : > { %v1066_v11 = vadd.f32 %v1065_v40, %v1972_v47  ;;  %v1134_v48 = vadd.f32 %v1133_v36, %v1103_v44  ;;  %1503 = vst [vmem:[%s1920_s9 + $0x78] sm:$0xff] %v1472_v62   ;;  %v886_v53 = vsel %vm790_vm15, %v691_v61, 0.0  ;;  %v1108_v6 = vmul.f32 %v2050_v49, %v2050_v49 }
 0x126   : > { %v1467_v51 = vpack.c.bf16 %v886_v53, %v885_v3  ;;  %v1109_v29 = vmul.f32 %v2059_v52, %v2059_v52  ;;  %v1110_v2 = vmul.f32 %v881_v31, %v881_v31  ;;  %v1111_v15 = vmul.f32 %v882_v58, %v882_v58 }
 0x127   : > { %v1135_v10 = vadd.f32 %v1134_v48, %v1104_v43  ;;  %v1067_v13 = vadd.f32 %v1066_v11, %v1988_v17  ;;  %v1112_v46 = vmul.f32 %v883_v24, %v883_v24  ;;  %v1113_v18 = vmul.f32 %v884_v33, %v884_v33 }
 0x128   : > { %1502 = vst [vmem:[%s1920_s9 + $0x70] sm:$0xff] %v1467_v51   ;;  %v1114_v9 = vmul.f32 %v885_v3, %v885_v3  ;;  %v1116_v60 = vmul.f32 %v887_v34, %v887_v34  ;;  %v1117_v26 = vmul.f32 %v888_v41, %v888_v41  ;;  %vm1155_vm0 = vcmask 1040384  }
 0x129   : > { %v1068_v42 = vadd.f32 %v1067_v13, %v2054_v32  ;;  %v1136_v54 = vadd.f32 %v1135_v10, %v1105_v50 }
 0x12b   : > { %v1137_v59 = vadd.f32 %v1136_v54, %v1106_v1  ;;  %v1069_v47 = vadd.f32 %v1068_v42, %v2067_v4 }
 0x12d   : > { %v1070_v12 = vadd.f32 %v1069_v47, %v2050_v49  ;;  %v1138_v17 = vadd.f32 %v1137_v59, %v1107_v5 }
 0x12f   : > { %v1139_v14 = vadd.f32 %v1138_v17, %v1108_v6  ;;  %v1071_v32 = vadd.f32 %v1070_v12, %v2059_v52  ;;  %v1115_v52 = vmul.f32 %v886_v53, %v886_v53 }
 0x131   : > { %v1072_v7 = vadd.f32 %v1071_v32, %v881_v31  ;;  %v1140_v30 = vadd.f32 %v1139_v14, %v1109_v29 }
 0x133   : > { %v1141_v57 = vadd.f32 %v1140_v30, %v1110_v2  ;;  %v1073_v45 = vadd.f32 %v1072_v7, %v882_v58 }
 0x135   : > { %v1074_v4 = vadd.f32 %v1073_v45, %v883_v24  ;;  %v1142_v16 = vadd.f32 %v1141_v57, %v1111_v15 }
 0x137   : > { %v1143_v8 = vadd.f32 %v1142_v16, %v1112_v46  ;;  %v1075_v49 = vadd.f32 %v1074_v4, %v884_v33 }
 0x139   : > { %v1076_v19 = vadd.f32 %v1075_v49, %v885_v3  ;;  %v1144_v20 = vadd.f32 %v1143_v8, %v1113_v18 }
 0x13b   : > { %v1145_v21 = vadd.f32 %v1144_v20, %v1114_v9  ;;  %v1077_v22 = vadd.f32 %v1076_v19, %v886_v53 }
 0x13d   : > { %v1078_v23 = vadd.f32 %v1077_v22, %v887_v34  ;;  %v1146_v25 = vadd.f32 %v1145_v21, %v1115_v52 }
 0x13f   : > { %v1079_v27 = vadd.f32 %v1078_v23, %v888_v41  ;;  %v1147_v63 = vadd.f32 %v1146_v25, %v1116_v60 }
 0x141   : > { %v1080_v0 = vrot.slane %v1079_v27, 4  ;;  %v1148_v24 = vadd.f32 %v1147_v63, %v1117_v26 }
 0x143   : > { %v1081_v28 = vadd.f32 %v1080_v0, %v1079_v27  ;;  %v1149_v31 = vrot.slane %v1148_v24, 4 }
 0x145   : > { %v1082_v35 = vrot.slane %v1081_v28, 2  ;;  %v1150_v33 = vadd.f32 %v1149_v31, %v1148_v24 }
 0x147   : > { %v1083_v58 = vadd.f32 %v1082_v35, %v1081_v28  ;;  %v1151_v39 = vrot.slane %v1150_v33, 2 }
 0x149   : > { %v1084_v37 = vrot.slane %v1083_v58, 1  ;;  %v1152_v55 = vadd.f32 %v1151_v39, %v1150_v33 }
 0x14b   : > { %v1153_v56 = vrot.slane %v1152_v55, 1  ;;  %v1085_v34 = vadd.f32 %v1084_v37, %v1083_v58 }
 0x14d   : > { %v1154_v38 = vadd.f32 %v1153_v56, %v1152_v55 }
 0x14f   : > { %v1156_v36 = vsel %vm1155_vm0, %v1085_v34, %v1154_v38 }
 0x150   : > { %1157 = vst [vmem:[%s265_s13] sm:$0x3] %v1156_v36 }
 0x151 PF: > { %s17_s21 = sadd.s32 1, %s1616_s21  }
 0x152   : > { %p14_p5 = scmp.ge.s32.totalorder %s17_s21, 4  }
 0x154   :  { %16 = sbr.rel (!%p14_p5) target bundleno = 1 (0x1), region = 82 }

// kernel: resgcn_forward.11
= control target key start
LH: loop header
LB: loop body
LE: loop exit
PB: predicated region body
PF: predicated region fallthrough
CT: control target
= control target key end

     0   :  { %12 = vsyncpa [#allocation3], 0  ;;  %s2248_s0 = inlined_call_operand.vmem [shape: f32[2,128], index: 0, kind: input, shape index: {}]   ;;  %s2249_s1 = inlined_call_operand.vmem [shape: f32[1,128], index: 1, kind: input, shape index: {}]   ;;  %s2250_s2 = inlined_call_operand.vmem [shape: f32[1,128], index: 2, kind: input, shape index: {}]   ;;  %s2251_s3 = inlined_call_operand.vmem [shape: bf16[512,128], index: 3, kind: input, shape index: {}]   ;;  %s2252_s4 = inlined_call_operand.vmem [shape: bf16[128,128], index: 4, kind: input, shape index: {}]   ;;  %s2253_s5 = inlined_call_operand.vmem [shape: bf16[512,128], index: 5, kind: output, shape index: {0}]   ;;  %s2254_s6 = inlined_call_operand.hbm [shape: f32[2,2,128], index: 6, kind: output, shape index: {1}]  }
   0x1   :  { %14 = vsyncpa [#allocation3 + $0x1], 0  ;;  %s1730_s21 = smov 0   ;;  %s1732_s22 = smov 0  }
   0x2   :  { %s1734_s23 = smov 0   ;;  %s1736_s24 = smov 0  }
   0x3 LB: > { %s1751_s25 = sadd.s32 4294967295, %s1692_s24   ;;  %s1233_s26 = sadd.s32 4294967294, %s1692_s24   ;;  %s1692_s24 = sphi %s1736_s24, %s2260_s24   ;;  %s1688_s23 = sphi %s1734_s23, %s2259_s23   ;;  %s1684_s22 = sphi %s1732_s22, %s2258_s22   ;;  %s1680_s21 = sphi %s1730_s21, %s2257_s21  }
   0x4   : > { %s1755_s27 = sadd.s32 1, %s1692_s24   ;;  %s163_s28 = sadd.s32 1, %s1688_s23 }
   0x5   : > { %s160_s29 = ssub.s32 %s1692_s24, %s1755_s27  ;;  %p173_p0 = scmp.ne.s32.totalorder %s1688_s23, %s1684_s22 }
   0x6   : > { %p161_p1 = scmp.eq.s32.totalorder %s160_s29, 0  ;;  %p174_p2 = scmp.eq.s32.totalorder %s1751_s25, 1 }
   0x7   : > { %p179_p3 = scmp.ne.s32.totalorder %s1684_s22, %s1680_s21  ;;  %p180_p4 = scmp.eq.s32.totalorder %s1233_s26, 1 }
   0x8   : > { %s1766_s30 = scalar_select %p161_p1, %s1688_s23, %s163_s28  }
   0x9   : > { %p1768_p5 = por %p174_p2, %p173_p0  ;;  %p1772_p6 = por %p180_p4, %p179_p3 }
   0xa   : > { %p1236_p7 = scmp.ge.s32.totalorder %s1692_s24, 1  ;;  %p219_p8 = scmp.lt.s32.totalorder %s1692_s24, 3 }
   0xc   : > { %p220_p9 = pnand %p1236_p7, %p219_p8 }
   0xd   : > { %v1620_v0 = vld [vmem:[%s2252_s4] sm:$0xff] (!%p220_p9)   ;;  %v1621_v1 = vld [vmem:[%s2252_s4 + $0x8] sm:$0xff] (!%p220_p9)   ;;  %v1622_v2 = vld [vmem:[%s2252_s4 + $0x10] sm:$0xff] (!%p220_p9)   ;;  %s1797_s26 = sshll.u32 (!%p220_p9), %s1751_s25, 5  ;;  %v346_v15 = vlaneseq (!%p220_p9)  ;;  %s1250_s10 = sshll.u32 (!%p220_p9), %s1751_s25, 8 }
   0xe   : > { %223 = sbr.rel (%p220_p9) target bundleno = 356 (0x164), region = 40  ;;  %1517 = vmatprep.subr.bf16.mxu0 (!%p220_p9), %v1620_v0  ;;  %1565 = vmatprep.subr.bf16.mxu1 (!%p220_p9), %v1620_v0  ;;  %v1623_v3 = vld [vmem:[%s2252_s4 + $0x18] sm:$0xff] (!%p220_p9)   ;;  %v267_v4 = vld [vmem:[%s2248_s0] sm:$0x1] (!%p220_p9)  ;;  %v269_v5 = vld [vmem:[%s2248_s0 + $0x1] sm:$0x1] (!%p220_p9)  ;;  %s2206_s19 = scalar_lea.hbm (!%p220_p9), %s2254_s6, %s1797_s26 }
   0xf   : > { %1518 = vmatpush3.bf16.msra.mxu0 (!%p220_p9), %v1620_v0  ;;  %1573 = vmatpush3.bf16.msra.mxu1 (!%p220_p9), %v1620_v0  ;;  %v268_v6 = vmul.f32 (!%p220_p9), 0.003164557, %v267_v4  ;;  %v270_v7 = vmul.f32 (!%p220_p9), 0.003164557, %v269_v5  ;;  %v1624_v9 = vld [vmem:[%s2252_s4 + $0x20] sm:$0xff] (!%p220_p9)   ;;  %p255_p10 = scmp.lt.s32.totalorder (!%p220_p9), %s1797_s26, 63 }
  0x10   : > { %1519 = vmatprep.subr.bf16.mxu0 (!%p220_p9), %v1621_v1  ;;  %1566 = vmatprep.subr.bf16.mxu1 (!%p220_p9), %v1621_v1  ;;  %v1625_v12 = vld [vmem:[%s2252_s4 + $0x28] sm:$0xff] (!%p220_p9)   ;;  %v1626_v14 = vld [vmem:[%s2252_s4 + $0x30] sm:$0xff] (!%p220_p9)   ;;  %v1627_v16 = vld [vmem:[%s2252_s4 + $0x38] sm:$0xff] (!%p220_p9)   ;;  %v1823_v17 = vshrl.u32 (!%p220_p9), %v346_v15, 7  ;;  %s1694_s29 = smov (!%p220_p9), [#allocation2]  }
  0x11   : > { %v271_v8 = vmul.f32 (!%p220_p9), %v268_v6, %v268_v6  ;;  %v274_v19 = vld [vmem:[%s2249_s1] sm:$0x1] (!%p220_p9)  ;;  %s1634_s9 = sshll.u32 (!%p220_p9), %s1694_s29, 4  ;;  %s1635_s9 = int_to_ptr.vmem [resolvable:$false] %s1634_s9 }
  0x12   : > { %v348_v21 = vsub.s32 (!%p220_p9), 0, %v1823_v17  ;;  %v278_v33 = vld [vmem:[%s2250_s2] sm:$0x1] (!%p220_p9) }
  0x13   : > { %1520 = vmatpush3.bf16.msra.mxu0 (!%p220_p9), %v1621_v1  ;;  %1574 = vmatpush3.bf16.msra.mxu1 (!%p220_p9), %v1621_v1  ;;  %v272_v10 = vsub.f32 (!%p220_p9), %v270_v7, %v271_v8 }
  0x14   : > { %1521 = vmatprep.subr.bf16.mxu0 (!%p220_p9), %v1622_v2  ;;  %1567 = vmatprep.subr.bf16.mxu1 (!%p220_p9), %v1622_v2 }
  0x15   : > { %v273_v11 = vmax.f32 %v272_v10, 0.0  ;;  %s1807_s11 = scalar_select %p255_p10, %s1797_s26, 63 }
  0x17   : > { %1522 = vmatpush3.bf16.msra.mxu0 %v1622_v2  ;;  %1575 = vmatpush3.bf16.msra.mxu1 %v1622_v2  ;;  %v275_v13 = vadd.f32 1e-05, %v273_v11  ;;  %s1239_s14 = sshll.u32 %s1807_s11, 2  ;;  %s251_s11 = sand.u32 1, %s1684_s22  }
  0x18   : > { %1523 = vmatprep.subr.bf16.mxu0 %v1623_v3  ;;  %1568 = vmatprep.subr.bf16.mxu1 %v1623_v3  ;;  %s1818_s17 = scalar_lea.vmem %s2251_s3, %s1239_s14  ;;  %s2016_s13 = scalar_lea.vmem %s2253_s5, %s1239_s14 }
  0x19   : > { %1628 = vrsqrt.f32 %v275_v13  ;;  %v1320_v18 = vld [vmem:[%s1818_s17] sm:$0xff]   ;;  %v1463_v20 = vld [vmem:[%s1818_s17 + $0x8] sm:$0xff]   ;;  %v1464_v22 = vld [vmem:[%s1818_s17 + $0x10] sm:$0xff]   ;;  %s1237_s14 = sshll.u32 %s251_s11, 1  ;;  %s1132_s20 = scalar_lea.sflag [#allocation3], %s251_s11 }
  0x1a   : > { %v1465_v23 = vld [vmem:[%s1818_s17 + $0x18] sm:$0xff]   ;;  %v1321_v25 = vunpack.c.l.bf16 %v1320_v18  ;;  %v1466_v26 = vld [vmem:[%s1818_s17 + $0x20] sm:$0xff]   ;;  %v1322_v28 = vunpack.c.h.bf16 %v1320_v18  ;;  %v1325_v29 = vunpack.c.l.bf16 %v1463_v20  ;;  %v1326_v30 = vunpack.c.h.bf16 %v1463_v20  ;;  %v1467_v31 = vld [vmem:[%s1818_s17 + $0x28] sm:$0xff]   ;;  %s253_s15 = scalar_lea.vmem [#allocation2], %s1237_s14 }
  0x1b   : > { %1524 = vmatpush3.bf16.msra.mxu0 %v1623_v3  ;;  %1576 = vmatpush3.bf16.msra.mxu1 %v1623_v3  ;;  %v1836_v32 = vld [vmem:[%s1818_s17 + $0x30] sm:$0xff]   ;;  %v1329_v34 = vunpack.c.l.bf16 %v1464_v22  ;;  %v1330_v35 = vunpack.c.h.bf16 %v1464_v22  ;;  %v1333_v36 = vunpack.c.l.bf16 %v1465_v23  ;;  %v1334_v37 = vunpack.c.h.bf16 %v1465_v23  ;;  %v1844_v42 = vld [vmem:[%s1818_s17 + $0x38] sm:$0xff]   ;;  %v1470_v47 = vld [vmem:[%s1818_s17 + $0x40] sm:$0xff]   ;;  %s1149_s16 = sshll.u32 %s253_s15, 4  ;;  %s2208_s16 = int_to_ptr.vmem [resolvable:$true] %s1149_s16 }
  0x1c   : > { %1525 = vmatprep.subr.bf16.mxu0 %v1624_v9  ;;  %1569 = vmatprep.subr.bf16.mxu1 %v1624_v9  ;;  %v1337_v40 = vunpack.c.l.bf16 %v1466_v26  ;;  %v1338_v41 = vunpack.c.h.bf16 %v1466_v26  ;;  %v1341_v43 = vunpack.c.l.bf16 %v1467_v31  ;;  %v1342_v44 = vunpack.c.h.bf16 %v1467_v31  ;;  %v1471_v52 = vld [vmem:[%s1818_s17 + $0x48] sm:$0xff]   ;;  %v1472_v53 = vld [vmem:[%s1818_s17 + $0x50] sm:$0xff]   ;;  %v1474_v7 = vld [vmem:[%s1818_s17 + $0x60] sm:$0xff]   ;;  %s1630_s28 = scalar_lea.vmem %s2208_s16, 32  ;;  %p1637_p0 = scmp.lt.s32.totalorder %s2208_s16, %s1635_s9 }
  0x1d   : > { %v1345_v45 = vunpack.c.l.bf16 %v1836_v32  ;;  %v1346_v46 = vunpack.c.h.bf16 %v1836_v32  ;;  %v1349_v57 = vunpack.c.l.bf16 %v1844_v42  ;;  %v1350_v59 = vunpack.c.h.bf16 %v1844_v42  ;;  %p1631_p11 = scmp.ne.s32.totalorder %s2208_s16, %s1630_s28 }
  0x1e   : > { %v1353_v60 = vunpack.c.l.bf16 %v1470_v47  ;;  %v1354_v61 = vunpack.c.h.bf16 %v1470_v47  ;;  %v1357_v62 = vunpack.c.l.bf16 %v1471_v52  ;;  %v1358_v63 = vunpack.c.h.bf16 %v1471_v52  ;;  %v1476_v52 = vld [vmem:[%s1818_s17 + $0x70] sm:$0xff]  }
  0x1f   : > { %1526 = vmatpush3.bf16.msra.mxu0 %v1624_v9  ;;  %1577 = vmatpush3.bf16.msra.mxu1 %v1624_v9  ;;  %v1361_v0 = vunpack.c.l.bf16 %v1472_v53  ;;  %v1362_v1 = vunpack.c.h.bf16 %v1472_v53  ;;  %v1369_v20 = vunpack.c.l.bf16 %v1474_v7  ;;  %p1632_p12 = pnand %p1631_p11, %p1768_p5 }
  0x20   : > { %1527 = vmatprep.subr.bf16.mxu0 %v1625_v12  ;;  %1570 = vmatprep.subr.bf16.mxu1 %v1625_v12 }
  0x21   : > { %p1633_p13 = pneg %p1632_p12 }
  0x23   : > { %1528 = vmatpush3.bf16.msra.mxu0 %v1625_v12  ;;  %1578 = vmatpush3.bf16.msra.mxu1 %v1625_v12  ;;  %v1629_v24 = vpop.eup %1628 }
  0x24   : > { %1529 = vmatprep.subr.bf16.mxu0 %v1626_v14  ;;  %1571 = vmatprep.subr.bf16.mxu1 %v1626_v14  ;;  %v277_v27 = vmul.f32 %v1629_v24, %v274_v19  ;;  %v1370_v24 = vunpack.c.h.bf16 %v1474_v7 }
  0x26   : > { %v279_v38 = vmul.f32 %v277_v27, %v268_v6  ;;  %v1841_v39 = vrot.slane %v277_v27, %v348_v21  ;;  %v1473_v6 = vld [vmem:[%s1818_s17 + $0x58] sm:$0xff]  }
  0x27   : > { %1530 = vmatpush3.bf16.msra.mxu0 %v1626_v14  ;;  %1579 = vmatpush3.bf16.msra.mxu1 %v1626_v14  ;;  %v1365_v18 = vunpack.c.l.bf16 %v1473_v6  ;;  %v1366_v19 = vunpack.c.h.bf16 %v1473_v6 }
  0x28   : > { %1531 = vmatprep.subr.bf16.mxu0 %v1627_v16  ;;  %1572 = vmatprep.subr.bf16.mxu1 %v1627_v16  ;;  %v280_v48 = vsub.f32 %v278_v33, %v279_v38  ;;  %v351_v49 = vmul.f32 %v1321_v25, %v1841_v39  ;;  %v352_v50 = vmul.f32 %v1322_v28, %v1841_v39 }
  0x29   : > { %v353_v51 = vmul.f32 %v1325_v29, %v1841_v39  ;;  %v354_v54 = vmul.f32 %v1326_v30, %v1841_v39  ;;  %v355_v55 = vmul.f32 %v1329_v34, %v1841_v39  ;;  %v356_v56 = vmul.f32 %v1330_v35, %v1841_v39 }
  0x2a   : > { %v1858_v58 = vrot.slane %v280_v48, %v348_v21  ;;  %v357_v10 = vmul.f32 %v1333_v36, %v1841_v39  ;;  %v358_v11 = vmul.f32 %v1334_v37, %v1841_v39  ;;  %v359_v14 = vmul.f32 %v1337_v40, %v1841_v39 }
  0x2b   : > { %1532 = vmatpush3.bf16.msra.mxu0 %v1627_v16  ;;  %1580 = vmatpush3.bf16.msra.mxu1 %v1627_v16  ;;  %v360_v15 = vmul.f32 %v1338_v41, %v1841_v39  ;;  %v361_v21 = vmul.f32 %v1341_v43, %v1841_v39  ;;  %v362_v22 = vmul.f32 %v1342_v44, %v1841_v39  ;;  %v1475_v43 = vld [vmem:[%s1818_s17 + $0x68] sm:$0xff]  }
  0x2c   : > { %v389_v2 = vadd.f32 %v1858_v58, %v351_v49  ;;  %v390_v3 = vadd.f32 %v1858_v58, %v352_v50  ;;  %v391_v4 = vadd.f32 %v1858_v58, %v353_v51  ;;  %v392_v5 = vadd.f32 %v1858_v58, %v354_v54 }
  0x2d   : > { %v393_v8 = vadd.f32 %v1858_v58, %v355_v55  ;;  %v394_v9 = vadd.f32 %v1858_v58, %v356_v56  ;;  %v363_v23 = vmul.f32 %v1345_v45, %v1841_v39  ;;  %v395_v25 = vadd.f32 %v1858_v58, %v357_v10 }
  0x2e   : > { %v421_v12 = vpack.c.bf16 %v390_v3, %v389_v2  ;;  %v422_v13 = vpack.c.bf16 %v392_v5, %v391_v4  ;;  %v396_v26 = vadd.f32 %v1858_v58, %v358_v11  ;;  %v367_v27 = vmul.f32 %v1353_v60, %v1841_v39  ;;  %v1477_v11 = vld [vmem:[%s1818_s17 + $0x78] sm:$0xff]  }
  0x2f   : > { %v423_v16 = vpack.c.bf16 %v394_v9, %v393_v8  ;;  %v368_v28 = vmul.f32 %v1354_v61, %v1841_v39  ;;  %v397_v29 = vadd.f32 %v1858_v58, %v359_v14  ;;  %v398_v30 = vadd.f32 %v1858_v58, %v360_v15 }
  0x30   : > { %1533 = vmatprep.mubr.bf16.mxu0 %v421_v12  ;;  %v369_v31 = vmul.f32 %v1357_v62, %v1841_v39  ;;  %v370_v32 = vmul.f32 %v1358_v63, %v1841_v39  ;;  %v364_v33 = vmul.f32 %v1346_v46, %v1841_v39  ;;  %v405_v34 = vadd.f32 %v1858_v58, %v367_v27 }
  0x31   : > { %1534 = vmatmul.mubr.bf16.vlgmr.msra.gmra.mrb[0].mxu0 %v422_v13  ;;  %v406_v35 = vadd.f32 %v1858_v58, %v368_v28  ;;  %v371_v36 = vmul.f32 %v1361_v0, %v1841_v39  ;;  %v372_v40 = vmul.f32 %v1362_v1, %v1841_v39  ;;  %v373_v41 = vmul.f32 %v1365_v18, %v1841_v39 }
  0x32   : > { %1537 = vmatprep.mubr.bf16.mxu0 %v423_v16  ;;  %v407_v37 = vadd.f32 %v1858_v58, %v369_v31  ;;  %v408_v38 = vadd.f32 %v1858_v58, %v370_v32  ;;  %v424_v44 = vpack.c.bf16 %v396_v26, %v395_v25  ;;  %v374_v47 = vmul.f32 %v1366_v19, %v1841_v39 }
  0x33   : > { %v429_v45 = vpack.c.bf16 %v406_v35, %v405_v34  ;;  %v409_v46 = vadd.f32 %v1858_v58, %v371_v36  ;;  %v425_v48 = vpack.c.bf16 %v398_v30, %v397_v29  ;;  %v410_v50 = vadd.f32 %v1858_v58, %v372_v40 }
  0x34   : > { %v430_v49 = vpack.c.bf16 %v408_v38, %v407_v37  ;;  %v375_v51 = vmul.f32 %v1369_v20, %v1841_v39  ;;  %v399_v53 = vadd.f32 %v1858_v58, %v361_v21  ;;  %v376_v54 = vmul.f32 %v1370_v24, %v1841_v39 }
  0x35   : > { %1549 = vmatprep.mubr.bf16.mxu1 %v429_v45  ;;  %v1373_v55 = vunpack.c.l.bf16 %v1475_v43  ;;  %v1374_v56 = vunpack.c.h.bf16 %v1475_v43  ;;  %v400_v60 = vadd.f32 %v1858_v58, %v362_v22  ;;  %v431_v61 = vpack.c.bf16 %v410_v50, %v409_v46 }
  0x36   : > { %1550 = vmatmul.mubr.bf16.vlgmr.msra.gmra.mrb[0].mxu1 %v430_v49  ;;  %v411_v62 = vadd.f32 %v1858_v58, %v373_v41  ;;  %v412_v63 = vadd.f32 %v1858_v58, %v374_v47  ;;  %v413_v0 = vadd.f32 %v1858_v58, %v375_v51  ;;  %v414_v1 = vadd.f32 %v1858_v58, %v376_v54 }
  0x37   : > { %v1377_v2 = vunpack.c.l.bf16 %v1476_v52  ;;  %v1378_v3 = vunpack.c.h.bf16 %v1476_v52  ;;  %v401_v4 = vadd.f32 %v1858_v58, %v363_v23  ;;  %v402_v5 = vadd.f32 %v1858_v58, %v364_v33  ;;  %1553 = vmatprep.mubr.bf16.mxu1 %v431_v61 }
  0x38   : > { %v365_v6 = vmul.f32 %v1349_v57, %v1841_v39  ;;  %v426_v7 = vpack.c.bf16 %v400_v60, %v399_v53  ;;  %v432_v8 = vpack.c.bf16 %v412_v63, %v411_v62  ;;  %v377_v9 = vmul.f32 %v1373_v55, %v1841_v39 }
  0x39   : > { %1538 = vmatmul.mubr.bf16.gmra.mrb[4].mxu0 %v424_v44  ;;  %v378_v10 = vmul.f32 %v1374_v56, %v1841_v39  ;;  %v366_v12 = vmul.f32 %v1350_v59, %v1841_v39  ;;  %v433_v13 = vpack.c.bf16 %v414_v1, %v413_v0  ;;  %v379_v14 = vmul.f32 %v1377_v2, %v1841_v39 }
  0x3a   : > { %1541 = vmatprep.mubr.bf16.mxu0 %v425_v48  ;;  %v380_v15 = vmul.f32 %v1378_v3, %v1841_v39  ;;  %v427_v16 = vpack.c.bf16 %v402_v5, %v401_v4  ;;  %v1381_v18 = vunpack.c.l.bf16 %v1477_v11  ;;  %v403_v57 = vadd.f32 %v1858_v58, %v365_v6 }
  0x3b   : > { %v415_v19 = vadd.f32 %v1858_v58, %v377_v9  ;;  %v416_v20 = vadd.f32 %v1858_v58, %v378_v10  ;;  %v1382_v21 = vunpack.c.h.bf16 %v1477_v11  ;;  %v404_v22 = vadd.f32 %v1858_v58, %v366_v12 }
  0x3c   : > { %v417_v42 = vadd.f32 %v1858_v58, %v379_v14  ;;  %v418_v59 = vadd.f32 %v1858_v58, %v380_v15  ;;  %v381_v24 = vmul.f32 %v1381_v18, %v1841_v39  ;;  %v666_v31 = vadd.s32 16, %v1823_v17 }
  0x3d   : > { %v434_v23 = vpack.c.bf16 %v416_v20, %v415_v19  ;;  %v382_v25 = vmul.f32 %v1382_v21, %v1841_v39  ;;  %v428_v26 = vpack.c.bf16 %v404_v22, %v403_v57  ;;  %v1930_v32 = vstv %s1250_s10  ;;  %s1636_s10 = scalar_lea.vmem %s1635_s9, 64 }
  0x3e   : > { %1554 = vmatmul.mubr.bf16.gmra.mrb[4].mxu1 %v432_v8  ;;  %v435_v27 = vpack.c.bf16 %v418_v59, %v417_v42  ;;  %v419_v28 = vadd.f32 %v1858_v58, %v381_v24  ;;  %v667_v33 = vadd.s32 24, %v1823_v17  ;;  %v699_v39 = vadd.s32 %v1930_v32, %v666_v31  ;;  %p1638_p1 = scmp.lt.s32.totalorder %s1636_s10, %s1630_s28 }
  0x3f   : > { %1557 = vmatprep.mubr.bf16.mxu1 %v433_v13  ;;  %v420_v29 = vadd.f32 %v1858_v58, %v382_v25  ;;  %v697_v34 = vadd.s32 %v1930_v32, %v1823_v17  ;;  %v665_v58 = vadd.s32 8, %v1823_v17  ;;  %v670_v36 = vadd.s32 48, %v1823_v17 }
  0x40   : > { %v700_v35 = vadd.s32 %v1930_v32, %v667_v33  ;;  %v668_v37 = vadd.s32 32, %v1823_v17  ;;  %v671_v38 = vadd.s32 56, %v1823_v17  ;;  %v669_v40 = vadd.s32 40, %v1823_v17  ;;  %p1639_p2 = por %p1638_p1, %p1637_p0 }
  0x41   : > { %1542 = vmatmul.mubr.bf16.gmra.mrb[8].mxu0 %v426_v7  ;;  %v436_v30 = vpack.c.bf16 %v420_v29, %v419_v28  ;;  %vm731_vm0 = vcmp.lt.s32.totalorder %v699_v39, 316  ;;  %vm729_vm1 = vcmp.lt.s32.totalorder %v697_v34, 316  ;;  %v698_v41 = vadd.s32 %v1930_v32, %v665_v58 }
  0x42   : > { %1545 = vmatprep.mubr.bf16.mxu0 %v427_v16  ;;  %vm732_vm2 = vcmp.lt.s32.totalorder %v700_v35, 316  ;;  %v1944_v43 = vadd.s32 %v1930_v32, %v670_v36  ;;  %v674_v44 = vadd.s32 80, %v1823_v17  ;;  %v1948_v45 = vadd.s32 %v1930_v32, %v668_v37  ;;  %p1640_p3 = pnand %p1639_p2, %p1633_p13 }
  0x43   : > { %v672_v46 = vadd.s32 64, %v1823_v17  ;;  %v675_v47 = vadd.s32 88, %v1823_v17  ;;  %v682_v48 = vadd.s32 144, %v1823_v17  ;;  %v1954_v49 = vadd.s32 %v1930_v32, %v671_v38 }
  0x44   : > { %v1957_v50 = vadd.s32 %v1930_v32, %v669_v40  ;;  %v673_v51 = vadd.s32 72, %v1823_v17  ;;  %v678_v52 = vadd.s32 112, %v1823_v17  ;;  %v676_v53 = vadd.s32 96, %v1823_v17 }
  0x45   : > { %v679_v54 = vadd.s32 120, %v1823_v17  ;;  %v677_v55 = vadd.s32 104, %v1823_v17  ;;  %v680_v56 = vadd.s32 128, %v1823_v17  ;;  %vm730_vm3 = vcmp.lt.s32.totalorder %v698_v41, 316 }
  0x46   : > { %1558 = vmatmul.mubr.bf16.gmra.mrb[8].mxu1 %v434_v23  ;;  %v1966_v60 = vadd.s32 %v1930_v32, %v674_v44  ;;  %v683_v61 = vadd.s32 152, %v1823_v17  ;;  %v681_v62 = vadd.s32 136, %v1823_v17  ;;  %vm735_vm4 = vcmp.lt.s32.totalorder %v1944_v43, 316 }
  0x47   : > { %1561 = vmatprep.mubr.bf16.mxu1 %v435_v27  ;;  %vm733_vm5 = vcmp.lt.s32.totalorder %v1948_v45, 316  ;;  %v1973_v63 = vadd.s32 %v1930_v32, %v672_v46  ;;  %v1976_v0 = vadd.s32 %v1930_v32, %v675_v47  ;;  %v1979_v1 = vadd.s32 %v1930_v32, %v682_v48 }
  0x48   : > { %v686_v2 = vadd.s32 176, %v1823_v17  ;;  %vm736_vm6 = vcmp.lt.s32.totalorder %v1954_v49, 316  ;;  %v1984_v4 = vadd.s32 %v1930_v32, %v673_v51  ;;  %v1987_v5 = vadd.s32 %v1930_v32, %v678_v52 }
  0x49   : > { %1546 = vmatmul.mubr.bf16.gmra.mrb[12].mxu0 %v428_v26  ;;  %v684_v6 = vadd.s32 160, %v1823_v17  ;;  %v687_v7 = vadd.s32 184, %v1823_v17  ;;  %vm734_vm7 = vcmp.lt.s32.totalorder %v1957_v50, 316  ;;  %v1993_v9 = vadd.s32 %v1930_v32, %v676_v53 }
  0x4a   : > { %v1996_v10 = vadd.s32 %v1930_v32, %v679_v54  ;;  %v1999_v11 = vadd.s32 %v1930_v32, %v677_v55  ;;  %v2002_v12 = vadd.s32 %v1930_v32, %v680_v56  ;;  %v716_v15 = vadd.s32 %v1930_v32, %v683_v61 }
  0x4b   : > { %v2007_v16 = vadd.s32 %v1930_v32, %v681_v62  ;;  %v685_v18 = vadd.s32 168, %v1823_v17  ;;  %vm747_vm8 = vcmp.lt.s32.totalorder %v1979_v1, 316  ;;  %v2021_v21 = vadd.s32 %v1930_v32, %v686_v2 }
  0x4c   : > { %v2025_v59 = vadd.s32 %v1930_v32, %v684_v6  ;;  %v2028_v23 = vadd.s32 %v1930_v32, %v687_v7  ;;  %vm745_vm9 = vcmp.lt.s32.totalorder %v2002_v12, 316  ;;  %vm748_vm10 = vcmp.lt.s32.totalorder %v716_v15, 316 }
  0x4d   : > { %vm746_vm11 = vcmp.lt.s32.totalorder %v2007_v16, 316  ;;  %v2034_v28 = vadd.s32 %v1930_v32, %v685_v18  ;;  %vm739_vm12 = vcmp.lt.s32.totalorder %v1966_v60, 316  ;;  %vm737_vm13 = vcmp.lt.s32.totalorder %v1973_v63, 316 }
  0x4e   : > { %1562 = vmatmul.mubr.bf16.gmra.mrb[12].mxu1 %v436_v30  ;;  %vm751_vm14 = vcmp.lt.s32.totalorder %v2021_v21, 316  ;;  %vm740_vm15 = vcmp.lt.s32.totalorder %v1976_v0, 316  ;;  %v690_v35 = vadd.s32 208, %v1823_v17  ;;  %v688_v58 = vadd.s32 192, %v1823_v17 }
  0x4f   : > { %v691_v36 = vadd.s32 216, %v1823_v17  ;;  %v689_v46 = vadd.s32 200, %v1823_v17 }
  0x50   : > { %v2079_v12 = vadd.s32 %v1930_v32, %v688_v58 }
 0x104   : > { %v1535_v3 = vpop.f32.mrb[0].mxu0 }
 0x105   : > { %v535_v8 = vpop.f32.mrb[1].mxu0  ;;  %v827_v57 = vsel %vm731_vm0, %v1535_v3, 0.0  ;;  %vm752_vm0 = vcmp.lt.s32.totalorder %v2028_v23, 316  ;;  %v2069_v3 = vadd.s32 %v1930_v32, %v690_v35  ;;  %v693_v23 = vadd.s32 232, %v1823_v17 }
 0x106   : > { %v825_v13 = vsel %vm729_vm1, %v535_v8, 0.0  ;;  %v1536_v14 = vpop.f32.mrb[2].mxu0  ;;  %v1056_v29 = vmul.f32 %v827_v57, %v827_v57  ;;  %vm738_vm1 = vcmp.lt.s32.totalorder %v1984_v4, 316 }
 0x107   : > { %v828_v19 = vsel %vm732_vm2, %v1536_v14, 0.0  ;;  %v538_v20 = vpop.f32.mrb[3].mxu0  ;;  %v1054_v24 = vmul.f32 %v825_v13, %v825_v13  ;;  %vm749_vm2 = vcmp.lt.s32.totalorder %v2025_v59, 316  ;;  %v2082_v14 = vadd.s32 %v1930_v32, %v691_v36 }
 0x108   : > { %v1391_v22 = vpack.c.bf16 %v828_v19, %v827_v57  ;;  %v826_v42 = vsel %vm730_vm3, %v538_v20, 0.0  ;;  %v1057_v37 = vmul.f32 %v828_v19, %v828_v19  ;;  %vm750_vm3 = vcmp.lt.s32.totalorder %v2034_v28, 316 }
 0x109   : > { %v1386_v25 = vpack.c.bf16 %v826_v42, %v825_v13  ;;  %v1017_v26 = vadd.f32 %v826_v42, %v825_v13  ;;  %v1055_v27 = vmul.f32 %v826_v42, %v826_v42  ;;  %v1551_v33 = vpop.f32.mrb[0].mxu1  ;;  %v2093_v42 = vadd.s32 %v1930_v32, %v689_v46 }
 0x10a   : > { %1478 = vst [vmem:[%s2016_s13 + $0x8] sm:$0xff] %v1391_v22   ;;  %v599_v34 = vpop.f32.mrb[1].mxu1  ;;  %v2054_v52 = vsel %vm747_vm8, %v1551_v33, 0.0  ;;  %vm742_vm8 = vcmp.lt.s32.totalorder %v1999_v11, 316  ;;  %v695_v33 = vadd.s32 248, %v1823_v17 }
 0x10b   : > { %1387 = vst [vmem:[%s2016_s13] sm:$0xff] %v1386_v25   ;;  %v1018_v30 = vadd.f32 %v1017_v26, %v827_v57  ;;  %v1086_v31 = vadd.f32 %v1055_v27, %v1054_v24  ;;  %v1552_v44 = vpop.f32.mrb[2].mxu1  ;;  %v2066_v2 = vsel %vm745_vm9, %v599_v34, 0.0  ;;  %v694_v24 = vadd.s32 240, %v1823_v17 }
 0x10c   : > { %v1539_v39 = vpop.f32.mrb[4].mxu0  ;;  %v2057_v53 = vsel %vm748_vm10, %v1552_v44, 0.0  ;;  %v602_v54 = vpop.f32.mrb[3].mxu1  ;;  %v692_v25 = vadd.s32 224, %v1823_v17  ;;  %vm753_vm9 = vcmp.lt.s32.totalorder %v2079_v12, 316  ;;  %vm756_vm10 = vcmp.lt.s32.totalorder %v2082_v14, 316 }
 0x10d   : > { %v1087_v38 = vadd.f32 %v1086_v31, %v1056_v29  ;;  %v551_v40 = vpop.f32.mrb[5].mxu0  ;;  %v1019_v41 = vadd.f32 %v1018_v30, %v828_v19  ;;  %v831_v47 = vsel %vm735_vm4, %v1539_v39, 0.0  ;;  %v1431_v13 = vpack.c.bf16 %v2057_v53, %v2054_v52 }
 0x10e   : > { %v829_v48 = vsel %vm733_vm5, %v551_v40, 0.0  ;;  %v1540_v51 = vpop.f32.mrb[6].mxu0  ;;  %v2076_v50 = vsel %vm746_vm11, %v602_v54, 0.0  ;;  %v1060_v15 = vmul.f32 %v831_v47, %v831_v47  ;;  %vm743_vm4 = vcmp.lt.s32.totalorder %v1987_v5, 316 }
 0x10f   : > { %v1020_v55 = vadd.f32 %v1019_v41, %v829_v48  ;;  %v1058_v56 = vmul.f32 %v829_v48, %v829_v48  ;;  %v1088_v61 = vadd.f32 %v1087_v38, %v1057_v37  ;;  %v832_v43 = vsel %vm736_vm6, %v1540_v51, 0.0  ;;  %v554_v62 = vpop.f32.mrb[7].mxu0  ;;  %1486 = vst [vmem:[%s2016_s13 + $0x48] sm:$0xff] %v1431_v13  }
 0x110   : > { %v1401_v45 = vpack.c.bf16 %v832_v43, %v831_v47  ;;  %v830_v1 = vsel %vm734_vm7, %v554_v62, 0.0  ;;  %vm741_vm5 = vcmp.lt.s32.totalorder %v1993_v9, 316  ;;  %v1426_v16 = vpack.c.bf16 %v2076_v50, %v2066_v2 }
 0x111   : > { %v1089_v6 = vadd.f32 %v1088_v61, %v1058_v56  ;;  %v1396_v7 = vpack.c.bf16 %v830_v1, %v829_v48  ;;  %v1021_v8 = vadd.f32 %v1020_v55, %v830_v1  ;;  %v1059_v49 = vmul.f32 %v830_v1, %v830_v1  ;;  %v1555_v19 = vpop.f32.mrb[4].mxu1 }
 0x112   : > { %1480 = vst [vmem:[%s2016_s13 + $0x18] sm:$0xff] %v1401_v45   ;;  %vm744_vm6 = vcmp.lt.s32.totalorder %v1996_v10, 316  ;;  %v615_v22 = vpop.f32.mrb[5].mxu1  ;;  %vm755_vm7 = vcmp.lt.s32.totalorder %v2069_v3, 316  ;;  %v1061_v26 = vmul.f32 %v832_v43, %v832_v43  ;;  %1485 = vst [vmem:[%s2016_s13 + $0x40] sm:$0xff] %v1426_v16   ;;  %v2106_v58 = vsel %vm751_vm14, %v1555_v19, 0.0 }
 0x113   : > { %1479 = vst [vmem:[%s2016_s13 + $0x10] sm:$0xff] %v1396_v7   ;;  %v1022_v18 = vadd.f32 %v1021_v8, %v831_v47  ;;  %v1090_v57 = vadd.f32 %v1089_v6, %v1059_v49  ;;  %v1556_v31 = vpop.f32.mrb[6].mxu1  ;;  %v2118_v46 = vsel %vm749_vm2, %v615_v22, 0.0  ;;  %vm754_vm11 = vcmp.lt.s32.totalorder %v2093_v42, 316 }
 0x114   : > { %v1543_v20 = vpop.f32.mrb[8].mxu0  ;;  %v2110_v36 = vsel %vm752_vm0, %v1556_v31, 0.0  ;;  %v618_v37 = vpop.f32.mrb[7].mxu1  ;;  %v727_v28 = vadd.s32 %v1930_v32, %v694_v24  ;;  %v725_v45 = vadd.s32 %v1930_v32, %v692_v25  ;;  %v728_v1 = vadd.s32 %v1930_v32, %v695_v33 }
 0x115   : > { %v1091_v27 = vadd.f32 %v1090_v57, %v1060_v15  ;;  %v567_v29 = vpop.f32.mrb[9].mxu0  ;;  %v1023_v30 = vadd.f32 %v1022_v18, %v832_v43  ;;  %v835_v39 = vsel %vm739_vm12, %v1543_v20, 0.0  ;;  %v1441_v0 = vpack.c.bf16 %v2110_v36, %v2106_v58 }
 0x116   : > { %v833_v34 = vsel %vm737_vm13, %v567_v29, 0.0  ;;  %v1544_v35 = vpop.f32.mrb[10].mxu0  ;;  %v2126_v55 = vsel %vm750_vm3, %v618_v37, 0.0  ;;  %v1064_v4 = vmul.f32 %v835_v39, %v835_v39  ;;  %v726_v15 = vadd.s32 %v1930_v32, %v693_v23 }
 0x117   : > { %v1024_v38 = vadd.f32 %v1023_v30, %v833_v34  ;;  %v1062_v40 = vmul.f32 %v833_v34, %v833_v34  ;;  %v1092_v41 = vadd.f32 %v1091_v27, %v1061_v26  ;;  %v836_v60 = vsel %vm740_vm15, %v1544_v35, 0.0  ;;  %v570_v63 = vpop.f32.mrb[11].mxu0  ;;  %1488 = vst [vmem:[%s2016_s13 + $0x58] sm:$0xff] %v1441_v0  }
 0x118   : > { %v1411_v44 = vpack.c.bf16 %v836_v60, %v835_v39  ;;  %v834_v21 = vsel %vm738_vm1, %v570_v63, 0.0  ;;  %v1436_v56 = vpack.c.bf16 %v2126_v55, %v2118_v46  ;;  %v1065_v6 = vmul.f32 %v836_v60, %v836_v60 }
 0x119   : > { %v1093_v47 = vadd.f32 %v1092_v41, %v1062_v40  ;;  %v1406_v48 = vpack.c.bf16 %v834_v21, %v833_v34  ;;  %v1025_v51 = vadd.f32 %v1024_v38, %v834_v21  ;;  %v1063_v54 = vmul.f32 %v834_v21, %v834_v21  ;;  %v1559_v61 = vpop.f32.mrb[8].mxu1 }
 0x11a   : > { %1482 = vst [vmem:[%s2016_s13 + $0x28] sm:$0xff] %v1411_v44   ;;  %v631_v62 = vpop.f32.mrb[9].mxu1  ;;  %1487 = vst [vmem:[%s2016_s13 + $0x50] sm:$0xff] %v1436_v56   ;;  %v2146_v19 = vsel %vm755_vm7, %v1559_v61, 0.0  ;;  %vm759_vm12 = vcmp.lt.s32.totalorder %v727_v28, 316  ;;  %vm757_vm13 = vcmp.lt.s32.totalorder %v725_v45, 316  ;;  %v1070_v42 = vmul.f32 %v2066_v2, %v2066_v2 }
 0x11b   : > { %1481 = vst [vmem:[%s2016_s13 + $0x20] sm:$0xff] %v1406_v48   ;;  %v1026_v17 = vadd.f32 %v1025_v51, %v835_v39  ;;  %v1094_v59 = vadd.f32 %v1093_v47, %v1063_v54  ;;  %v1560_v13 = vpop.f32.mrb[10].mxu1  ;;  %v849_v27 = vsel %vm753_vm9, %v631_v62, 0.0  ;;  %vm760_vm14 = vcmp.lt.s32.totalorder %v728_v1, 316 }
 0x11c   : > { %v1547_v43 = vpop.f32.mrb[12].mxu0  ;;  %v2150_v20 = vsel %vm756_vm10, %v1560_v13, 0.0  ;;  %v634_v22 = vpop.f32.mrb[11].mxu1  ;;  %vm758_vm15 = vcmp.lt.s32.totalorder %v726_v15, 316  ;;  %v1072_v56 = vmul.f32 %v2054_v52, %v2054_v52  ;;  %v1074_v45 = vmul.f32 %v2118_v46, %v2118_v46 }
 0x11d   : > { %v1095_v7 = vadd.f32 %v1094_v59, %v1064_v4  ;;  %v583_v8 = vpop.f32.mrb[13].mxu0  ;;  %v1027_v49 = vadd.f32 %v1026_v17, %v836_v60  ;;  %v839_v18 = vsel %vm743_vm4, %v1547_v43, 0.0  ;;  %v1451_v10 = vpack.c.bf16 %v2150_v20, %v2146_v19 }
 0x11e   : > { %v837_v57 = vsel %vm741_vm5, %v583_v8, 0.0  ;;  %v1548_v16 = vpop.f32.mrb[14].mxu0  ;;  %v850_v33 = vsel %vm754_vm11, %v634_v22, 0.0  ;;  %v1068_v11 = vmul.f32 %v839_v18, %v839_v18  ;;  %v1071_v17 = vmul.f32 %v2076_v50, %v2076_v50 }
 0x11f   : > { %v1028_v24 = vadd.f32 %v1027_v49, %v837_v57  ;;  %v1066_v25 = vmul.f32 %v837_v57, %v837_v57  ;;  %v1096_v32 = vadd.f32 %v1095_v7, %v1065_v6  ;;  %v840_v5 = vsel %vm744_vm6, %v1548_v16, 0.0  ;;  %v586_v9 = vpop.f32.mrb[15].mxu0  ;;  %1490 = vst [vmem:[%s2016_s13 + $0x68] sm:$0xff] %v1451_v10  }
 0x120   : > { %v1421_v26 = vpack.c.bf16 %v840_v5, %v839_v18  ;;  %v838_v3 = vsel %vm742_vm8, %v586_v9, 0.0  ;;  %v1446_v34 = vpack.c.bf16 %v850_v33, %v849_v27  ;;  %v1069_v40 = vmul.f32 %v840_v5, %v840_v5 }
 0x121   : > { %v1097_v14 = vadd.f32 %v1096_v32, %v1066_v25  ;;  %v1416_v29 = vpack.c.bf16 %v838_v3, %v837_v57  ;;  %v1029_v30 = vadd.f32 %v1028_v24, %v838_v3  ;;  %v1067_v31 = vmul.f32 %v838_v3, %v838_v3  ;;  %v1563_v35 = vpop.f32.mrb[12].mxu1 }
 0x122   : > { %1484 = vst [vmem:[%s2016_s13 + $0x38] sm:$0xff] %v1421_v26   ;;  %v855_v37 = vsel %vm759_vm12, %v1563_v35, 0.0  ;;  %v647_v38 = vpop.f32.mrb[13].mxu1  ;;  %1489 = vst [vmem:[%s2016_s13 + $0x60] sm:$0xff] %v1446_v34   ;;  %v1076_v8 = vmul.f32 %v2106_v58, %v2106_v58  ;;  %v1079_v25 = vmul.f32 %v850_v33, %v850_v33  ;;  %vm1123_vm0 = vcmask 1040384  }
 0x123   : > { %1483 = vst [vmem:[%s2016_s13 + $0x30] sm:$0xff] %v1416_v29   ;;  %v1030_v12 = vadd.f32 %v1029_v30, %v839_v18  ;;  %v1098_v39 = vadd.f32 %v1097_v14, %v1067_v31  ;;  %v1564_v63 = vpop.f32.mrb[14].mxu1  ;;  %v853_v44 = vsel %vm757_vm13, %v647_v38, 0.0  ;;  %v1084_v31 = vmul.f32 %v855_v37, %v855_v37 }
 0x124   : > { %v856_v21 = vsel %vm760_vm14, %v1564_v63, 0.0  ;;  %v650_v23 = vpop.f32.mrb[15].mxu1 }
 0x125   : > { %v1099_v41 = vadd.f32 %v1098_v39, %v1068_v11  ;;  %v1031_v60 = vadd.f32 %v1030_v12, %v840_v5  ;;  %v1461_v51 = vpack.c.bf16 %v856_v21, %v855_v37  ;;  %v854_v54 = vsel %vm758_vm15, %v650_v23, 0.0 }
 0x126   : > { %v1456_v59 = vpack.c.bf16 %v854_v54, %v853_v44  ;;  %v1083_v30 = vmul.f32 %v854_v54, %v854_v54  ;;  %v1085_v11 = vmul.f32 %v856_v21, %v856_v21 }
 0x127   : > { %v1032_v47 = vadd.f32 %v1031_v60, %v2066_v2  ;;  %v1100_v48 = vadd.f32 %v1099_v41, %v1069_v40  ;;  %1492 = vst [vmem:[%s2016_s13 + $0x78] sm:$0xff] %v1461_v51   ;;  %v1073_v2 = vmul.f32 %v2057_v53, %v2057_v53 }
 0x128   : > { %1491 = vst [vmem:[%s2016_s13 + $0x70] sm:$0xff] %v1456_v59  }
 0x129   : > { %v1101_v0 = vadd.f32 %v1100_v48, %v1070_v42  ;;  %v1033_v4 = vadd.f32 %v1032_v47, %v2076_v50 }
 0x12b   : > { %v1034_v61 = vadd.f32 %v1033_v4, %v2054_v52  ;;  %v1102_v43 = vadd.f32 %v1101_v0, %v1071_v17  ;;  %v1075_v52 = vmul.f32 %v2126_v55, %v2126_v55 }
 0x12d   : > { %v1103_v62 = vadd.f32 %v1102_v43, %v1072_v56  ;;  %v1035_v28 = vadd.f32 %v1034_v61, %v2057_v53  ;;  %v1077_v53 = vmul.f32 %v2110_v36, %v2110_v36 }
 0x12f   : > { %v1036_v50 = vadd.f32 %v1035_v28, %v2118_v46  ;;  %v1104_v1 = vadd.f32 %v1103_v62, %v1073_v2  ;;  %v1078_v46 = vmul.f32 %v849_v27, %v849_v27 }
 0x131   : > { %v1105_v6 = vadd.f32 %v1104_v1, %v1074_v45  ;;  %v1037_v7 = vadd.f32 %v1036_v50, %v2126_v55  ;;  %v1080_v55 = vmul.f32 %v2146_v19, %v2146_v19 }
 0x133   : > { %v1038_v49 = vadd.f32 %v1037_v7, %v2106_v58  ;;  %v1106_v13 = vadd.f32 %v1105_v6, %v1075_v52  ;;  %v1081_v58 = vmul.f32 %v2150_v20, %v2150_v20 }
 0x135   : > { %v1107_v15 = vadd.f32 %v1106_v13, %v1076_v8  ;;  %v1039_v18 = vadd.f32 %v1038_v49, %v2110_v36  ;;  %v1082_v36 = vmul.f32 %v853_v44, %v853_v44 }
 0x137   : > { %v1040_v57 = vadd.f32 %v1039_v18, %v849_v27  ;;  %v1108_v16 = vadd.f32 %v1107_v15, %v1077_v53 }
 0x139   : > { %v1109_v22 = vadd.f32 %v1108_v16, %v1078_v46  ;;  %v1041_v24 = vadd.f32 %v1040_v57, %v850_v33 }
 0x13b   : > { %v1042_v32 = vadd.f32 %v1041_v24, %v2146_v19  ;;  %v1110_v5 = vadd.f32 %v1109_v22, %v1079_v25 }
 0x13d   : > { %v1111_v9 = vadd.f32 %v1110_v5, %v1080_v55  ;;  %v1043_v26 = vadd.f32 %v1042_v32, %v2150_v20 }
 0x13f   : > { %v1044_v3 = vadd.f32 %v1043_v26, %v853_v44  ;;  %v1112_v27 = vadd.f32 %v1111_v9, %v1081_v58 }
 0x141   : > { %v1113_v14 = vadd.f32 %v1112_v27, %v1082_v36  ;;  %v1045_v29 = vadd.f32 %v1044_v3, %v854_v54 }
 0x143   : > { %v1046_v10 = vadd.f32 %v1045_v29, %v855_v37  ;;  %v1114_v33 = vadd.f32 %v1113_v14, %v1083_v30 }
 0x145   : > { %v1047_v12 = vadd.f32 %v1046_v10, %v856_v21  ;;  %v1115_v19 = vadd.f32 %v1114_v33, %v1084_v31 }
 0x147   : > { %v1048_v39 = vrot.slane %v1047_v12, 4  ;;  %v1116_v34 = vadd.f32 %v1115_v19, %v1085_v11 }
 0x149   : > { %v1049_v35 = vadd.f32 %v1048_v39, %v1047_v12  ;;  %v1117_v38 = vrot.slane %v1116_v34, 4 }
 0x14b   : > { %v1050_v40 = vrot.slane %v1049_v35, 2  ;;  %v1118_v20 = vadd.f32 %v1117_v38, %v1116_v34 }
 0x14d   : > { %v1051_v41 = vadd.f32 %v1050_v40, %v1049_v35  ;;  %v1119_v60 = vrot.slane %v1118_v20, 2 }
 0x14f   : > { %v1052_v42 = vrot.slane %v1051_v41, 1  ;;  %v1120_v63 = vadd.f32 %v1119_v60, %v1118_v20 }
 0x151   : > { %v1121_v44 = vrot.slane %v1120_v63, 1  ;;  %v1053_v37 = vadd.f32 %v1052_v42, %v1051_v41 }
 0x153   : > { %v1122_v21 = vadd.f32 %v1121_v44, %v1120_v63 }
 0x155   : > { %v1124_v23 = vsel %vm1123_vm0, %v1053_v37, %v1122_v21 }
 0x156   : > { %1125 = vst [vmem:[%s253_s15] sm:$0x3] %v1124_v23 }
 0x157   : > { %1643 = shalt.err (!%p1640_p3)
}
 0x158   : > { %s1644_s26 = scalar_lea.hbm %s2206_s19, 32  ;;  %s1648_s13 = scalar_lea.hbm %s2254_s6, 64 }
 0x159   : > { %p1645_p4 = scmp.ne.s32.totalorder %s2206_s19, %s1644_s26  ;;  %p1649_p9 = scmp.lt.u32.totalorder %s2206_s19, %s2254_s6 }
 0x15a   : > { %p1650_p10 = scmp.lt.u32.totalorder %s1648_s13, %s1644_s26  ;;  %p1652_p12 = scmp.lt.u32.totalorder %s1644_s26, %s2206_s19 }
 0x15b   : > { %p1646_p7 = pnand %p1645_p4, %p1768_p5 }
 0x15c   : > { %p1651_p11 = por %p1650_p10, %p1649_p9 }
 0x15d   : > { %p1647_p8 = pneg %p1646_p7 }
 0x15e   : > { %p1653_p13 = por %p1652_p12, %p1651_p11 }
 0x160   : > { %p1654_p0 = pnand %p1653_p13, %p1647_p8 }
 0x162   : > { %1657 = shalt.err (!%p1654_p0)
}
 0x163   : > { %1581 = dma.vmem_to_hbm [thread:$0]  (%p1768_p5), %s2208_s16, 32, %s2206_s19, %s1132_s20  }
 0x164 PF: > { %p1587_p1 = scmp.ge.s32.totalorder %s1692_s24, 2  ;;  %s1169_s15 = sand.u32 1, %s1680_s21  }
 0x165   : > { %s1170_s17 = scalar_lea.sflag [#allocation3], %s1169_s15 }
 0x166   : > { %p1584_p2 = pnand %p1587_p1, %p1772_p6 }
 0x168   : > { %1675 = dma.done.wait (!%p1584_p2), %s1170_s17, 32  }
 0x169   : > { %1677 = vsyncadd (!%p1584_p2), %s1170_s17, 4294967264  ;;  %p17_p3 = scmp.ge.s32.totalorder %s1755_s27, 4   ;;  %s2257_s21 = smov %s1684_s22 }
 0x16a   : > { %s2258_s22 = smov %s1688_s23  ;;  %s2259_s23 = smov %s1766_s30 }
 0x16b   : > { %s2260_s24 = smov %s1755_s27  ;;  %19 = sbr.rel (!%p17_p3) target bundleno = 3 (0x3), region = 87 }
 0x172   :  { %1175 = vsyncpa [#allocation3], 1 }
 0x173   :  { %1177 = vsyncpa [#allocation3 + $0x1], 1 }

// kernel: resgcn_forward.12
= control target key start
LH: loop header
LB: loop body
LE: loop exit
PB: predicated region body
PF: predicated region fallthrough
CT: control target
= control target key end

     0   :  { %s2406_s0 = inlined_call_operand.vmem [shape: s32[2,1], index: 0, kind: input, shape index: {}]   ;;  %s2407_s3 = inlined_call_operand.vmem [shape: bf16[2,256,256], index: 3, kind: input, shape index: {}]   ;;  %s2408_s4 = inlined_call_operand.vmem [shape: bf16[512,128], index: 4, kind: input, shape index: {}]   ;;  %s2409_s5 = inlined_call_operand.vmem [shape: f32[1,128], index: 5, kind: input, shape index: {}]   ;;  %s2410_s6 = inlined_call_operand.vmem [shape: bf16[512,128], index: 6, kind: output, shape index: {0}]   ;;  %s2411_s7 = inlined_call_operand.vmem [shape: f32[2,2,128], index: 7, kind: output, shape index: {1}]   ;;  %s2412_s1 = inlined_call_operand.vmem [shape: s32[2,1], index: 1, kind: input, shape index: {}]   ;;  %s2413_s2 = inlined_call_operand.vmem [shape: s32[2], index: 2, kind: input, shape index: {}]  }
   0x1   :  { %s13_s26 = sshll.u32 %s2406_s0, 4  ;;  %s17_s29 = sshll.u32 %s2412_s1, 4  ;;  %s14_s26 = int_to_ptr.vmem [resolvable:$true] %s13_s26  ;;  %s18_s29 = int_to_ptr.vmem [resolvable:$true] %s17_s29 }
   0x2   :  { %s2045_s30 = scalar_lea.vmem %s14_s26, 32  ;;  %p2050_p1 = scmp.lt.s32.totalorder %s14_s26, %s14_s26 }
   0x3   :  { %p2046_p0 = scmp.ne.s32.totalorder %s14_s26, %s2045_s30  ;;  %p2051_p2 = scmp.lt.s32.totalorder %s2045_s30, %s2045_s30 }
   0x5   :  { %p2052_p3 = por %p2051_p2, %p2050_p1 }
   0x7   :  { %p2053_p4 = pnand %p2052_p3, %p2046_p0 }
   0x9   :  { %2056 = shalt.err (!%p2053_p4)  }
   0xa   :  { %s2107_s8 = smov [#allocation4]   ;;  %s2057_s9 = scalar_lea.vmem %s18_s29, 32 }
   0xb   :  { %16 = dma.vmem_to_smem %s14_s26, 32, %s2107_s8, [#allocation3] }
   0xc   :  { %p2058_p5 = scmp.ne.s32.totalorder %s18_s29, %s2057_s9  ;;  %p2062_p6 = scmp.lt.s32.totalorder %s18_s29, %s18_s29 }
   0xd   :  { %p2063_p7 = scmp.lt.s32.totalorder %s2057_s9, %s2057_s9 }
   0xf   :  { %p2064_p8 = por %p2063_p7, %p2062_p6 }
  0x11   :  { %p2065_p9 = pnand %p2064_p8, %p2058_p5 }
  0x13   :  { %2068 = shalt.err (!%p2065_p9)  }
  0x14   :  { %s2108_s0 = smov [#allocation5]   ;;  %s21_s11 = sshll.u32 %s2413_s2, 4  ;;  %s22_s11 = int_to_ptr.vmem [resolvable:$true] %s21_s11 }
  0x15   :  { %20 = dma.vmem_to_smem %s18_s29, 32, %s2108_s0, [#allocation3] }
  0x16   :  { %s2069_s12 = scalar_lea.vmem %s22_s11, 16  ;;  %p2074_p11 = scmp.lt.s32.totalorder %s22_s11, %s22_s11 }
  0x17   :  { %p2070_p10 = scmp.ne.s32.totalorder %s22_s11, %s2069_s12  ;;  %p2075_p12 = scmp.lt.s32.totalorder %s2069_s12, %s2069_s12 }
  0x19   :  { %p2076_p13 = por %p2075_p12, %p2074_p11 }
  0x1b   :  { %p2077_p0 = pnand %p2076_p13, %p2070_p10 }
  0x1d   :  { %2080 = shalt.err (!%p2077_p0)  }
  0x1e   :  { %s2109_s13 = smov [#allocation6]  }
  0x1f   :  { %24 = dma.vmem_to_smem %s22_s11, 16, %s2109_s13, [#allocation3] }
  0x20   :  { %2093 = dma.done.wait [#allocation3], 80 }
  0x21   :  { %2094 = vsyncadd [#allocation3], 4294967216 }
  0x22   :  { %26 = sfence }
  0x23   :  { %s2160_s14 = smov 0   ;;  %s2162_s15 = smov 0  }
  0x24   :  { %s2164_s16 = smov 0  }
  0x25 LB: > { %s44_s2 = sadd.s32 1, %s2101_s15  ;;  %p1601_p1 = scmp.ge.s32.totalorder %s2105_s16, 1  ;;  %s2105_s16 = sphi %s2164_s16, %s32_s16   ;;  %s2101_s15 = sphi %s2162_s15, %s2416_s15   ;;  %s2097_s14 = sphi %s2160_s14, %s2415_s14  }
  0x26   : > { %p46_p2 = scmp.ge.s32.totalorder %s44_s2, 2  ;;  %p226_p3 = scmp.lt.s32.totalorder %s2105_s16, 3 }
  0x28   : > { %s2418_s2 = smov (%p46_p2, %s44_s2), 0  ;;  %p227_p4 = pnand %p1601_p1, %p226_p3 }
  0x29   : > { %s1602_s17 = sshll.u32 (!%p227_p4), %s2097_s14, 7  ;;  %s1605_s18 = sshll.u32 (!%p227_p4), %s2097_s14, 5  ;;  %v2110_v0 = vmov (!%p227_p4), 0.0  }
  0x2a   : > { %230 = sbr.rel (%p227_p4) target bundleno = 470 (0x1d6), region = 32  ;;  %s2184_s19 = sld [smem:[#allocation4 + %s1602_s17]] (!%p227_p4)  ;;  %300 = vst [vmem:[#allocation2] sm:$0xff] (!%p227_p4), %v2110_v0  ;;  %301 = vst [vmem:[#allocation2 + $0x8] sm:$0xff] (!%p227_p4), %v2110_v0 }
  0x2b   : > { %p2188_p5 = scmp.lt.s32.totalorder (!%p227_p4), %s1605_s18, 63  ;;  %302 = vst [vmem:[#allocation2 + $0x10] sm:$0xff] (!%p227_p4), %v2110_v0  ;;  %303 = vst [vmem:[#allocation2 + $0x18] sm:$0xff] (!%p227_p4), %v2110_v0  ;;  %p291_p6 = scmp.lt.s32.totalorder (!%p227_p4), %s2097_s14, 1 }
  0x2c   : > { %304 = vst [vmem:[#allocation2 + $0x20] sm:$0xff] (!%p227_p4), %v2110_v0  ;;  %305 = vst [vmem:[#allocation2 + $0x28] sm:$0xff] (!%p227_p4), %v2110_v0  ;;  %s332_s21 = sld [smem:[#allocation6 + %s2097_s14]] (!%p227_p4) }
  0x2d   : > { %306 = vst [vmem:[#allocation2 + $0x30] sm:$0xff] (!%p227_p4), %v2110_v0  ;;  %307 = vst [vmem:[#allocation2 + $0x38] sm:$0xff] (!%p227_p4), %v2110_v0 }
  0x2e   : > { %308 = vst [vmem:[#allocation2 + $0x40] sm:$0xff] (!%p227_p4), %v2110_v0  ;;  %309 = vst [vmem:[#allocation2 + $0x48] sm:$0xff] (!%p227_p4), %v2110_v0 }
  0x2f   : > { %310 = vst [vmem:[#allocation2 + $0x50] sm:$0xff] (!%p227_p4), %v2110_v0  ;;  %311 = vst [vmem:[#allocation2 + $0x58] sm:$0xff] (!%p227_p4), %v2110_v0 }
  0x30   : > { %312 = vst [vmem:[#allocation2 + $0x60] sm:$0xff] (!%p227_p4), %v2110_v0  ;;  %313 = vst [vmem:[#allocation2 + $0x68] sm:$0xff] (!%p227_p4), %v2110_v0  ;;  %p272_p7 = scmp.lt.s32.totalorder (!%p227_p4), %s2184_s19, 1 }
  0x31   : > { %314 = vst [vmem:[#allocation2 + $0x70] sm:$0xff] %v2110_v0  ;;  %315 = vst [vmem:[#allocation2 + $0x78] sm:$0xff] %v2110_v0  ;;  %s2420_s18 = smov (!%p2188_p5, %s1605_s18), 63 }
  0x32   : > { %316 = vst [vmem:[#allocation2 + $0x80] sm:$0xff] %v2110_v0  ;;  %317 = vst [vmem:[#allocation2 + $0x88] sm:$0xff] %v2110_v0  ;;  %s292_s22 = scalar_select %p291_p6, %s2097_s14, 1 }
  0x33   : > { %318 = vst [vmem:[#allocation2 + $0x90] sm:$0xff] %v2110_v0  ;;  %319 = vst [vmem:[#allocation2 + $0x98] sm:$0xff] %v2110_v0  ;;  %s1606_s23 = sshll.u32 %s2420_s18, 2  ;;  %s2422_s19 = smov (!%p272_p7, %s2184_s19), 1 }
  0x34   : > { %320 = vst [vmem:[#allocation2 + $0xa0] sm:$0xff] %v2110_v0  ;;  %321 = vst [vmem:[#allocation2 + $0xa8] sm:$0xff] %v2110_v0  ;;  %s2202_s26 = scalar_lea.vmem %s2410_s6, %s1606_s23  ;;  %s1607_s27 = sshll.u32 %s292_s22, 1 }
  0x35   : > { %322 = vst [vmem:[#allocation2 + $0xb0] sm:$0xff] %v2110_v0  ;;  %323 = vst [vmem:[#allocation2 + $0xb8] sm:$0xff] %v2110_v0  ;;  %s2208_s30 = scalar_lea.vmem %s2411_s7, %s1607_s27  ;;  %s1697_s8 = sshll.u32 %s2422_s19, 8 }
  0x36   : > { %324 = vst [vmem:[#allocation2 + $0xc0] sm:$0xff] %v2110_v0  ;;  %325 = vst [vmem:[#allocation2 + $0xc8] sm:$0xff] %v2110_v0  ;;  %s2214_s1 = scalar_lea.vmem %s2407_s3, %s1697_s8  ;;  %p1609_p8 = scmp.le.s32.totalorder %s332_s21, 0 }
  0x37   : > { %326 = vst [vmem:[#allocation2 + $0xd0] sm:$0xff] %v2110_v0  ;;  %327 = vst [vmem:[#allocation2 + $0xd8] sm:$0xff] %v2110_v0  ;;  %s344_s10 = sld [smem:[#allocation5 + %s1602_s17]] (!%p1609_p8)  ;;  %v1999_v1 = vld [vmem:[%s2214_s1 + $0x4] ss:$8 sps:$4 sm:$0xff] (!%p1609_p8)  }
  0x38   : > { %328 = vst [vmem:[#allocation2 + $0xe0] sm:$0xff] %v2110_v0  ;;  %329 = vst [vmem:[#allocation2 + $0xe8] sm:$0xff] %v2110_v0  ;;  %336 = sbr.rel (%p1609_p8) target bundleno = 374 (0x176), region = 40  ;;  %v2002_v2 = vld [vmem:[%s2214_s1 + $0x84] ss:$8 sps:$4 sm:$0xff] (!%p1609_p8)   ;;  %734 = vmatprep.mubr.bf16.mxu0 (!%p1609_p8), %v1999_v1 }
  0x39   : > { %330 = vst [vmem:[#allocation2 + $0xf0] sm:$0xff] %v2110_v0  ;;  %331 = vst [vmem:[#allocation2 + $0xf8] sm:$0xff] %v2110_v0  ;;  %798 = vmatprep.mubr.bf16.mxu1 (!%p1609_p8), %v2002_v2  ;;  %v1997_v19 = vld [vmem:[%s2214_s1] ss:$8 sps:$4 sm:$0xff] (!%p1609_p8)   ;;  %v2003_v21 = vld [vmem:[%s2214_s1 + $0x14] ss:$8 sps:$4 sm:$0xff] (!%p1609_p8)  }
  0x3a   : > { %v2000_v20 = vld [vmem:[%s2214_s1 + $0x80] ss:$8 sps:$4 sm:$0xff] (!%p1609_p8)   ;;  %v2005_v22 = vld [vmem:[%s2214_s1 + $0x94] ss:$8 sps:$4 sm:$0xff] (!%p1609_p8)   ;;  %v2007_v23 = vld [vmem:[%s2214_s1 + $0x10] ss:$8 sps:$4 sm:$0xff] (!%p1609_p8)  }
  0x3b   : > { %v2008_v24 = vld [vmem:[%s2214_s1 + $0x90] ss:$8 sps:$4 sm:$0xff] (!%p1609_p8)   ;;  %v2009_v25 = vld [vmem:[%s2214_s1 + $0x24] ss:$8 sps:$4 sm:$0xff] (!%p1609_p8)   ;;  %v2013_v27 = vld [vmem:[%s2214_s1 + $0x20] ss:$8 sps:$4 sm:$0xff] (!%p1609_p8)  }
  0x3c   : > { %v2011_v26 = vld [vmem:[%s2214_s1 + $0xa4] ss:$8 sps:$4 sm:$0xff] (!%p1609_p8)   ;;  %v2014_v28 = vld [vmem:[%s2214_s1 + $0xa0] ss:$8 sps:$4 sm:$0xff] (!%p1609_p8)   ;;  %v2015_v29 = vld [vmem:[%s2214_s1 + $0x34] ss:$8 sps:$4 sm:$0xff] (!%p1609_p8)  }
  0x3d   : > { %s1611_s11 = sshll.u32 (!%p1609_p8), %s344_s10, 8  ;;  %v2017_v30 = vld [vmem:[%s2214_s1 + $0xb4] ss:$8 sps:$4 sm:$0xff] (!%p1609_p8)   ;;  %v2019_v31 = vld [vmem:[%s2214_s1 + $0x30] ss:$8 sps:$4 sm:$0xff] (!%p1609_p8)   ;;  %v346_v51 = vld [vmem:[#allocation2] sm:$0xff] (!%p1609_p8) }
  0x3e   : > { %s410_s12 = sshra.s32 (!%p1609_p8), %s1611_s11, 3  ;;  %v2020_v32 = vld [vmem:[%s2214_s1 + $0xb0] ss:$8 sps:$4 sm:$0xff] (!%p1609_p8)   ;;  %v2021_v33 = vld [vmem:[%s2214_s1 + $0x44] ss:$8 sps:$4 sm:$0xff] (!%p1609_p8)  }
  0x3f   : > { %s1612_s13 = sshll.u32 %s410_s12, 2  ;;  %v2023_v34 = vld [vmem:[%s2214_s1 + $0xc4] ss:$8 sps:$4 sm:$0xff]   ;;  %v2025_v35 = vld [vmem:[%s2214_s1 + $0x40] ss:$8 sps:$4 sm:$0xff]  }
  0x40   : > { %s2223_s20 = scalar_lea.vmem %s2408_s4, %s1612_s13  ;;  %v2026_v36 = vld [vmem:[%s2214_s1 + $0xc0] ss:$8 sps:$4 sm:$0xff]   ;;  %v2027_v37 = vld [vmem:[%s2214_s1 + $0x54] ss:$8 sps:$4 sm:$0xff]   ;;  %v2031_v39 = vld [vmem:[%s2214_s1 + $0x50] ss:$8 sps:$4 sm:$0xff]  }
  0x41   : > { %v1981_v3 = vld [vmem:[%s2223_s20 + $0x40] sm:$0xff]   ;;  %v1983_v5 = vld [vmem:[%s2223_s20 + $0x48] sm:$0xff]   ;;  %v1985_v7 = vld [vmem:[%s2223_s20 + $0x50] sm:$0xff]  }
  0x42   : > { %v1982_v4 = vld [vmem:[%s2223_s20] sm:$0xff]   ;;  %1825 = vmatprep.subr.bf16.mxu0 %v1981_v3  ;;  %1937 = vmatprep.subr.bf16.mxu1 %v1981_v3  ;;  %v1984_v6 = vld [vmem:[%s2223_s20 + $0x8] sm:$0xff]   ;;  %v1986_v8 = vld [vmem:[%s2223_s20 + $0x10] sm:$0xff]  }
  0x43   : > { %1826 = vmatpush3.bf16.msra.mxu0 %v1982_v4  ;;  %1945 = vmatpush3.bf16.msra.mxu1 %v1982_v4  ;;  %v1987_v9 = vld [vmem:[%s2223_s20 + $0x58] sm:$0xff]   ;;  %v1989_v11 = vld [vmem:[%s2223_s20 + $0x60] sm:$0xff]   ;;  %v1991_v13 = vld [vmem:[%s2223_s20 + $0x68] sm:$0xff]  }
  0x44   : > { %1827 = vmatprep.subr.bf16.mxu0 %v1983_v5  ;;  %1938 = vmatprep.subr.bf16.mxu1 %v1983_v5  ;;  %v1988_v10 = vld [vmem:[%s2223_s20 + $0x18] sm:$0xff]   ;;  %v1990_v12 = vld [vmem:[%s2223_s20 + $0x20] sm:$0xff]   ;;  %v1992_v14 = vld [vmem:[%s2223_s20 + $0x28] sm:$0xff]  }
  0x45   : > { %v1993_v15 = vld [vmem:[%s2223_s20 + $0x70] sm:$0xff]   ;;  %v1995_v17 = vld [vmem:[%s2223_s20 + $0x78] sm:$0xff]   ;;  %v2033_v41 = vld [vmem:[%s2214_s1 + $0x64] ss:$8 sps:$4 sm:$0xff]  }
  0x46   : > { %v1994_v16 = vld [vmem:[%s2223_s20 + $0x30] sm:$0xff]   ;;  %v1996_v18 = vld [vmem:[%s2223_s20 + $0x38] sm:$0xff]   ;;  %v2035_v42 = vld [vmem:[%s2214_s1 + $0xe4] ss:$8 sps:$4 sm:$0xff]  }
  0x47   : > { %1828 = vmatpush3.bf16.msra.mxu0 %v1984_v6  ;;  %1946 = vmatpush3.bf16.msra.mxu1 %v1984_v6  ;;  %v2029_v38 = vld [vmem:[%s2214_s1 + $0xd4] ss:$8 sps:$4 sm:$0xff]   ;;  %v2032_v40 = vld [vmem:[%s2214_s1 + $0xd0] ss:$8 sps:$4 sm:$0xff]   ;;  %v2037_v43 = vld [vmem:[%s2214_s1 + $0x60] ss:$8 sps:$4 sm:$0xff]  }
  0x48   : > { %1829 = vmatprep.subr.bf16.mxu0 %v1985_v7  ;;  %1939 = vmatprep.subr.bf16.mxu1 %v1985_v7  ;;  %v2038_v44 = vld [vmem:[%s2214_s1 + $0xe0] ss:$8 sps:$4 sm:$0xff]   ;;  %v2039_v45 = vld [vmem:[%s2214_s1 + $0x74] ss:$8 sps:$4 sm:$0xff]   ;;  %v2043_v47 = vld [vmem:[%s2214_s1 + $0x70] ss:$8 sps:$4 sm:$0xff]  }
  0x49   : > { %v2041_v46 = vld [vmem:[%s2214_s1 + $0xf4] ss:$8 sps:$4 sm:$0xff]   ;;  %v2044_v48 = vld [vmem:[%s2214_s1 + $0xf0] ss:$8 sps:$4 sm:$0xff]   ;;  %v362_v53 = vld [vmem:[#allocation2 + $0x80] sm:$0xff] }
  0x4a   : > { %v347_v59 = vld [vmem:[#allocation2 + $0x8] sm:$0xff]  ;;  %v348_v7 = vld [vmem:[#allocation2 + $0x10] sm:$0xff] }
  0x4b   : > { %1830 = vmatpush3.bf16.msra.mxu0 %v1986_v8  ;;  %1947 = vmatpush3.bf16.msra.mxu1 %v1986_v8  ;;  %v363_v61 = vld [vmem:[#allocation2 + $0x88] sm:$0xff] }
  0x4c   : > { %1831 = vmatprep.subr.bf16.mxu0 %v1987_v9  ;;  %1940 = vmatprep.subr.bf16.mxu1 %v1987_v9  ;;  %v364_v9 = vld [vmem:[#allocation2 + $0x90] sm:$0xff] }
  0x4f   : > { %1832 = vmatpush3.bf16.msra.mxu0 %v1988_v10  ;;  %1948 = vmatpush3.bf16.msra.mxu1 %v1988_v10 }
  0x50   : > { %1833 = vmatprep.subr.bf16.mxu0 %v1989_v11  ;;  %1941 = vmatprep.subr.bf16.mxu1 %v1989_v11 }
  0x53   : > { %1834 = vmatpush3.bf16.msra.mxu0 %v1990_v12  ;;  %1949 = vmatpush3.bf16.msra.mxu1 %v1990_v12 }
  0x54   : > { %1835 = vmatprep.subr.bf16.mxu0 %v1991_v13  ;;  %1942 = vmatprep.subr.bf16.mxu1 %v1991_v13 }
  0x57   : > { %1836 = vmatpush3.bf16.msra.mxu0 %v1992_v14  ;;  %1950 = vmatpush3.bf16.msra.mxu1 %v1992_v14 }
  0x58   : > { %1837 = vmatprep.subr.bf16.mxu0 %v1993_v15  ;;  %1943 = vmatprep.subr.bf16.mxu1 %v1993_v15  ;;  %v349_v15 = vld [vmem:[#allocation2 + $0x18] sm:$0xff] }
  0x5b   : > { %1838 = vmatpush3.bf16.msra.mxu0 %v1994_v16  ;;  %1951 = vmatpush3.bf16.msra.mxu1 %v1994_v16 }
  0x5c   : > { %1839 = vmatprep.subr.bf16.mxu0 %v1995_v17  ;;  %1944 = vmatprep.subr.bf16.mxu1 %v1995_v17  ;;  %v365_v17 = vld [vmem:[#allocation2 + $0x98] sm:$0xff] }
  0x5f   : > { %1840 = vmatpush3.bf16.msra.mxu0 %v1996_v18  ;;  %1952 = vmatpush3.bf16.msra.mxu1 %v1996_v18 }
  0x62   : > { %735 = vmatmul.mubr.bf16.vlgmr.msra.gmra.mrb[0].mxu0 %v1997_v19  ;;  %799 = vmatmul.mubr.bf16.vlgmr.msra.gmra.mrb[0].mxu1 %v2000_v20 }
  0x63   : > { %742 = vmatprep.mubr.bf16.mxu0 %v2003_v21  ;;  %806 = vmatprep.mubr.bf16.mxu1 %v2005_v22 }
  0x6a   : > { %743 = vmatmul.mubr.bf16.gmra.mrb[4].mxu0 %v2007_v23  ;;  %807 = vmatmul.mubr.bf16.gmra.mrb[4].mxu1 %v2008_v24 }
  0x6b   : > { %750 = vmatprep.mubr.bf16.mxu0 %v2009_v25  ;;  %814 = vmatprep.mubr.bf16.mxu1 %v2011_v26 }
  0x72   : > { %751 = vmatmul.mubr.bf16.gmra.mrb[8].mxu0 %v2013_v27  ;;  %815 = vmatmul.mubr.bf16.gmra.mrb[8].mxu1 %v2014_v28  ;;  %v350_v27 = vld [vmem:[#allocation2 + $0x20] sm:$0xff] }
  0x73   : > { %758 = vmatprep.mubr.bf16.mxu0 %v2015_v29  ;;  %822 = vmatprep.mubr.bf16.mxu1 %v2017_v30  ;;  %v366_v29 = vld [vmem:[#allocation2 + $0xa0] sm:$0xff] }
  0x7a   : > { %759 = vmatmul.mubr.bf16.gmra.mrb[12].mxu0 %v2019_v31  ;;  %823 = vmatmul.mubr.bf16.gmra.mrb[12].mxu1 %v2020_v32 }
  0x7b   : > { %766 = vmatprep.mubr.bf16.mxu0 %v2021_v33  ;;  %830 = vmatprep.mubr.bf16.mxu1 %v2023_v34 }
  0x82   : > { %767 = vmatmul.mubr.bf16.gmra.mrb[16].mxu0 %v2025_v35  ;;  %831 = vmatmul.mubr.bf16.gmra.mrb[16].mxu1 %v2026_v36  ;;  %v351_v35 = vld [vmem:[#allocation2 + $0x28] sm:$0xff] }
  0x83   : > { %774 = vmatprep.mubr.bf16.mxu0 %v2027_v37  ;;  %838 = vmatprep.mubr.bf16.mxu1 %v2029_v38  ;;  %v367_v37 = vld [vmem:[#allocation2 + $0xa8] sm:$0xff] }
  0x8a   : > { %775 = vmatmul.mubr.bf16.gmra.mrb[20].mxu0 %v2031_v39  ;;  %839 = vmatmul.mubr.bf16.gmra.mrb[20].mxu1 %v2032_v40 }
  0x8b   : > { %782 = vmatprep.mubr.bf16.mxu0 %v2033_v41  ;;  %846 = vmatprep.mubr.bf16.mxu1 %v2035_v42 }
  0x92   : > { %783 = vmatmul.mubr.bf16.gmra.mrb[24].mxu0 %v2037_v43  ;;  %847 = vmatmul.mubr.bf16.gmra.mrb[24].mxu1 %v2038_v44 }
  0x93   : > { %790 = vmatprep.mubr.bf16.mxu0 %v2039_v45  ;;  %854 = vmatprep.mubr.bf16.mxu1 %v2041_v46 }
  0x9a   : > { %791 = vmatmul.mubr.bf16.gmra.mrb[28].mxu0 %v2043_v47  ;;  %855 = vmatmul.mubr.bf16.gmra.mrb[28].mxu1 %v2044_v48  ;;  %v352_v47 = vld [vmem:[#allocation2 + $0x30] sm:$0xff] }
 0x135   : > { %v1841_v49 = vpop.f32.mrb[0].mxu0  ;;  %v1889_v50 = vpop.f32.mrb[0].mxu1 }
 0x136   : > { %v1842_v52 = vpop.f32.mrb[1].mxu0  ;;  %v1890_v54 = vpop.f32.mrb[1].mxu1 }
 0x137   : > { %v1843_v55 = vadd.f32 %v1842_v52, %v1841_v49  ;;  %v1891_v56 = vadd.f32 %v1890_v54, %v1889_v50  ;;  %v1844_v57 = vpop.f32.mrb[2].mxu0  ;;  %v1892_v58 = vpop.f32.mrb[2].mxu1  ;;  %v368_v49 = vld [vmem:[#allocation2 + $0xb0] sm:$0xff] }
 0x138   : > { %v1845_v60 = vpop.f32.mrb[3].mxu0  ;;  %v1893_v62 = vpop.f32.mrb[3].mxu1 }
 0x139   : > { %v863_v63 = vadd.f32 %v1843_v55, %v346_v51  ;;  %v879_v0 = vadd.f32 %v1891_v56, %v362_v53  ;;  %v1846_v1 = vadd.f32 %v1845_v60, %v1844_v57  ;;  %v1894_v2 = vadd.f32 %v1893_v62, %v1892_v58  ;;  %v353_v55 = vld [vmem:[#allocation2 + $0x38] sm:$0xff] }
 0x13a   : > { %v369_v57 = vld [vmem:[#allocation2 + $0xb8] sm:$0xff] }
 0x13b   : > { %895 = vst [vmem:[#allocation2] sm:$0xff] %v863_v63  ;;  %911 = vst [vmem:[#allocation2 + $0x80] sm:$0xff] %v879_v0  ;;  %v864_v3 = vadd.f32 %v1846_v1, %v347_v59  ;;  %v880_v4 = vadd.f32 %v1894_v2, %v363_v61 }
 0x13d   : > { %896 = vst [vmem:[#allocation2 + $0x8] sm:$0xff] %v864_v3  ;;  %912 = vst [vmem:[#allocation2 + $0x88] sm:$0xff] %v880_v4  ;;  %v1847_v5 = vpop.f32.mrb[4].mxu0  ;;  %v1895_v6 = vpop.f32.mrb[4].mxu1  ;;  %v354_v3 = vld [vmem:[#allocation2 + $0x40] sm:$0xff] }
 0x13e   : > { %v1848_v8 = vpop.f32.mrb[5].mxu0  ;;  %v1896_v10 = vpop.f32.mrb[5].mxu1 }
 0x13f   : > { %v1849_v11 = vadd.f32 %v1848_v8, %v1847_v5  ;;  %v1897_v12 = vadd.f32 %v1896_v10, %v1895_v6  ;;  %v1850_v13 = vpop.f32.mrb[6].mxu0  ;;  %v1898_v14 = vpop.f32.mrb[6].mxu1  ;;  %v370_v5 = vld [vmem:[#allocation2 + $0xc0] sm:$0xff] }
 0x140   : > { %v1851_v16 = vpop.f32.mrb[7].mxu0  ;;  %v1899_v18 = vpop.f32.mrb[7].mxu1 }
 0x141   : > { %v865_v19 = vadd.f32 %v1849_v11, %v348_v7  ;;  %v881_v20 = vadd.f32 %v1897_v12, %v364_v9  ;;  %v1852_v21 = vadd.f32 %v1851_v16, %v1850_v13  ;;  %v1900_v22 = vadd.f32 %v1899_v18, %v1898_v14  ;;  %v355_v11 = vld [vmem:[#allocation2 + $0x48] sm:$0xff] }
 0x142   : > { %v371_v13 = vld [vmem:[#allocation2 + $0xc8] sm:$0xff] }
 0x143   : > { %897 = vst [vmem:[#allocation2 + $0x10] sm:$0xff] %v865_v19  ;;  %913 = vst [vmem:[#allocation2 + $0x90] sm:$0xff] %v881_v20  ;;  %v866_v23 = vadd.f32 %v1852_v21, %v349_v15  ;;  %v882_v24 = vadd.f32 %v1900_v22, %v365_v17 }
 0x145   : > { %898 = vst [vmem:[#allocation2 + $0x18] sm:$0xff] %v866_v23  ;;  %914 = vst [vmem:[#allocation2 + $0x98] sm:$0xff] %v882_v24  ;;  %v1853_v25 = vpop.f32.mrb[8].mxu0  ;;  %v1901_v26 = vpop.f32.mrb[8].mxu1  ;;  %v356_v23 = vld [vmem:[#allocation2 + $0x50] sm:$0xff] }
 0x146   : > { %v1854_v28 = vpop.f32.mrb[9].mxu0  ;;  %v1902_v30 = vpop.f32.mrb[9].mxu1 }
 0x147   : > { %v1855_v31 = vadd.f32 %v1854_v28, %v1853_v25  ;;  %v1903_v32 = vadd.f32 %v1902_v30, %v1901_v26  ;;  %v1856_v33 = vpop.f32.mrb[10].mxu0  ;;  %v1904_v34 = vpop.f32.mrb[10].mxu1  ;;  %v372_v25 = vld [vmem:[#allocation2 + $0xd0] sm:$0xff] }
 0x148   : > { %v1857_v36 = vpop.f32.mrb[11].mxu0  ;;  %v1905_v38 = vpop.f32.mrb[11].mxu1 }
 0x149   : > { %v867_v39 = vadd.f32 %v1855_v31, %v350_v27  ;;  %v883_v40 = vadd.f32 %v1903_v32, %v366_v29  ;;  %v1858_v41 = vadd.f32 %v1857_v36, %v1856_v33  ;;  %v1906_v42 = vadd.f32 %v1905_v38, %v1904_v34  ;;  %v357_v31 = vld [vmem:[#allocation2 + $0x58] sm:$0xff] }
 0x14a   : > { %v373_v33 = vld [vmem:[#allocation2 + $0xd8] sm:$0xff] }
 0x14b   : > { %899 = vst [vmem:[#allocation2 + $0x20] sm:$0xff] %v867_v39  ;;  %915 = vst [vmem:[#allocation2 + $0xa0] sm:$0xff] %v883_v40  ;;  %v868_v43 = vadd.f32 %v1858_v41, %v351_v35  ;;  %v884_v44 = vadd.f32 %v1906_v42, %v367_v37 }
 0x14d   : > { %900 = vst [vmem:[#allocation2 + $0x28] sm:$0xff] %v868_v43  ;;  %916 = vst [vmem:[#allocation2 + $0xa8] sm:$0xff] %v884_v44  ;;  %v1859_v45 = vpop.f32.mrb[12].mxu0  ;;  %v1907_v46 = vpop.f32.mrb[12].mxu1  ;;  %v358_v43 = vld [vmem:[#allocation2 + $0x60] sm:$0xff] }
 0x14e   : > { %v1860_v48 = vpop.f32.mrb[13].mxu0  ;;  %v1908_v50 = vpop.f32.mrb[13].mxu1 }
 0x14f   : > { %v1861_v51 = vadd.f32 %v1860_v48, %v1859_v45  ;;  %v1909_v52 = vadd.f32 %v1908_v50, %v1907_v46  ;;  %v1862_v53 = vpop.f32.mrb[14].mxu0  ;;  %v1910_v54 = vpop.f32.mrb[14].mxu1  ;;  %v374_v45 = vld [vmem:[#allocation2 + $0xe0] sm:$0xff] }
 0x150   : > { %v1863_v56 = vpop.f32.mrb[15].mxu0  ;;  %v1911_v58 = vpop.f32.mrb[15].mxu1 }
 0x151   : > { %v869_v59 = vadd.f32 %v1861_v51, %v352_v47  ;;  %v885_v60 = vadd.f32 %v1909_v52, %v368_v49  ;;  %v1864_v61 = vadd.f32 %v1863_v56, %v1862_v53  ;;  %v1912_v62 = vadd.f32 %v1911_v58, %v1910_v54  ;;  %v359_v51 = vld [vmem:[#allocation2 + $0x68] sm:$0xff] }
 0x152   : > { %v375_v53 = vld [vmem:[#allocation2 + $0xe8] sm:$0xff] }
 0x153   : > { %901 = vst [vmem:[#allocation2 + $0x30] sm:$0xff] %v869_v59  ;;  %917 = vst [vmem:[#allocation2 + $0xb0] sm:$0xff] %v885_v60  ;;  %v870_v63 = vadd.f32 %v1864_v61, %v353_v55  ;;  %v886_v0 = vadd.f32 %v1912_v62, %v369_v57 }
 0x155   : > { %902 = vst [vmem:[#allocation2 + $0x38] sm:$0xff] %v870_v63  ;;  %918 = vst [vmem:[#allocation2 + $0xb8] sm:$0xff] %v886_v0  ;;  %v1865_v1 = vpop.f32.mrb[16].mxu0  ;;  %v1913_v2 = vpop.f32.mrb[16].mxu1  ;;  %v360_v63 = vld [vmem:[#allocation2 + $0x70] sm:$0xff] }
 0x156   : > { %v1866_v4 = vpop.f32.mrb[17].mxu0  ;;  %v1914_v6 = vpop.f32.mrb[17].mxu1 }
 0x157   : > { %v1867_v7 = vadd.f32 %v1866_v4, %v1865_v1  ;;  %v1915_v8 = vadd.f32 %v1914_v6, %v1913_v2  ;;  %v1868_v9 = vpop.f32.mrb[18].mxu0  ;;  %v1916_v10 = vpop.f32.mrb[18].mxu1  ;;  %v376_v1 = vld [vmem:[#allocation2 + $0xf0] sm:$0xff] }
 0x158   : > { %v1869_v12 = vpop.f32.mrb[19].mxu0  ;;  %v1917_v14 = vpop.f32.mrb[19].mxu1 }
 0x159   : > { %v871_v15 = vadd.f32 %v1867_v7, %v354_v3  ;;  %v887_v16 = vadd.f32 %v1915_v8, %v370_v5  ;;  %v1870_v17 = vadd.f32 %v1869_v12, %v1868_v9  ;;  %v1918_v18 = vadd.f32 %v1917_v14, %v1916_v10  ;;  %v361_v7 = vld [vmem:[#allocation2 + $0x78] sm:$0xff] }
 0x15a   : > { %v377_v9 = vld [vmem:[#allocation2 + $0xf8] sm:$0xff] }
 0x15b   : > { %903 = vst [vmem:[#allocation2 + $0x40] sm:$0xff] %v871_v15  ;;  %919 = vst [vmem:[#allocation2 + $0xc0] sm:$0xff] %v887_v16  ;;  %v872_v19 = vadd.f32 %v1870_v17, %v355_v11  ;;  %v888_v20 = vadd.f32 %v1918_v18, %v371_v13 }
 0x15d   : > { %904 = vst [vmem:[#allocation2 + $0x48] sm:$0xff] %v872_v19  ;;  %920 = vst [vmem:[#allocation2 + $0xc8] sm:$0xff] %v888_v20  ;;  %v1871_v21 = vpop.f32.mrb[20].mxu0  ;;  %v1919_v22 = vpop.f32.mrb[20].mxu1 }
 0x15e   : > { %v1872_v24 = vpop.f32.mrb[21].mxu0  ;;  %v1920_v26 = vpop.f32.mrb[21].mxu1 }
 0x15f   : > { %v1873_v27 = vadd.f32 %v1872_v24, %v1871_v21  ;;  %v1921_v28 = vadd.f32 %v1920_v26, %v1919_v22  ;;  %v1874_v29 = vpop.f32.mrb[22].mxu0  ;;  %v1922_v30 = vpop.f32.mrb[22].mxu1 }
 0x160   : > { %v1875_v32 = vpop.f32.mrb[23].mxu0  ;;  %v1923_v34 = vpop.f32.mrb[23].mxu1 }
 0x161   : > { %v873_v35 = vadd.f32 %v1873_v27, %v356_v23  ;;  %v889_v36 = vadd.f32 %v1921_v28, %v372_v25  ;;  %v1876_v37 = vadd.f32 %v1875_v32, %v1874_v29  ;;  %v1924_v38 = vadd.f32 %v1923_v34, %v1922_v30 }
 0x163   : > { %905 = vst [vmem:[#allocation2 + $0x50] sm:$0xff] %v873_v35  ;;  %921 = vst [vmem:[#allocation2 + $0xd0] sm:$0xff] %v889_v36  ;;  %v874_v39 = vadd.f32 %v1876_v37, %v357_v31  ;;  %v890_v40 = vadd.f32 %v1924_v38, %v373_v33 }
 0x165   : > { %906 = vst [vmem:[#allocation2 + $0x58] sm:$0xff] %v874_v39  ;;  %922 = vst [vmem:[#allocation2 + $0xd8] sm:$0xff] %v890_v40  ;;  %v1877_v41 = vpop.f32.mrb[24].mxu0  ;;  %v1925_v42 = vpop.f32.mrb[24].mxu1 }
 0x166   : > { %v1878_v44 = vpop.f32.mrb[25].mxu0  ;;  %v1926_v46 = vpop.f32.mrb[25].mxu1 }
 0x167   : > { %v1879_v47 = vadd.f32 %v1878_v44, %v1877_v41  ;;  %v1927_v48 = vadd.f32 %v1926_v46, %v1925_v42  ;;  %v1880_v49 = vpop.f32.mrb[26].mxu0  ;;  %v1928_v50 = vpop.f32.mrb[26].mxu1 }
 0x168   : > { %v1881_v52 = vpop.f32.mrb[27].mxu0  ;;  %v1929_v54 = vpop.f32.mrb[27].mxu1 }
 0x169   : > { %v875_v55 = vadd.f32 %v1879_v47, %v358_v43  ;;  %v891_v56 = vadd.f32 %v1927_v48, %v374_v45  ;;  %v1882_v57 = vadd.f32 %v1881_v52, %v1880_v49  ;;  %v1930_v58 = vadd.f32 %v1929_v54, %v1928_v50 }
 0x16b   : > { %907 = vst [vmem:[#allocation2 + $0x60] sm:$0xff] %v875_v55  ;;  %923 = vst [vmem:[#allocation2 + $0xe0] sm:$0xff] %v891_v56  ;;  %v876_v59 = vadd.f32 %v1882_v57, %v359_v51  ;;  %v892_v60 = vadd.f32 %v1930_v58, %v375_v53 }
 0x16d   : > { %908 = vst [vmem:[#allocation2 + $0x68] sm:$0xff] %v876_v59  ;;  %924 = vst [vmem:[#allocation2 + $0xe8] sm:$0xff] %v892_v60  ;;  %v1883_v61 = vpop.f32.mrb[28].mxu0  ;;  %v1931_v62 = vpop.f32.mrb[28].mxu1 }
 0x16e   : > { %v1884_v0 = vpop.f32.mrb[29].mxu0  ;;  %v1932_v2 = vpop.f32.mrb[29].mxu1 }
 0x16f   : > { %v1885_v3 = vadd.f32 %v1884_v0, %v1883_v61  ;;  %v1933_v4 = vadd.f32 %v1932_v2, %v1931_v62  ;;  %v1886_v5 = vpop.f32.mrb[30].mxu0  ;;  %v1934_v6 = vpop.f32.mrb[30].mxu1 }
 0x170   : > { %v1887_v8 = vpop.f32.mrb[31].mxu0  ;;  %v1935_v10 = vpop.f32.mrb[31].mxu1 }
 0x171   : > { %v877_v11 = vadd.f32 %v1885_v3, %v360_v63  ;;  %v893_v12 = vadd.f32 %v1933_v4, %v376_v1  ;;  %v1888_v13 = vadd.f32 %v1887_v8, %v1886_v5  ;;  %v1936_v14 = vadd.f32 %v1935_v10, %v1934_v6 }
 0x173   : > { %909 = vst [vmem:[#allocation2 + $0x70] sm:$0xff] %v877_v11  ;;  %925 = vst [vmem:[#allocation2 + $0xf0] sm:$0xff] %v893_v12  ;;  %v878_v15 = vadd.f32 %v1888_v13, %v361_v7  ;;  %v894_v16 = vadd.f32 %v1936_v14, %v377_v9 }
 0x175   : > { %910 = vst [vmem:[#allocation2 + $0x78] sm:$0xff] %v878_v15  ;;  %926 = vst [vmem:[#allocation2 + $0xf8] sm:$0xff] %v894_v16 }
 0x176 PF: > { %s1661_s17 = sshll.u32 %s2097_s14, 8  ;;  %v931_v17 = vlaneseq  ;;  %v997_v18 = vld [vmem:[#allocation2] sm:$0xff]  ;;  %v998_v19 = vld [vmem:[#allocation2 + $0x8] sm:$0xff]  ;;  %v999_v24 = vld [vmem:[#allocation2 + $0x10] sm:$0xff] }
 0x177   : > { %v2275_v20 = vld [vmem:[%s2409_s5] ss:$0 sm:$0xff]  ;;  %v2277_v21 = vstv %s1661_s17  ;;  %v1000_v25 = vld [vmem:[#allocation2 + $0x18] sm:$0xff]  ;;  %v1002_v30 = vld [vmem:[#allocation2 + $0x28] sm:$0xff] }
 0x178   : > { %v1036_v22 = vadd.f32 %v2275_v20, %v997_v18  ;;  %v1037_v23 = vadd.f32 %v2275_v20, %v998_v19  ;;  %v1001_v26 = vld [vmem:[#allocation2 + $0x20] sm:$0xff]  ;;  %v2281_v27 = vshrl.u32 %v931_v17, 7  ;;  %v1038_v28 = vadd.f32 %v2275_v20, %v999_v24  ;;  %v1003_v32 = vld [vmem:[#allocation2 + $0x30] sm:$0xff]  ;;  %v1004_v63 = vld [vmem:[#allocation2 + $0x38] sm:$0xff] }
 0x179   : > { %v1039_v29 = vadd.f32 %v2275_v20, %v1000_v25  ;;  %v1040_v31 = vadd.f32 %v2275_v20, %v1001_v26  ;;  %v1041_v35 = vadd.f32 %v2275_v20, %v1002_v30  ;;  %v2288_v36 = vadd.f32 %v2275_v20, %v1003_v32  ;;  %v1005_v12 = vld [vmem:[#allocation2 + $0x40] sm:$0xff] }
 0x17a   : > { %v1068_v33 = vmax.f32 %v1036_v22, 0.0  ;;  %v1069_v34 = vmax.f32 %v1037_v23, 0.0  ;;  %v933_v37 = vadd.s32 8, %v2281_v27  ;;  %v965_v38 = vadd.s32 %v2277_v21, %v2281_v27  ;;  %v1006_v23 = vld [vmem:[#allocation2 + $0x48] sm:$0xff] }
 0x17b   : > { %v934_v39 = vadd.s32 16, %v2281_v27  ;;  %v935_v40 = vadd.s32 24, %v2281_v27  ;;  %v1070_v41 = vmax.f32 %v1038_v28, 0.0  ;;  %v1071_v42 = vmax.f32 %v1039_v29, 0.0 }
 0x17c   : > { %v936_v43 = vadd.s32 32, %v2281_v27  ;;  %v937_v44 = vadd.s32 40, %v2281_v27  ;;  %v966_v45 = vadd.s32 %v2277_v21, %v933_v37  ;;  %vm1100_vm0 = vcmp.lt.s32.totalorder %v965_v38, 316 }
 0x17d   : > { %v967_v46 = vadd.s32 %v2277_v21, %v934_v39  ;;  %v968_v47 = vadd.s32 %v2277_v21, %v935_v40  ;;  %v1196_v48 = vsel %vm1100_vm0, %v1068_v33, 0.0  ;;  %v1072_v51 = vmax.f32 %v1040_v31, 0.0  ;;  %v1007_v39 = vld [vmem:[#allocation2 + $0x50] sm:$0xff] }
 0x17e   : > { %v969_v49 = vadd.s32 %v2277_v21, %v936_v43  ;;  %v970_v50 = vadd.s32 %v2277_v21, %v937_v44  ;;  %vm1101_vm1 = vcmp.lt.s32.totalorder %v966_v45, 316  ;;  %v1425_v52 = vmul.f32 %v1196_v48, %v1196_v48 }
 0x17f   : > { %vm1102_vm2 = vcmp.lt.s32.totalorder %v967_v46, 316  ;;  %vm1103_vm3 = vcmp.lt.s32.totalorder %v968_v47, 316  ;;  %v1197_v53 = vsel %vm1101_vm1, %v1069_v34, 0.0  ;;  %v1073_v56 = vmax.f32 %v1041_v35, 0.0  ;;  %v1008_v46 = vld [vmem:[#allocation2 + $0x58] sm:$0xff] }
 0x180   : > { %v1198_v54 = vsel %vm1102_vm2, %v1070_v41, 0.0  ;;  %v1199_v55 = vsel %vm1103_vm3, %v1071_v42, 0.0  ;;  %v1733_v57 = vpack.c.bf16 %v1197_v53, %v1196_v48  ;;  %v1388_v58 = vadd.f32 %v1197_v53, %v1196_v48 }
 0x181   : > { %v1426_v59 = vmul.f32 %v1197_v53, %v1197_v53  ;;  %v1738_v60 = vpack.c.bf16 %v1199_v55, %v1198_v54  ;;  %v1427_v61 = vmul.f32 %v1198_v54, %v1198_v54  ;;  %v1428_v62 = vmul.f32 %v1199_v55, %v1199_v55 }
 0x182   : > { %vm1104_vm4 = vcmp.lt.s32.totalorder %v969_v49, 316  ;;  %vm1105_vm5 = vcmp.lt.s32.totalorder %v970_v50, 316  ;;  %1734 = vst [vmem:[%s2202_s26] sm:$0xff] %v1733_v57   ;;  %v1389_v1 = vadd.f32 %v1388_v58, %v1198_v54  ;;  %v938_v7 = vadd.s32 48, %v2281_v27 }
 0x183   : > { %v1457_v0 = vadd.f32 %v1426_v59, %v1425_v52  ;;  %1810 = vst [vmem:[%s2202_s26 + $0x8] sm:$0xff] %v1738_v60   ;;  %v1200_v2 = vsel %vm1104_vm4, %v1072_v51, 0.0  ;;  %v1201_v3 = vsel %vm1105_vm5, %v1073_v56, 0.0  ;;  %v939_v10 = vadd.s32 56, %v2281_v27 }
 0x184   : > { %v1743_v4 = vpack.c.bf16 %v1201_v3, %v1200_v2  ;;  %v1429_v5 = vmul.f32 %v1200_v2, %v1200_v2  ;;  %v1430_v6 = vmul.f32 %v1201_v3, %v1201_v3  ;;  %v1390_v8 = vadd.f32 %v1389_v1, %v1199_v55  ;;  %v1009_v55 = vld [vmem:[#allocation2 + $0x60] sm:$0xff] }
 0x185   : > { %v1458_v9 = vadd.f32 %v1457_v0, %v1427_v61  ;;  %v1043_v11 = vadd.f32 %v2275_v20, %v1004_v63  ;;  %v971_v13 = vadd.s32 %v2277_v21, %v938_v7  ;;  %v1074_v14 = vmax.f32 %v2288_v36, 0.0  ;;  %v1010_v63 = vld [vmem:[#allocation2 + $0x68] sm:$0xff] }
 0x186   : > { %1811 = vst [vmem:[%s2202_s26 + $0x10] sm:$0xff] %v1743_v4   ;;  %v940_v15 = vadd.s32 64, %v2281_v27  ;;  %v941_v16 = vadd.s32 72, %v2281_v27  ;;  %v1391_v18 = vadd.f32 %v1390_v8, %v1200_v2  ;;  %v972_v19 = vadd.s32 %v2277_v21, %v939_v10 }
 0x187   : > { %v1459_v17 = vadd.f32 %v1458_v9, %v1428_v62  ;;  %v1075_v22 = vmax.f32 %v1043_v11, 0.0  ;;  %vm1106_vm6 = vcmp.lt.s32.totalorder %v971_v13, 316  ;;  %v1044_v26 = vadd.f32 %v2275_v20, %v1005_v12  ;;  %v1011_v11 = vld [vmem:[#allocation2 + $0x70] sm:$0xff] }
 0x188   : > { %v973_v24 = vadd.s32 %v2277_v21, %v940_v15  ;;  %v974_v25 = vadd.s32 %v2277_v21, %v941_v16  ;;  %v1392_v28 = vadd.f32 %v1391_v18, %v1201_v3  ;;  %vm1107_vm7 = vcmp.lt.s32.totalorder %v972_v19, 316  ;;  %v1012_v18 = vld [vmem:[#allocation2 + $0x78] sm:$0xff] }
 0x189   : > { %v1460_v29 = vadd.f32 %v1459_v17, %v1429_v5  ;;  %v1202_v30 = vsel %vm1106_vm6, %v1074_v14, 0.0  ;;  %v1203_v31 = vsel %vm1107_vm7, %v1075_v22, 0.0  ;;  %v1045_v33 = vadd.f32 %v2275_v20, %v1006_v23 }
 0x18a   : > { %v1431_v32 = vmul.f32 %v1202_v30, %v1202_v30  ;;  %v1076_v34 = vmax.f32 %v1044_v26, 0.0  ;;  %v1748_v36 = vpack.c.bf16 %v1203_v31, %v1202_v30  ;;  %v1393_v37 = vadd.f32 %v1392_v28, %v1202_v30 }
 0x18b   : > { %v1461_v35 = vadd.f32 %v1460_v29, %v1430_v6  ;;  %v1432_v38 = vmul.f32 %v1203_v31, %v1203_v31  ;;  %v1077_v40 = vmax.f32 %v1045_v33, 0.0  ;;  %vm1108_vm8 = vcmp.lt.s32.totalorder %v973_v24, 316 }
 0x18c   : > { %vm1109_vm9 = vcmp.lt.s32.totalorder %v974_v25, 316  ;;  %v942_v41 = vadd.s32 80, %v2281_v27  ;;  %1812 = vst [vmem:[%s2202_s26 + $0x18] sm:$0xff] %v1748_v36   ;;  %v1394_v42 = vadd.f32 %v1393_v37, %v1203_v31  ;;  %v1204_v44 = vsel %vm1108_vm8, %v1076_v34, 0.0  ;;  %v1013_v34 = vld [vmem:[#allocation2 + $0x80] sm:$0xff] }
 0x18d   : > { %v1462_v43 = vadd.f32 %v1461_v35, %v1431_v32  ;;  %v943_v45 = vadd.s32 88, %v2281_v27  ;;  %v1205_v47 = vsel %vm1109_vm9, %v1077_v40, 0.0  ;;  %v1433_v48 = vmul.f32 %v1204_v44, %v1204_v44  ;;  %v1014_v35 = vld [vmem:[#allocation2 + $0x88] sm:$0xff] }
 0x18e   : > { %v975_v49 = vadd.s32 %v2277_v21, %v942_v41  ;;  %v1046_v50 = vadd.f32 %v2275_v20, %v1007_v39  ;;  %v1753_v52 = vpack.c.bf16 %v1205_v47, %v1204_v44  ;;  %v1395_v53 = vadd.f32 %v1394_v42, %v1204_v44 }
 0x18f   : > { %v1463_v51 = vadd.f32 %v1462_v43, %v1432_v38  ;;  %v1434_v54 = vmul.f32 %v1205_v47, %v1205_v47  ;;  %v976_v56 = vadd.s32 %v2277_v21, %v943_v45  ;;  %v1047_v57 = vadd.f32 %v2275_v20, %v1008_v46 }
 0x190   : > { %v1078_v58 = vmax.f32 %v1046_v50, 0.0  ;;  %vm1110_vm10 = vcmp.lt.s32.totalorder %v975_v49, 316  ;;  %1813 = vst [vmem:[%s2202_s26 + $0x20] sm:$0xff] %v1753_v52   ;;  %v1396_v59 = vadd.f32 %v1395_v53, %v1205_v47  ;;  %v944_v61 = vadd.s32 96, %v2281_v27 }
 0x191   : > { %v1464_v60 = vadd.f32 %v1463_v51, %v1433_v48  ;;  %v945_v62 = vadd.s32 104, %v2281_v27  ;;  %v1079_v0 = vmax.f32 %v1047_v57, 0.0  ;;  %vm1111_vm11 = vcmp.lt.s32.totalorder %v976_v56, 316 }
 0x192   : > { %v1206_v1 = vsel %vm1110_vm10, %v1078_v58, 0.0  ;;  %v1048_v2 = vadd.f32 %v2275_v20, %v1009_v55  ;;  %v977_v6 = vadd.s32 %v2277_v21, %v944_v61  ;;  %v1049_v9 = vadd.f32 %v2275_v20, %v1010_v63  ;;  %v1016_v61 = vld [vmem:[#allocation2 + $0x98] sm:$0xff] }
 0x193   : > { %v1465_v3 = vadd.f32 %v1464_v60, %v1434_v54  ;;  %v1397_v4 = vadd.f32 %v1396_v59, %v1206_v1  ;;  %v1435_v5 = vmul.f32 %v1206_v1, %v1206_v1  ;;  %v1207_v7 = vsel %vm1111_vm11, %v1079_v0, 0.0  ;;  %v1015_v60 = vld [vmem:[#allocation2 + $0x90] sm:$0xff] }
 0x194   : > { %v978_v8 = vadd.s32 %v2277_v21, %v945_v62  ;;  %v1080_v10 = vmax.f32 %v1048_v2, 0.0  ;;  %v1758_v12 = vpack.c.bf16 %v1207_v7, %v1206_v1  ;;  %v1436_v14 = vmul.f32 %v1207_v7, %v1207_v7 }
 0x195   : > { %v1398_v13 = vadd.f32 %v1397_v4, %v1207_v7  ;;  %v1466_v15 = vadd.f32 %v1465_v3, %v1435_v5  ;;  %v1081_v16 = vmax.f32 %v1049_v9, 0.0  ;;  %vm1112_vm12 = vcmp.lt.s32.totalorder %v977_v6, 316  ;;  %v1017_v6 = vld [vmem:[#allocation2 + $0xa0] sm:$0xff] }
 0x196   : > { %vm1113_vm13 = vcmp.lt.s32.totalorder %v978_v8, 316  ;;  %v946_v17 = vadd.s32 112, %v2281_v27  ;;  %1814 = vst [vmem:[%s2202_s26 + $0x28] sm:$0xff] %v1758_v12   ;;  %v1208_v22 = vsel %vm1112_vm12, %v1080_v10, 0.0  ;;  %v947_v23 = vadd.s32 120, %v2281_v27 }
 0x197   : > { %v1467_v19 = vadd.f32 %v1466_v15, %v1436_v14  ;;  %v1050_v24 = vadd.f32 %v2275_v20, %v1011_v11  ;;  %v1209_v25 = vsel %vm1113_vm13, %v1081_v16, 0.0  ;;  %v1399_v26 = vadd.f32 %v1398_v13, %v1208_v22  ;;  %v1018_v11 = vld [vmem:[#allocation2 + $0xa8] sm:$0xff] }
 0x198   : > { %v1437_v28 = vmul.f32 %v1208_v22, %v1208_v22  ;;  %v979_v29 = vadd.s32 %v2277_v21, %v946_v17  ;;  %v1763_v30 = vpack.c.bf16 %v1209_v25, %v1208_v22  ;;  %v1438_v31 = vmul.f32 %v1209_v25, %v1209_v25 }
 0x199   : > { %v980_v32 = vadd.s32 %v2277_v21, %v947_v23  ;;  %v1051_v33 = vadd.f32 %v2275_v20, %v1012_v18  ;;  %v1400_v36 = vadd.f32 %v1399_v26, %v1209_v25  ;;  %v1082_v38 = vmax.f32 %v1050_v24, 0.0 }
 0x19a   : > { %v1468_v37 = vadd.f32 %v1467_v19, %v1437_v28  ;;  %vm1114_vm14 = vcmp.lt.s32.totalorder %v979_v29, 316  ;;  %1815 = vst [vmem:[%s2202_s26 + $0x30] sm:$0xff] %v1763_v30   ;;  %v948_v40 = vadd.s32 128, %v2281_v27  ;;  %v949_v41 = vadd.s32 136, %v2281_v27 }
 0x19b   : > { %v1083_v39 = vmax.f32 %v1051_v33, 0.0  ;;  %vm1115_vm15 = vcmp.lt.s32.totalorder %v980_v32, 316  ;;  %v1210_v43 = vsel %vm1114_vm14, %v1082_v38, 0.0  ;;  %v1052_v44 = vadd.f32 %v2275_v20, %v1013_v34  ;;  %v1019_v33 = vld [vmem:[#allocation2 + $0xb0] sm:$0xff]  ;;  %v1020_v34 = vld [vmem:[#allocation2 + $0xb8] sm:$0xff] }
 0x19c   : > { %v1469_v42 = vadd.f32 %v1468_v37, %v1438_v31  ;;  %v1053_v45 = vadd.f32 %v2275_v20, %v1014_v35  ;;  %v1401_v47 = vadd.f32 %v1400_v36, %v1210_v43  ;;  %v1439_v48 = vmul.f32 %v1210_v43, %v1210_v43 }
 0x19d   : > { %v1211_v46 = vsel %vm1115_vm15, %v1083_v39, 0.0  ;;  %v981_v49 = vadd.s32 %v2277_v21, %v948_v40  ;;  %v982_v52 = vadd.s32 %v2277_v21, %v949_v41  ;;  %v1084_v53 = vmax.f32 %v1052_v44, 0.0 }
 0x19e   : > { %v1768_v50 = vpack.c.bf16 %v1211_v46, %v1210_v43  ;;  %v1440_v51 = vmul.f32 %v1211_v46, %v1211_v46  ;;  %v1402_v54 = vadd.f32 %v1401_v47, %v1211_v46  ;;  %v1470_v55 = vadd.f32 %v1469_v42, %v1439_v48 }
 0x19f   : > { %v1085_v56 = vmax.f32 %v1053_v45, 0.0  ;;  %vm1116_vm0 = vcmp.lt.s32.totalorder %v981_v49, 316  ;;  %vm1117_vm1 = vcmp.lt.s32.totalorder %v982_v52, 316  ;;  %v950_v58 = vadd.s32 144, %v2281_v27  ;;  %v1021_v49 = vld [vmem:[#allocation2 + $0xc0] sm:$0xff] }
 0x1a0   : > { %1816 = vst [vmem:[%s2202_s26 + $0x38] sm:$0xff] %v1768_v50   ;;  %v1212_v57 = vsel %vm1116_vm0, %v1084_v53, 0.0  ;;  %v951_v59 = vadd.s32 152, %v2281_v27  ;;  %v1471_v62 = vadd.f32 %v1470_v55, %v1440_v51  ;;  %v1054_v9 = vadd.f32 %v2275_v20, %v1015_v60  ;;  %v1022_v50 = vld [vmem:[#allocation2 + $0xc8] sm:$0xff] }
 0x1a1   : > { %v1213_v63 = vsel %vm1117_vm1, %v1085_v56, 0.0  ;;  %v1403_v0 = vadd.f32 %v1402_v54, %v1212_v57  ;;  %v1441_v1 = vmul.f32 %v1212_v57, %v1212_v57  ;;  %v983_v4 = vadd.s32 %v2277_v21, %v950_v58 }
 0x1a2   : > { %v1773_v2 = vpack.c.bf16 %v1213_v63, %v1212_v57  ;;  %v1442_v3 = vmul.f32 %v1213_v63, %v1213_v63  ;;  %v984_v5 = vadd.s32 %v2277_v21, %v951_v59  ;;  %v1055_v10 = vadd.f32 %v2275_v20, %v1016_v61 }
 0x1a3   : > { %v1404_v7 = vadd.f32 %v1403_v0, %v1213_v63  ;;  %v1472_v8 = vadd.f32 %v1471_v62, %v1441_v1  ;;  %vm1118_vm2 = vcmp.lt.s32.totalorder %v983_v4, 316  ;;  %v952_v12 = vadd.s32 160, %v2281_v27  ;;  %v1023_v1 = vld [vmem:[#allocation2 + $0xd0] sm:$0xff] }
 0x1a4   : > { %1817 = vst [vmem:[%s2202_s26 + $0x40] sm:$0xff] %v1773_v2   ;;  %vm1119_vm3 = vcmp.lt.s32.totalorder %v984_v5, 316  ;;  %v953_v13 = vadd.s32 168, %v2281_v27  ;;  %v1086_v15 = vmax.f32 %v1054_v9, 0.0  ;;  %v1087_v16 = vmax.f32 %v1055_v10, 0.0 }
 0x1a5   : > { %v1473_v14 = vadd.f32 %v1472_v8, %v1442_v3  ;;  %v1056_v17 = vadd.f32 %v2275_v20, %v1017_v6  ;;  %v985_v18 = vadd.s32 %v2277_v21, %v952_v12  ;;  %v1057_v22 = vadd.f32 %v2275_v20, %v1018_v11  ;;  %v1024_v11 = vld [vmem:[#allocation2 + $0xd8] sm:$0xff] }
 0x1a6   : > { %v986_v19 = vadd.s32 %v2277_v21, %v953_v13  ;;  %v954_v23 = vadd.s32 176, %v2281_v27  ;;  %v1214_v24 = vsel %vm1118_vm2, %v1086_v15, 0.0  ;;  %v1215_v25 = vsel %vm1119_vm3, %v1087_v16, 0.0 }
 0x1a7   : > { %v1088_v26 = vmax.f32 %v1056_v17, 0.0  ;;  %v955_v28 = vadd.s32 184, %v2281_v27  ;;  %v1778_v29 = vpack.c.bf16 %v1215_v25, %v1214_v24  ;;  %v1405_v30 = vadd.f32 %v1404_v7, %v1214_v24 }
 0x1a8   : > { %v1443_v31 = vmul.f32 %v1214_v24, %v1214_v24  ;;  %v1444_v32 = vmul.f32 %v1215_v25, %v1215_v25  ;;  %v1089_v35 = vmax.f32 %v1057_v22, 0.0  ;;  %vm1120_vm4 = vcmp.lt.s32.totalorder %v985_v18, 316 }
 0x1a9   : > { %vm1121_vm5 = vcmp.lt.s32.totalorder %v986_v19, 316  ;;  %v987_v36 = vadd.s32 %v2277_v21, %v954_v23  ;;  %1818 = vst [vmem:[%s2202_s26 + $0x48] sm:$0xff] %v1778_v29   ;;  %v1406_v37 = vadd.f32 %v1405_v30, %v1215_v25  ;;  %v1216_v39 = vsel %vm1120_vm4, %v1088_v26, 0.0  ;;  %v1025_v23 = vld [vmem:[#allocation2 + $0xe0] sm:$0xff] }
 0x1aa   : > { %v1474_v38 = vadd.f32 %v1473_v14, %v1443_v31  ;;  %v988_v40 = vadd.s32 %v2277_v21, %v955_v28  ;;  %v1217_v41 = vsel %vm1121_vm5, %v1089_v35, 0.0  ;;  %v1445_v42 = vmul.f32 %v1216_v39, %v1216_v39 }
 0x1ab   : > { %v1058_v43 = vadd.f32 %v2275_v20, %v1019_v33  ;;  %v1059_v44 = vadd.f32 %v2275_v20, %v1020_v34  ;;  %v1783_v46 = vpack.c.bf16 %v1217_v41, %v1216_v39  ;;  %v1407_v47 = vadd.f32 %v1406_v37, %v1216_v39 }
 0x1ac   : > { %v1475_v45 = vadd.f32 %v1474_v38, %v1444_v32  ;;  %v1446_v48 = vmul.f32 %v1217_v41, %v1217_v41  ;;  %vm1122_vm6 = vcmp.lt.s32.totalorder %v987_v36, 316  ;;  %vm1123_vm7 = vcmp.lt.s32.totalorder %v988_v40, 316  ;;  %v1026_v32 = vld [vmem:[#allocation2 + $0xe8] sm:$0xff] }
 0x1ad   : > { %v1090_v51 = vmax.f32 %v1058_v43, 0.0  ;;  %v1091_v52 = vmax.f32 %v1059_v44, 0.0  ;;  %1819 = vst [vmem:[%s2202_s26 + $0x50] sm:$0xff] %v1783_v46   ;;  %v1408_v53 = vadd.f32 %v1407_v47, %v1217_v41  ;;  %v956_v55 = vadd.s32 192, %v2281_v27  ;;  %v1027_v44 = vld [vmem:[#allocation2 + $0xf0] sm:$0xff] }
 0x1ae   : > { %v1476_v54 = vadd.f32 %v1475_v45, %v1445_v42  ;;  %v957_v56 = vadd.s32 200, %v2281_v27  ;;  %v1060_v59 = vadd.f32 %v2275_v20, %v1021_v49  ;;  %v1061_v60 = vadd.f32 %v2275_v20, %v1022_v50 }
 0x1af   : > { %v1218_v57 = vsel %vm1122_vm6, %v1090_v51, 0.0  ;;  %v1219_v58 = vsel %vm1123_vm7, %v1091_v52, 0.0  ;;  %v989_v3 = vadd.s32 %v2277_v21, %v956_v55  ;;  %v958_v9 = vadd.s32 208, %v2281_v27  ;;  %v1028_v51 = vld [vmem:[#allocation2 + $0xf8] sm:$0xff] }
 0x1b0   : > { %v1477_v61 = vadd.f32 %v1476_v54, %v1446_v48  ;;  %v1788_v62 = vpack.c.bf16 %v1219_v58, %v1218_v57  ;;  %v1409_v63 = vadd.f32 %v1408_v53, %v1218_v57  ;;  %v1447_v0 = vmul.f32 %v1218_v57, %v1218_v57 }
 0x1b1   : > { %v1448_v2 = vmul.f32 %v1219_v58, %v1219_v58  ;;  %v990_v4 = vadd.s32 %v2277_v21, %v957_v56  ;;  %v1092_v5 = vmax.f32 %v1060_v59, 0.0  ;;  %v1093_v8 = vmax.f32 %v1061_v60, 0.0 }
 0x1b2   : > { %1820 = vst [vmem:[%s2202_s26 + $0x58] sm:$0xff] %v1788_v62   ;;  %v1410_v6 = vadd.f32 %v1409_v63, %v1219_v58  ;;  %v1478_v7 = vadd.f32 %v1477_v61, %v1447_v0  ;;  %vm1124_vm8 = vcmp.lt.s32.totalorder %v989_v3, 316  ;;  %v959_v10 = vadd.s32 216, %v2281_v27 }
 0x1b3   : > { %vm1125_vm9 = vcmp.lt.s32.totalorder %v990_v4, 316  ;;  %v1062_v12 = vadd.f32 %v2275_v20, %v1023_v1  ;;  %v1220_v14 = vsel %vm1124_vm8, %v1092_v5, 0.0  ;;  %v991_v16 = vadd.s32 %v2277_v21, %v958_v9 }
 0x1b4   : > { %v1479_v13 = vadd.f32 %v1478_v7, %v1448_v2  ;;  %v1221_v15 = vsel %vm1125_vm9, %v1093_v8, 0.0  ;;  %v1411_v18 = vadd.f32 %v1410_v6, %v1220_v14  ;;  %v1449_v19 = vmul.f32 %v1220_v14, %v1220_v14 }
 0x1b5   : > { %v1793_v17 = vpack.c.bf16 %v1221_v15, %v1220_v14  ;;  %v1450_v22 = vmul.f32 %v1221_v15, %v1221_v15  ;;  %v992_v24 = vadd.s32 %v2277_v21, %v959_v10  ;;  %v1063_v25 = vadd.f32 %v2275_v20, %v1024_v11 }
 0x1b6   : > { %v1094_v26 = vmax.f32 %v1062_v12, 0.0  ;;  %vm1126_vm10 = vcmp.lt.s32.totalorder %v991_v16, 316  ;;  %v1412_v28 = vadd.f32 %v1411_v18, %v1221_v15  ;;  %v1480_v29 = vadd.f32 %v1479_v13, %v1449_v19 }
 0x1b7   : > { %1821 = vst [vmem:[%s2202_s26 + $0x60] sm:$0xff] %v1793_v17   ;;  %v960_v30 = vadd.s32 224, %v2281_v27  ;;  %v961_v31 = vadd.s32 232, %v2281_v27  ;;  %v1095_v33 = vmax.f32 %v1063_v25, 0.0  ;;  %vm1127_vm11 = vcmp.lt.s32.totalorder %v992_v24, 316 }
 0x1b8   : > { %v1222_v34 = vsel %vm1126_vm10, %v1094_v26, 0.0  ;;  %v1064_v35 = vadd.f32 %v2275_v20, %v1025_v23  ;;  %v1481_v36 = vadd.f32 %v1480_v29, %v1450_v22  ;;  %v1065_v42 = vadd.f32 %v2275_v20, %v1026_v32 }
 0x1b9   : > { %v1413_v37 = vadd.f32 %v1412_v28, %v1222_v34  ;;  %v1451_v38 = vmul.f32 %v1222_v34, %v1222_v34  ;;  %v993_v39 = vadd.s32 %v2277_v21, %v960_v30  ;;  %v1223_v40 = vsel %vm1127_vm11, %v1095_v33, 0.0 }
 0x1ba   : > { %v994_v41 = vadd.s32 %v2277_v21, %v961_v31  ;;  %v1096_v43 = vmax.f32 %v1064_v35, 0.0  ;;  %v1798_v45 = vpack.c.bf16 %v1223_v40, %v1222_v34  ;;  %v1452_v47 = vmul.f32 %v1223_v40, %v1223_v40 }
 0x1bb   : > { %v1414_v46 = vadd.f32 %v1413_v37, %v1223_v40  ;;  %v1482_v48 = vadd.f32 %v1481_v36, %v1451_v38  ;;  %v1097_v49 = vmax.f32 %v1065_v42, 0.0  ;;  %vm1128_vm12 = vcmp.lt.s32.totalorder %v993_v39, 316 }
 0x1bc   : > { %vm1129_vm13 = vcmp.lt.s32.totalorder %v994_v41, 316  ;;  %v962_v50 = vadd.s32 240, %v2281_v27  ;;  %1822 = vst [vmem:[%s2202_s26 + $0x68] sm:$0xff] %v1798_v45   ;;  %v1224_v53 = vsel %vm1128_vm12, %v1096_v43, 0.0  ;;  %v963_v54 = vadd.s32 248, %v2281_v27 }
 0x1bd   : > { %v1483_v52 = vadd.f32 %v1482_v48, %v1452_v47  ;;  %v1066_v55 = vadd.f32 %v2275_v20, %v1027_v44  ;;  %v1225_v56 = vsel %vm1129_vm13, %v1097_v49, 0.0  ;;  %v1415_v57 = vadd.f32 %v1414_v46, %v1224_v53 }
 0x1be   : > { %v1453_v58 = vmul.f32 %v1224_v53, %v1224_v53  ;;  %v995_v59 = vadd.s32 %v2277_v21, %v962_v50  ;;  %v1803_v60 = vpack.c.bf16 %v1225_v56, %v1224_v53  ;;  %v1454_v61 = vmul.f32 %v1225_v56, %v1225_v56 }
 0x1bf   : > { %v996_v62 = vadd.s32 %v2277_v21, %v963_v54  ;;  %v1067_v63 = vadd.f32 %v2275_v20, %v1028_v51  ;;  %v1416_v0 = vadd.f32 %v1415_v57, %v1225_v56  ;;  %v1098_v2 = vmax.f32 %v1066_v55, 0.0 }
 0x1c0   : > { %v1484_v1 = vadd.f32 %v1483_v52, %v1453_v58  ;;  %vm1130_vm14 = vcmp.lt.s32.totalorder %v995_v59, 316  ;;  %1823 = vst [vmem:[%s2202_s26 + $0x70] sm:$0xff] %v1803_v60   ;;  %vm1494_vm0 = vcmask 1040384  }
 0x1c1   : > { %v1099_v27 = vmax.f32 %v1067_v63, 0.0  ;;  %vm1131_vm15 = vcmp.lt.s32.totalorder %v996_v62, 316  ;;  %v1226_v4 = vsel %vm1130_vm14, %v1098_v2, 0.0 }
 0x1c2   : > { %v1485_v3 = vadd.f32 %v1484_v1, %v1454_v61  ;;  %v1417_v6 = vadd.f32 %v1416_v0, %v1226_v4  ;;  %v1455_v7 = vmul.f32 %v1226_v4, %v1226_v4 }
 0x1c3   : > { %v1227_v5 = vsel %vm1131_vm15, %v1099_v27, 0.0 }
 0x1c4   : > { %v1808_v8 = vpack.c.bf16 %v1227_v5, %v1226_v4  ;;  %v1456_v9 = vmul.f32 %v1227_v5, %v1227_v5  ;;  %v1418_v10 = vadd.f32 %v1417_v6, %v1227_v5  ;;  %v1486_v11 = vadd.f32 %v1485_v3, %v1455_v7 }
 0x1c6   : > { %1824 = vst [vmem:[%s2202_s26 + $0x78] sm:$0xff] %v1808_v8   ;;  %v1419_v20 = vrot.slane %v1418_v10, 4  ;;  %v1487_v21 = vadd.f32 %v1486_v11, %v1456_v9 }
 0x1c8   : > { %v1420_v12 = vadd.f32 %v1419_v20, %v1418_v10  ;;  %v1488_v13 = vrot.slane %v1487_v21, 4 }
 0x1ca   : > { %v1421_v14 = vrot.slane %v1420_v12, 2  ;;  %v1489_v15 = vadd.f32 %v1488_v13, %v1487_v21 }
 0x1cc   : > { %v1422_v16 = vadd.f32 %v1421_v14, %v1420_v12  ;;  %v1490_v17 = vrot.slane %v1489_v15, 2 }
 0x1ce   : > { %v1423_v18 = vrot.slane %v1422_v16, 1  ;;  %v1491_v19 = vadd.f32 %v1490_v17, %v1489_v15 }
 0x1d0   : > { %v1424_v22 = vadd.f32 %v1423_v18, %v1422_v16  ;;  %v1492_v23 = vrot.slane %v1491_v19, 1 }
 0x1d2   : > { %v1493_v24 = vadd.f32 %v1492_v23, %v1491_v19 }
 0x1d4   : > { %v1495_v25 = vsel %vm1494_vm0, %v1424_v22, %v1493_v24 }
 0x1d5   : > { %1496 = vst [vmem:[%s2208_s30] sm:$0x3] %v1495_v25 }
 0x1d6 PF: > { %s32_s16 = sadd.s32 1, %s2105_s16   ;;  %s2415_s14 = smov %s2101_s15 }
 0x1d7   : > { %p29_p9 = scmp.ge.s32.totalorder %s32_s16, 4   ;;  %s2416_s15 = smov %s2418_s2 }
 0x1d9   :  { %31 = sbr.rel (!%p29_p9) target bundleno = 37 (0x25), region = 87 }

// kernel: resgcn_forward.16
= control target key start
LH: loop header
LB: loop body
LE: loop exit
PB: predicated region body
PF: predicated region fallthrough
CT: control target
= control target key end

     0   :  { %s3029_s0 = inlined_call_operand.vmem [shape: s32[2,1], index: 0, kind: input, shape index: {}]   ;;  %s3030_s3 = inlined_call_operand.vmem [shape: bf16[2,256,256], index: 3, kind: input, shape index: {}]   ;;  %s3031_s4 = inlined_call_operand.vmem [shape: bf16[512,128], index: 4, kind: input, shape index: {}]   ;;  %s3032_s5 = inlined_call_operand.vmem [shape: f32[1,128], index: 5, kind: input, shape index: {}]   ;;  %s3033_s6 = inlined_call_operand.vmem [shape: bf16[512,128], index: 6, kind: output, shape index: {0}]   ;;  %s3034_s7 = inlined_call_operand.hbm [shape: f32[2,2,128], index: 7, kind: output, shape index: {1}]   ;;  %s3035_s1 = inlined_call_operand.vmem [shape: s32[2,1], index: 1, kind: input, shape index: {}]   ;;  %s3036_s2 = inlined_call_operand.vmem [shape: s32[2], index: 2, kind: input, shape index: {}]  }
   0x1   :  { %s13_s26 = sshll.u32 %s3029_s0, 4  ;;  %s17_s29 = sshll.u32 %s3035_s1, 4  ;;  %s14_s26 = int_to_ptr.vmem [resolvable:$true] %s13_s26  ;;  %s18_s29 = int_to_ptr.vmem [resolvable:$true] %s17_s29 }
   0x2   :  { %s2097_s30 = scalar_lea.vmem %s14_s26, 32  ;;  %p2102_p1 = scmp.lt.s32.totalorder %s14_s26, %s14_s26 }
   0x3   :  { %p2098_p0 = scmp.ne.s32.totalorder %s14_s26, %s2097_s30  ;;  %p2103_p2 = scmp.lt.s32.totalorder %s2097_s30, %s2097_s30 }
   0x5   :  { %p2104_p3 = por %p2103_p2, %p2102_p1 }
   0x7   :  { %p2105_p4 = pnand %p2104_p3, %p2098_p0 }
   0x9   :  { %2108 = shalt.err (!%p2105_p4)  }
   0xa   :  { %s2215_s8 = smov [#allocation4]   ;;  %s2109_s9 = scalar_lea.vmem %s18_s29, 32 }
   0xb   :  { %16 = dma.vmem_to_smem %s14_s26, 32, %s2215_s8, [#allocation3] }
   0xc   :  { %p2110_p5 = scmp.ne.s32.totalorder %s18_s29, %s2109_s9  ;;  %p2114_p6 = scmp.lt.s32.totalorder %s18_s29, %s18_s29 }
   0xd   :  { %p2115_p7 = scmp.lt.s32.totalorder %s2109_s9, %s2109_s9 }
   0xf   :  { %p2116_p8 = por %p2115_p7, %p2114_p6 }
  0x11   :  { %p2117_p9 = pnand %p2116_p8, %p2110_p5 }
  0x13   :  { %2120 = shalt.err (!%p2117_p9)  }
  0x14   :  { %s2216_s0 = smov [#allocation5]   ;;  %s21_s11 = sshll.u32 %s3036_s2, 4  ;;  %s22_s11 = int_to_ptr.vmem [resolvable:$true] %s21_s11 }
  0x15   :  { %20 = dma.vmem_to_smem %s18_s29, 32, %s2216_s0, [#allocation3] }
  0x16   :  { %s2121_s12 = scalar_lea.vmem %s22_s11, 16  ;;  %p2126_p11 = scmp.lt.s32.totalorder %s22_s11, %s22_s11 }
  0x17   :  { %p2122_p10 = scmp.ne.s32.totalorder %s22_s11, %s2121_s12  ;;  %p2127_p12 = scmp.lt.s32.totalorder %s2121_s12, %s2121_s12 }
  0x19   :  { %p2128_p13 = por %p2127_p12, %p2126_p11 }
  0x1b   :  { %p2129_p0 = pnand %p2128_p13, %p2122_p10 }
  0x1d   :  { %2132 = shalt.err (!%p2129_p0)  }
  0x1e   :  { %s2217_s13 = smov [#allocation6]  }
  0x1f   :  { %24 = dma.vmem_to_smem %s22_s11, 16, %s2217_s13, [#allocation3] }
  0x20   :  { %2185 = dma.done.wait [#allocation3], 80 }
  0x21   :  { %2186 = vsyncadd [#allocation3], 4294967216 }
  0x22   :  { %26 = sfence }
  0x23   :  { %27 = vsyncpa [#allocation8], 0 }
  0x24   :  { %29 = vsyncpa [#allocation8 + $0x1], 0  ;;  %s2269_s14 = smov 0   ;;  %s2271_s15 = smov 0  }
  0x25   :  { %s2273_s2 = smov 0   ;;  %s2275_s16 = smov 0  }
  0x26   :  { %s2277_s17 = smov 0   ;;  %s2279_s18 = smov 0  }
  0x27 LB: > { %s1614_s19 = sadd.s32 4294967295, %s2213_s18   ;;  %s1615_s20 = sadd.s32 4294967294, %s2213_s18   ;;  %s2213_s18 = sphi %s2279_s18, %s35_s18   ;;  %s2209_s17 = sphi %s2277_s17, %s3142_s17   ;;  %s2205_s16 = sphi %s2275_s16, %s3141_s16   ;;  %s2201_s2 = sphi %s2273_s2, %s3140_s2   ;;  %s2197_s15 = sphi %s2271_s15, %s3139_s15   ;;  %s2193_s14 = sphi %s2269_s14, %s3138_s14  }
  0x28   : > { %s47_s21 = sadd.s32 1, %s2209_s17  ;;  %s164_s22 = sadd.s32 1, %s2201_s2 }
  0x29   : > { %p49_p1 = scmp.ge.s32.totalorder %s47_s21, 2  ;;  %p174_p2 = scmp.ne.s32.totalorder %s2201_s2, %s2197_s15 }
  0x2a   : > { %p175_p3 = scmp.eq.s32.totalorder %s1614_s19, 1  ;;  %p180_p4 = scmp.ne.s32.totalorder %s2197_s15, %s2193_s14 }
  0x2b   : > { %s3144_s21 = smov (%p49_p1, %s47_s21), 0  ;;  %p181_p6 = scmp.eq.s32.totalorder %s1615_s20, 1 }
  0x2c   : > { %p2309_p5 = por %p175_p3, %p174_p2  ;;  %s161_s24 = ssub.s32 %s2209_s17, %s3144_s21 }
  0x2d   : > { %p1620_p7 = scmp.ge.s32.totalorder %s2213_s18, 1  ;;  %p162_p8 = scmp.eq.s32.totalorder %s161_s24, 0 }
  0x2e   : > { %p2316_p9 = por %p181_p6, %p180_p4  ;;  %p229_p10 = scmp.lt.s32.totalorder %s2213_s18, 3 }
  0x2f   : > { %s2322_s26 = scalar_select %p162_p8, %s2201_s2, %s164_s22  }
  0x30   : > { %p230_p11 = pnand %p1620_p7, %p229_p10 }
  0x32   : > { %233 = sbr.rel (%p230_p11) target bundleno = 531 (0x213), region = 32 }
  0x39   : > { %s3037_s27 = sand.u32 1, %s2197_s15   ;;  %s1622_s28 = sshll.u32 %s2205_s16, 7  ;;  %v2218_v0 = vmov 0.0  }
  0x3a   : > { %s2328_s29 = sshll.u32 %s3037_s27, 1  ;;  %s2332_s30 = sld [smem:[#allocation4 + %s1622_s28]]  ;;  %300 = vst [vmem:[#allocation2] sm:$0xff] %v2218_v0  ;;  %301 = vst [vmem:[#allocation2 + $0x8] sm:$0xff] %v2218_v0 }
  0x3b   : > { %302 = vst [vmem:[#allocation2 + $0x10] sm:$0xff] %v2218_v0  ;;  %303 = vst [vmem:[#allocation2 + $0x18] sm:$0xff] %v2218_v0  ;;  %s2335_s8 = sshll.u32 %s2205_s16, 5  ;;  %s332_s9 = sld [smem:[#allocation6 + %s2205_s16]] }
  0x3c   : > { %304 = vst [vmem:[#allocation2 + $0x20] sm:$0xff] %v2218_v0  ;;  %305 = vst [vmem:[#allocation2 + $0x28] sm:$0xff] %v2218_v0  ;;  %p290_p12 = scmp.lt.s32.totalorder %s2335_s8, 63  ;;  %s267_s24 = scalar_lea.vmem [#allocation7], %s2328_s29 }
  0x3d   : > { %306 = vst [vmem:[#allocation2 + $0x30] sm:$0xff] %v2218_v0  ;;  %307 = vst [vmem:[#allocation2 + $0x38] sm:$0xff] %v2218_v0 }
  0x3e   : > { %308 = vst [vmem:[#allocation2 + $0x40] sm:$0xff] %v2218_v0  ;;  %309 = vst [vmem:[#allocation2 + $0x48] sm:$0xff] %v2218_v0  ;;  %s291_s0 = scalar_select %p290_p12, %s2335_s8, 63 }
  0x3f   : > { %310 = vst [vmem:[#allocation2 + $0x50] sm:$0xff] %v2218_v0  ;;  %311 = vst [vmem:[#allocation2 + $0x58] sm:$0xff] %v2218_v0 }
  0x40   : > { %312 = vst [vmem:[#allocation2 + $0x60] sm:$0xff] %v2218_v0  ;;  %313 = vst [vmem:[#allocation2 + $0x68] sm:$0xff] %v2218_v0  ;;  %p276_p13 = scmp.lt.s32.totalorder %s2332_s30, 1  ;;  %s1626_s1 = sshll.u32 %s291_s0, 2 }
  0x41   : > { %314 = vst [vmem:[#allocation2 + $0x70] sm:$0xff] %v2218_v0  ;;  %315 = vst [vmem:[#allocation2 + $0x78] sm:$0xff] %v2218_v0  ;;  %s2344_s12 = scalar_lea.vmem %s3033_s6, %s1626_s1  ;;  %p1628_p0 = scmp.le.s32.totalorder %s332_s9, 0 }
  0x42   : > { %316 = vst [vmem:[#allocation2 + $0x80] sm:$0xff] %v2218_v0  ;;  %317 = vst [vmem:[#allocation2 + $0x88] sm:$0xff] %v2218_v0  ;;  %s3146_s30 = smov (!%p276_p13, %s2332_s30), 1  ;;  %s344_s0 = sld [smem:[#allocation5 + %s1622_s28]] (!%p1628_p0)  ;;  %v346_v51 = vld [vmem:[#allocation2] sm:$0xff] (!%p1628_p0)  ;;  %v347_v59 = vld [vmem:[#allocation2 + $0x8] sm:$0xff] (!%p1628_p0) }
  0x43   : > { %318 = vst [vmem:[#allocation2 + $0x90] sm:$0xff] %v2218_v0  ;;  %319 = vst [vmem:[#allocation2 + $0x98] sm:$0xff] %v2218_v0  ;;  %s1718_s13 = sshll.u32 %s3146_s30, 8  ;;  %336 = sbr.rel (%p1628_p0) target bundleno = 385 (0x181), region = 40 }
  0x44   : > { %320 = vst [vmem:[#allocation2 + $0xa0] sm:$0xff] %v2218_v0  ;;  %321 = vst [vmem:[#allocation2 + $0xa8] sm:$0xff] %v2218_v0  ;;  %s2350_s22 = scalar_lea.vmem %s3030_s3, %s1718_s13 }
  0x45   : > { %322 = vst [vmem:[#allocation2 + $0xb0] sm:$0xff] %v2218_v0  ;;  %323 = vst [vmem:[#allocation2 + $0xb8] sm:$0xff] %v2218_v0  ;;  %v2051_v1 = vld [vmem:[%s2350_s22 + $0x4] ss:$8 sps:$4 sm:$0xff] (!%p1628_p0)   ;;  %v2049_v19 = vld [vmem:[%s2350_s22] ss:$8 sps:$4 sm:$0xff] (!%p1628_p0)  }
  0x46   : > { %324 = vst [vmem:[#allocation2 + $0xc0] sm:$0xff] %v2218_v0  ;;  %325 = vst [vmem:[#allocation2 + $0xc8] sm:$0xff] %v2218_v0  ;;  %v2054_v2 = vld [vmem:[%s2350_s22 + $0x84] ss:$8 sps:$4 sm:$0xff] (!%p1628_p0)   ;;  %734 = vmatprep.mubr.bf16.mxu0 (!%p1628_p0), %v2051_v1  ;;  %v2052_v20 = vld [vmem:[%s2350_s22 + $0x80] ss:$8 sps:$4 sm:$0xff] (!%p1628_p0)  }
  0x47   : > { %326 = vst [vmem:[#allocation2 + $0xd0] sm:$0xff] %v2218_v0  ;;  %327 = vst [vmem:[#allocation2 + $0xd8] sm:$0xff] %v2218_v0  ;;  %798 = vmatprep.mubr.bf16.mxu1 (!%p1628_p0), %v2054_v2  ;;  %v2055_v21 = vld [vmem:[%s2350_s22 + $0x14] ss:$8 sps:$4 sm:$0xff] (!%p1628_p0)   ;;  %v2059_v23 = vld [vmem:[%s2350_s22 + $0x10] ss:$8 sps:$4 sm:$0xff] (!%p1628_p0)  }
  0x48   : > { %328 = vst [vmem:[#allocation2 + $0xe0] sm:$0xff] %v2218_v0  ;;  %329 = vst [vmem:[#allocation2 + $0xe8] sm:$0xff] %v2218_v0  ;;  %s1630_s1 = sshll.u32 (!%p1628_p0), %s344_s0, 8  ;;  %v2057_v22 = vld [vmem:[%s2350_s22 + $0x94] ss:$8 sps:$4 sm:$0xff] (!%p1628_p0)  }
  0x49   : > { %330 = vst [vmem:[#allocation2 + $0xf0] sm:$0xff] %v2218_v0  ;;  %331 = vst [vmem:[#allocation2 + $0xf8] sm:$0xff] %v2218_v0  ;;  %s410_s10 = sshra.s32 (!%p1628_p0), %s1630_s1, 3  ;;  %v2060_v24 = vld [vmem:[%s2350_s22 + $0x90] ss:$8 sps:$4 sm:$0xff] (!%p1628_p0)   ;;  %v362_v53 = vld [vmem:[#allocation2 + $0x80] sm:$0xff] (!%p1628_p0) }
  0x4a   : > { %s1631_s30 = sshll.u32 %s410_s10, 2  ;;  %v2061_v25 = vld [vmem:[%s2350_s22 + $0x24] ss:$8 sps:$4 sm:$0xff]   ;;  %v2065_v27 = vld [vmem:[%s2350_s22 + $0x20] ss:$8 sps:$4 sm:$0xff]  }
  0x4b   : > { %s2360_s13 = scalar_lea.vmem %s3031_s4, %s1631_s30  ;;  %v2063_v26 = vld [vmem:[%s2350_s22 + $0xa4] ss:$8 sps:$4 sm:$0xff]   ;;  %v2066_v28 = vld [vmem:[%s2350_s22 + $0xa0] ss:$8 sps:$4 sm:$0xff]   ;;  %v2067_v29 = vld [vmem:[%s2350_s22 + $0x34] ss:$8 sps:$4 sm:$0xff]  }
  0x4c   : > { %v2033_v3 = vld [vmem:[%s2360_s13 + $0x40] sm:$0xff]   ;;  %v2035_v5 = vld [vmem:[%s2360_s13 + $0x48] sm:$0xff]   ;;  %v2037_v7 = vld [vmem:[%s2360_s13 + $0x50] sm:$0xff]  }
  0x4d   : > { %v2034_v4 = vld [vmem:[%s2360_s13] sm:$0xff]   ;;  %1846 = vmatprep.subr.bf16.mxu0 %v2033_v3  ;;  %1958 = vmatprep.subr.bf16.mxu1 %v2033_v3  ;;  %v2036_v6 = vld [vmem:[%s2360_s13 + $0x8] sm:$0xff]   ;;  %v2038_v8 = vld [vmem:[%s2360_s13 + $0x10] sm:$0xff]  }
  0x4e   : > { %1847 = vmatpush3.bf16.msra.mxu0 %v2034_v4  ;;  %1966 = vmatpush3.bf16.msra.mxu1 %v2034_v4  ;;  %v2039_v9 = vld [vmem:[%s2360_s13 + $0x58] sm:$0xff]   ;;  %v2041_v11 = vld [vmem:[%s2360_s13 + $0x60] sm:$0xff]   ;;  %v2043_v13 = vld [vmem:[%s2360_s13 + $0x68] sm:$0xff]  }
  0x4f   : > { %1848 = vmatprep.subr.bf16.mxu0 %v2035_v5  ;;  %1959 = vmatprep.subr.bf16.mxu1 %v2035_v5  ;;  %v2040_v10 = vld [vmem:[%s2360_s13 + $0x18] sm:$0xff]   ;;  %v2042_v12 = vld [vmem:[%s2360_s13 + $0x20] sm:$0xff]   ;;  %v2044_v14 = vld [vmem:[%s2360_s13 + $0x28] sm:$0xff]  }
  0x50   : > { %v2045_v15 = vld [vmem:[%s2360_s13 + $0x70] sm:$0xff]   ;;  %v2047_v17 = vld [vmem:[%s2360_s13 + $0x78] sm:$0xff]   ;;  %v2073_v33 = vld [vmem:[%s2350_s22 + $0x44] ss:$8 sps:$4 sm:$0xff]  }
  0x51   : > { %v2046_v16 = vld [vmem:[%s2360_s13 + $0x30] sm:$0xff]   ;;  %v2048_v18 = vld [vmem:[%s2360_s13 + $0x38] sm:$0xff]   ;;  %v2075_v34 = vld [vmem:[%s2350_s22 + $0xc4] ss:$8 sps:$4 sm:$0xff]  }
  0x52   : > { %1849 = vmatpush3.bf16.msra.mxu0 %v2036_v6  ;;  %1967 = vmatpush3.bf16.msra.mxu1 %v2036_v6  ;;  %v2069_v30 = vld [vmem:[%s2350_s22 + $0xb4] ss:$8 sps:$4 sm:$0xff]   ;;  %v2071_v31 = vld [vmem:[%s2350_s22 + $0x30] ss:$8 sps:$4 sm:$0xff]   ;;  %v2077_v35 = vld [vmem:[%s2350_s22 + $0x40] ss:$8 sps:$4 sm:$0xff]  }
  0x53   : > { %1850 = vmatprep.subr.bf16.mxu0 %v2037_v7  ;;  %1960 = vmatprep.subr.bf16.mxu1 %v2037_v7  ;;  %v2072_v32 = vld [vmem:[%s2350_s22 + $0xb0] ss:$8 sps:$4 sm:$0xff]   ;;  %v2078_v36 = vld [vmem:[%s2350_s22 + $0xc0] ss:$8 sps:$4 sm:$0xff]   ;;  %v2079_v37 = vld [vmem:[%s2350_s22 + $0x54] ss:$8 sps:$4 sm:$0xff]  }
  0x54   : > { %v2081_v38 = vld [vmem:[%s2350_s22 + $0xd4] ss:$8 sps:$4 sm:$0xff]   ;;  %v2083_v39 = vld [vmem:[%s2350_s22 + $0x50] ss:$8 sps:$4 sm:$0xff]   ;;  %v2085_v41 = vld [vmem:[%s2350_s22 + $0x64] ss:$8 sps:$4 sm:$0xff]  }
  0x55   : > { %v2084_v40 = vld [vmem:[%s2350_s22 + $0xd0] ss:$8 sps:$4 sm:$0xff]   ;;  %v2087_v42 = vld [vmem:[%s2350_s22 + $0xe4] ss:$8 sps:$4 sm:$0xff]   ;;  %v2089_v43 = vld [vmem:[%s2350_s22 + $0x60] ss:$8 sps:$4 sm:$0xff]  }
  0x56   : > { %1851 = vmatpush3.bf16.msra.mxu0 %v2038_v8  ;;  %1968 = vmatpush3.bf16.msra.mxu1 %v2038_v8  ;;  %v2090_v44 = vld [vmem:[%s2350_s22 + $0xe0] ss:$8 sps:$4 sm:$0xff]   ;;  %v2091_v45 = vld [vmem:[%s2350_s22 + $0x74] ss:$8 sps:$4 sm:$0xff]   ;;  %v2095_v47 = vld [vmem:[%s2350_s22 + $0x70] ss:$8 sps:$4 sm:$0xff]  }
  0x57   : > { %1852 = vmatprep.subr.bf16.mxu0 %v2039_v9  ;;  %1961 = vmatprep.subr.bf16.mxu1 %v2039_v9  ;;  %v2093_v46 = vld [vmem:[%s2350_s22 + $0xf4] ss:$8 sps:$4 sm:$0xff]   ;;  %v2096_v48 = vld [vmem:[%s2350_s22 + $0xf0] ss:$8 sps:$4 sm:$0xff]   ;;  %v363_v61 = vld [vmem:[#allocation2 + $0x88] sm:$0xff] }
  0x58   : > { %v348_v7 = vld [vmem:[#allocation2 + $0x10] sm:$0xff] }
  0x59   : > { %v364_v9 = vld [vmem:[#allocation2 + $0x90] sm:$0xff] }
  0x5a   : > { %1853 = vmatpush3.bf16.msra.mxu0 %v2040_v10  ;;  %1969 = vmatpush3.bf16.msra.mxu1 %v2040_v10 }
  0x5b   : > { %1854 = vmatprep.subr.bf16.mxu0 %v2041_v11  ;;  %1962 = vmatprep.subr.bf16.mxu1 %v2041_v11 }
  0x5e   : > { %1855 = vmatpush3.bf16.msra.mxu0 %v2042_v12  ;;  %1970 = vmatpush3.bf16.msra.mxu1 %v2042_v12 }
  0x5f   : > { %1856 = vmatprep.subr.bf16.mxu0 %v2043_v13  ;;  %1963 = vmatprep.subr.bf16.mxu1 %v2043_v13 }
  0x62   : > { %1857 = vmatpush3.bf16.msra.mxu0 %v2044_v14  ;;  %1971 = vmatpush3.bf16.msra.mxu1 %v2044_v14 }
  0x63   : > { %1858 = vmatprep.subr.bf16.mxu0 %v2045_v15  ;;  %1964 = vmatprep.subr.bf16.mxu1 %v2045_v15  ;;  %v349_v15 = vld [vmem:[#allocation2 + $0x18] sm:$0xff] }
  0x66   : > { %1859 = vmatpush3.bf16.msra.mxu0 %v2046_v16  ;;  %1972 = vmatpush3.bf16.msra.mxu1 %v2046_v16 }
  0x67   : > { %1860 = vmatprep.subr.bf16.mxu0 %v2047_v17  ;;  %1965 = vmatprep.subr.bf16.mxu1 %v2047_v17  ;;  %v365_v17 = vld [vmem:[#allocation2 + $0x98] sm:$0xff] }
  0x6a   : > { %1861 = vmatpush3.bf16.msra.mxu0 %v2048_v18  ;;  %1973 = vmatpush3.bf16.msra.mxu1 %v2048_v18 }
  0x6d   : > { %735 = vmatmul.mubr.bf16.vlgmr.msra.gmra.mrb[0].mxu0 %v2049_v19  ;;  %799 = vmatmul.mubr.bf16.vlgmr.msra.gmra.mrb[0].mxu1 %v2052_v20 }
  0x6e   : > { %742 = vmatprep.mubr.bf16.mxu0 %v2055_v21  ;;  %806 = vmatprep.mubr.bf16.mxu1 %v2057_v22 }
  0x75   : > { %743 = vmatmul.mubr.bf16.gmra.mrb[4].mxu0 %v2059_v23  ;;  %807 = vmatmul.mubr.bf16.gmra.mrb[4].mxu1 %v2060_v24 }
  0x76   : > { %750 = vmatprep.mubr.bf16.mxu0 %v2061_v25  ;;  %814 = vmatprep.mubr.bf16.mxu1 %v2063_v26 }
  0x7d   : > { %751 = vmatmul.mubr.bf16.gmra.mrb[8].mxu0 %v2065_v27  ;;  %815 = vmatmul.mubr.bf16.gmra.mrb[8].mxu1 %v2066_v28  ;;  %v350_v27 = vld [vmem:[#allocation2 + $0x20] sm:$0xff] }
  0x7e   : > { %758 = vmatprep.mubr.bf16.mxu0 %v2067_v29  ;;  %822 = vmatprep.mubr.bf16.mxu1 %v2069_v30  ;;  %v366_v29 = vld [vmem:[#allocation2 + $0xa0] sm:$0xff] }
  0x85   : > { %759 = vmatmul.mubr.bf16.gmra.mrb[12].mxu0 %v2071_v31  ;;  %823 = vmatmul.mubr.bf16.gmra.mrb[12].mxu1 %v2072_v32 }
  0x86   : > { %766 = vmatprep.mubr.bf16.mxu0 %v2073_v33  ;;  %830 = vmatprep.mubr.bf16.mxu1 %v2075_v34 }
  0x8d   : > { %767 = vmatmul.mubr.bf16.gmra.mrb[16].mxu0 %v2077_v35  ;;  %831 = vmatmul.mubr.bf16.gmra.mrb[16].mxu1 %v2078_v36  ;;  %v351_v35 = vld [vmem:[#allocation2 + $0x28] sm:$0xff] }
  0x8e   : > { %774 = vmatprep.mubr.bf16.mxu0 %v2079_v37  ;;  %838 = vmatprep.mubr.bf16.mxu1 %v2081_v38  ;;  %v367_v37 = vld [vmem:[#allocation2 + $0xa8] sm:$0xff] }
  0x95   : > { %775 = vmatmul.mubr.bf16.gmra.mrb[20].mxu0 %v2083_v39  ;;  %839 = vmatmul.mubr.bf16.gmra.mrb[20].mxu1 %v2084_v40 }
  0x96   : > { %782 = vmatprep.mubr.bf16.mxu0 %v2085_v41  ;;  %846 = vmatprep.mubr.bf16.mxu1 %v2087_v42 }
  0x9d   : > { %783 = vmatmul.mubr.bf16.gmra.mrb[24].mxu0 %v2089_v43  ;;  %847 = vmatmul.mubr.bf16.gmra.mrb[24].mxu1 %v2090_v44 }
  0x9e   : > { %790 = vmatprep.mubr.bf16.mxu0 %v2091_v45  ;;  %854 = vmatprep.mubr.bf16.mxu1 %v2093_v46 }
  0xa5   : > { %791 = vmatmul.mubr.bf16.gmra.mrb[28].mxu0 %v2095_v47  ;;  %855 = vmatmul.mubr.bf16.gmra.mrb[28].mxu1 %v2096_v48  ;;  %v352_v47 = vld [vmem:[#allocation2 + $0x30] sm:$0xff] }
 0x140   : > { %v1862_v49 = vpop.f32.mrb[0].mxu0  ;;  %v1910_v50 = vpop.f32.mrb[0].mxu1 }
 0x141   : > { %v1863_v52 = vpop.f32.mrb[1].mxu0  ;;  %v1911_v54 = vpop.f32.mrb[1].mxu1 }
 0x142   : > { %v1864_v55 = vadd.f32 %v1863_v52, %v1862_v49  ;;  %v1912_v56 = vadd.f32 %v1911_v54, %v1910_v50  ;;  %v1865_v57 = vpop.f32.mrb[2].mxu0  ;;  %v1913_v58 = vpop.f32.mrb[2].mxu1  ;;  %v368_v49 = vld [vmem:[#allocation2 + $0xb0] sm:$0xff] }
 0x143   : > { %v1866_v60 = vpop.f32.mrb[3].mxu0  ;;  %v1914_v62 = vpop.f32.mrb[3].mxu1 }
 0x144   : > { %v863_v63 = vadd.f32 %v1864_v55, %v346_v51  ;;  %v879_v0 = vadd.f32 %v1912_v56, %v362_v53  ;;  %v1867_v1 = vadd.f32 %v1866_v60, %v1865_v57  ;;  %v1915_v2 = vadd.f32 %v1914_v62, %v1913_v58  ;;  %v353_v55 = vld [vmem:[#allocation2 + $0x38] sm:$0xff] }
 0x145   : > { %v369_v57 = vld [vmem:[#allocation2 + $0xb8] sm:$0xff] }
 0x146   : > { %895 = vst [vmem:[#allocation2] sm:$0xff] %v863_v63  ;;  %911 = vst [vmem:[#allocation2 + $0x80] sm:$0xff] %v879_v0  ;;  %v864_v3 = vadd.f32 %v1867_v1, %v347_v59  ;;  %v880_v4 = vadd.f32 %v1915_v2, %v363_v61 }
 0x148   : > { %896 = vst [vmem:[#allocation2 + $0x8] sm:$0xff] %v864_v3  ;;  %912 = vst [vmem:[#allocation2 + $0x88] sm:$0xff] %v880_v4  ;;  %v1868_v5 = vpop.f32.mrb[4].mxu0  ;;  %v1916_v6 = vpop.f32.mrb[4].mxu1  ;;  %v354_v3 = vld [vmem:[#allocation2 + $0x40] sm:$0xff] }
 0x149   : > { %v1869_v8 = vpop.f32.mrb[5].mxu0  ;;  %v1917_v10 = vpop.f32.mrb[5].mxu1 }
 0x14a   : > { %v1870_v11 = vadd.f32 %v1869_v8, %v1868_v5  ;;  %v1918_v12 = vadd.f32 %v1917_v10, %v1916_v6  ;;  %v1871_v13 = vpop.f32.mrb[6].mxu0  ;;  %v1919_v14 = vpop.f32.mrb[6].mxu1  ;;  %v370_v5 = vld [vmem:[#allocation2 + $0xc0] sm:$0xff] }
 0x14b   : > { %v1872_v16 = vpop.f32.mrb[7].mxu0  ;;  %v1920_v18 = vpop.f32.mrb[7].mxu1 }
 0x14c   : > { %v865_v19 = vadd.f32 %v1870_v11, %v348_v7  ;;  %v881_v20 = vadd.f32 %v1918_v12, %v364_v9  ;;  %v1873_v21 = vadd.f32 %v1872_v16, %v1871_v13  ;;  %v1921_v22 = vadd.f32 %v1920_v18, %v1919_v14  ;;  %v355_v11 = vld [vmem:[#allocation2 + $0x48] sm:$0xff] }
 0x14d   : > { %v371_v13 = vld [vmem:[#allocation2 + $0xc8] sm:$0xff] }
 0x14e   : > { %897 = vst [vmem:[#allocation2 + $0x10] sm:$0xff] %v865_v19  ;;  %913 = vst [vmem:[#allocation2 + $0x90] sm:$0xff] %v881_v20  ;;  %v866_v23 = vadd.f32 %v1873_v21, %v349_v15  ;;  %v882_v24 = vadd.f32 %v1921_v22, %v365_v17 }
 0x150   : > { %898 = vst [vmem:[#allocation2 + $0x18] sm:$0xff] %v866_v23  ;;  %914 = vst [vmem:[#allocation2 + $0x98] sm:$0xff] %v882_v24  ;;  %v1874_v25 = vpop.f32.mrb[8].mxu0  ;;  %v1922_v26 = vpop.f32.mrb[8].mxu1  ;;  %v356_v23 = vld [vmem:[#allocation2 + $0x50] sm:$0xff] }
 0x151   : > { %v1875_v28 = vpop.f32.mrb[9].mxu0  ;;  %v1923_v30 = vpop.f32.mrb[9].mxu1 }
 0x152   : > { %v1876_v31 = vadd.f32 %v1875_v28, %v1874_v25  ;;  %v1924_v32 = vadd.f32 %v1923_v30, %v1922_v26  ;;  %v1877_v33 = vpop.f32.mrb[10].mxu0  ;;  %v1925_v34 = vpop.f32.mrb[10].mxu1  ;;  %v372_v25 = vld [vmem:[#allocation2 + $0xd0] sm:$0xff] }
 0x153   : > { %v1878_v36 = vpop.f32.mrb[11].mxu0  ;;  %v1926_v38 = vpop.f32.mrb[11].mxu1 }
 0x154   : > { %v867_v39 = vadd.f32 %v1876_v31, %v350_v27  ;;  %v883_v40 = vadd.f32 %v1924_v32, %v366_v29  ;;  %v1879_v41 = vadd.f32 %v1878_v36, %v1877_v33  ;;  %v1927_v42 = vadd.f32 %v1926_v38, %v1925_v34  ;;  %v357_v31 = vld [vmem:[#allocation2 + $0x58] sm:$0xff] }
 0x155   : > { %v373_v33 = vld [vmem:[#allocation2 + $0xd8] sm:$0xff] }
 0x156   : > { %899 = vst [vmem:[#allocation2 + $0x20] sm:$0xff] %v867_v39  ;;  %915 = vst [vmem:[#allocation2 + $0xa0] sm:$0xff] %v883_v40  ;;  %v868_v43 = vadd.f32 %v1879_v41, %v351_v35  ;;  %v884_v44 = vadd.f32 %v1927_v42, %v367_v37 }
 0x158   : > { %900 = vst [vmem:[#allocation2 + $0x28] sm:$0xff] %v868_v43  ;;  %916 = vst [vmem:[#allocation2 + $0xa8] sm:$0xff] %v884_v44  ;;  %v1880_v45 = vpop.f32.mrb[12].mxu0  ;;  %v1928_v46 = vpop.f32.mrb[12].mxu1  ;;  %v358_v43 = vld [vmem:[#allocation2 + $0x60] sm:$0xff] }
 0x159   : > { %v1881_v48 = vpop.f32.mrb[13].mxu0  ;;  %v1929_v50 = vpop.f32.mrb[13].mxu1 }
 0x15a   : > { %v1882_v51 = vadd.f32 %v1881_v48, %v1880_v45  ;;  %v1930_v52 = vadd.f32 %v1929_v50, %v1928_v46  ;;  %v1883_v53 = vpop.f32.mrb[14].mxu0  ;;  %v1931_v54 = vpop.f32.mrb[14].mxu1  ;;  %v374_v45 = vld [vmem:[#allocation2 + $0xe0] sm:$0xff] }
 0x15b   : > { %v1884_v56 = vpop.f32.mrb[15].mxu0  ;;  %v1932_v58 = vpop.f32.mrb[15].mxu1 }
 0x15c   : > { %v869_v59 = vadd.f32 %v1882_v51, %v352_v47  ;;  %v885_v60 = vadd.f32 %v1930_v52, %v368_v49  ;;  %v1885_v61 = vadd.f32 %v1884_v56, %v1883_v53  ;;  %v1933_v62 = vadd.f32 %v1932_v58, %v1931_v54  ;;  %v359_v51 = vld [vmem:[#allocation2 + $0x68] sm:$0xff] }
 0x15d   : > { %v375_v53 = vld [vmem:[#allocation2 + $0xe8] sm:$0xff] }
 0x15e   : > { %901 = vst [vmem:[#allocation2 + $0x30] sm:$0xff] %v869_v59  ;;  %917 = vst [vmem:[#allocation2 + $0xb0] sm:$0xff] %v885_v60  ;;  %v870_v63 = vadd.f32 %v1885_v61, %v353_v55  ;;  %v886_v0 = vadd.f32 %v1933_v62, %v369_v57 }
 0x160   : > { %902 = vst [vmem:[#allocation2 + $0x38] sm:$0xff] %v870_v63  ;;  %918 = vst [vmem:[#allocation2 + $0xb8] sm:$0xff] %v886_v0  ;;  %v1886_v1 = vpop.f32.mrb[16].mxu0  ;;  %v1934_v2 = vpop.f32.mrb[16].mxu1  ;;  %v360_v63 = vld [vmem:[#allocation2 + $0x70] sm:$0xff] }
 0x161   : > { %v1887_v4 = vpop.f32.mrb[17].mxu0  ;;  %v1935_v6 = vpop.f32.mrb[17].mxu1 }
 0x162   : > { %v1888_v7 = vadd.f32 %v1887_v4, %v1886_v1  ;;  %v1936_v8 = vadd.f32 %v1935_v6, %v1934_v2  ;;  %v1889_v9 = vpop.f32.mrb[18].mxu0  ;;  %v1937_v10 = vpop.f32.mrb[18].mxu1  ;;  %v376_v1 = vld [vmem:[#allocation2 + $0xf0] sm:$0xff] }
 0x163   : > { %v1890_v12 = vpop.f32.mrb[19].mxu0  ;;  %v1938_v14 = vpop.f32.mrb[19].mxu1 }
 0x164   : > { %v871_v15 = vadd.f32 %v1888_v7, %v354_v3  ;;  %v887_v16 = vadd.f32 %v1936_v8, %v370_v5  ;;  %v1891_v17 = vadd.f32 %v1890_v12, %v1889_v9  ;;  %v1939_v18 = vadd.f32 %v1938_v14, %v1937_v10  ;;  %v361_v7 = vld [vmem:[#allocation2 + $0x78] sm:$0xff] }
 0x165   : > { %v377_v9 = vld [vmem:[#allocation2 + $0xf8] sm:$0xff] }
 0x166   : > { %903 = vst [vmem:[#allocation2 + $0x40] sm:$0xff] %v871_v15  ;;  %919 = vst [vmem:[#allocation2 + $0xc0] sm:$0xff] %v887_v16  ;;  %v872_v19 = vadd.f32 %v1891_v17, %v355_v11  ;;  %v888_v20 = vadd.f32 %v1939_v18, %v371_v13 }
 0x168   : > { %904 = vst [vmem:[#allocation2 + $0x48] sm:$0xff] %v872_v19  ;;  %920 = vst [vmem:[#allocation2 + $0xc8] sm:$0xff] %v888_v20  ;;  %v1892_v21 = vpop.f32.mrb[20].mxu0  ;;  %v1940_v22 = vpop.f32.mrb[20].mxu1 }
 0x169   : > { %v1893_v24 = vpop.f32.mrb[21].mxu0  ;;  %v1941_v26 = vpop.f32.mrb[21].mxu1 }
 0x16a   : > { %v1894_v27 = vadd.f32 %v1893_v24, %v1892_v21  ;;  %v1942_v28 = vadd.f32 %v1941_v26, %v1940_v22  ;;  %v1895_v29 = vpop.f32.mrb[22].mxu0  ;;  %v1943_v30 = vpop.f32.mrb[22].mxu1 }
 0x16b   : > { %v1896_v32 = vpop.f32.mrb[23].mxu0  ;;  %v1944_v34 = vpop.f32.mrb[23].mxu1 }
 0x16c   : > { %v873_v35 = vadd.f32 %v1894_v27, %v356_v23  ;;  %v889_v36 = vadd.f32 %v1942_v28, %v372_v25  ;;  %v1897_v37 = vadd.f32 %v1896_v32, %v1895_v29  ;;  %v1945_v38 = vadd.f32 %v1944_v34, %v1943_v30 }
 0x16e   : > { %905 = vst [vmem:[#allocation2 + $0x50] sm:$0xff] %v873_v35  ;;  %921 = vst [vmem:[#allocation2 + $0xd0] sm:$0xff] %v889_v36  ;;  %v874_v39 = vadd.f32 %v1897_v37, %v357_v31  ;;  %v890_v40 = vadd.f32 %v1945_v38, %v373_v33 }
 0x170   : > { %906 = vst [vmem:[#allocation2 + $0x58] sm:$0xff] %v874_v39  ;;  %922 = vst [vmem:[#allocation2 + $0xd8] sm:$0xff] %v890_v40  ;;  %v1898_v41 = vpop.f32.mrb[24].mxu0  ;;  %v1946_v42 = vpop.f32.mrb[24].mxu1 }
 0x171   : > { %v1899_v44 = vpop.f32.mrb[25].mxu0  ;;  %v1947_v46 = vpop.f32.mrb[25].mxu1 }
 0x172   : > { %v1900_v47 = vadd.f32 %v1899_v44, %v1898_v41  ;;  %v1948_v48 = vadd.f32 %v1947_v46, %v1946_v42  ;;  %v1901_v49 = vpop.f32.mrb[26].mxu0  ;;  %v1949_v50 = vpop.f32.mrb[26].mxu1 }
 0x173   : > { %v1902_v52 = vpop.f32.mrb[27].mxu0  ;;  %v1950_v54 = vpop.f32.mrb[27].mxu1 }
 0x174   : > { %v875_v55 = vadd.f32 %v1900_v47, %v358_v43  ;;  %v891_v56 = vadd.f32 %v1948_v48, %v374_v45  ;;  %v1903_v57 = vadd.f32 %v1902_v52, %v1901_v49  ;;  %v1951_v58 = vadd.f32 %v1950_v54, %v1949_v50 }
 0x176   : > { %907 = vst [vmem:[#allocation2 + $0x60] sm:$0xff] %v875_v55  ;;  %923 = vst [vmem:[#allocation2 + $0xe0] sm:$0xff] %v891_v56  ;;  %v876_v59 = vadd.f32 %v1903_v57, %v359_v51  ;;  %v892_v60 = vadd.f32 %v1951_v58, %v375_v53 }
 0x178   : > { %908 = vst [vmem:[#allocation2 + $0x68] sm:$0xff] %v876_v59  ;;  %924 = vst [vmem:[#allocation2 + $0xe8] sm:$0xff] %v892_v60  ;;  %v1904_v61 = vpop.f32.mrb[28].mxu0  ;;  %v1952_v62 = vpop.f32.mrb[28].mxu1 }
 0x179   : > { %v1905_v0 = vpop.f32.mrb[29].mxu0  ;;  %v1953_v2 = vpop.f32.mrb[29].mxu1 }
 0x17a   : > { %v1906_v3 = vadd.f32 %v1905_v0, %v1904_v61  ;;  %v1954_v4 = vadd.f32 %v1953_v2, %v1952_v62  ;;  %v1907_v5 = vpop.f32.mrb[30].mxu0  ;;  %v1955_v6 = vpop.f32.mrb[30].mxu1 }
 0x17b   : > { %v1908_v8 = vpop.f32.mrb[31].mxu0  ;;  %v1956_v10 = vpop.f32.mrb[31].mxu1 }
 0x17c   : > { %v877_v11 = vadd.f32 %v1906_v3, %v360_v63  ;;  %v893_v12 = vadd.f32 %v1954_v4, %v376_v1  ;;  %v1909_v13 = vadd.f32 %v1908_v8, %v1907_v5  ;;  %v1957_v14 = vadd.f32 %v1956_v10, %v1955_v6 }
 0x17e   : > { %909 = vst [vmem:[#allocation2 + $0x70] sm:$0xff] %v877_v11  ;;  %925 = vst [vmem:[#allocation2 + $0xf0] sm:$0xff] %v893_v12  ;;  %v878_v15 = vadd.f32 %v1909_v13, %v361_v7  ;;  %v894_v16 = vadd.f32 %v1957_v14, %v377_v9 }
 0x180   : > { %910 = vst [vmem:[#allocation2 + $0x78] sm:$0xff] %v878_v15  ;;  %926 = vst [vmem:[#allocation2 + $0xf8] sm:$0xff] %v894_v16 }
 0x181 PF: > { %v931_v17 = vlaneseq  ;;  %s1680_s27 = sshll.u32 %s2205_s16, 8  ;;  %v997_v1 = vld [vmem:[#allocation2] sm:$0xff]  ;;  %v998_v2 = vld [vmem:[#allocation2 + $0x8] sm:$0xff]  ;;  %v999_v7 = vld [vmem:[#allocation2 + $0x10] sm:$0xff]  ;;  %s1520_s9 = sshll.u32 %s267_s24, 4  ;;  %s2980_s9 = int_to_ptr.vmem [resolvable:$true] %s1520_s9 }
 0x182   : > { %v2409_v20 = vstv %s1680_s27  ;;  %v1000_v8 = vld [vmem:[#allocation2 + $0x18] sm:$0xff]  ;;  %v1001_v9 = vld [vmem:[#allocation2 + $0x20] sm:$0xff]  ;;  %v1002_v10 = vld [vmem:[#allocation2 + $0x28] sm:$0xff]  ;;  %s2978_s20 = scalar_lea.hbm %s3034_s7, %s2335_s8  ;;  %s3137_s22 = sand.u32 1, %s2197_s15  }
 0x183   : > { %v932_v18 = vshrl.u32 %v931_v17, 7  ;;  %v1003_v15 = vld [vmem:[#allocation2 + $0x30] sm:$0xff]  ;;  %v1004_v16 = vld [vmem:[#allocation2 + $0x38] sm:$0xff]  ;;  %v1005_v17 = vld [vmem:[#allocation2 + $0x40] sm:$0xff]  ;;  %s1503_s0 = scalar_lea.sflag [#allocation8], %s3137_s22  ;;  %s2133_s1 = scalar_lea.vmem %s2980_s9, 32 }
 0x184   : > { %p2134_p1 = scmp.ne.s32.totalorder %s2980_s9, %s2133_s1  ;;  %s2219_s10 = smov [#allocation7]  }
 0x185   : > { %v933_v19 = vadd.s32 8, %v932_v18  ;;  %v934_v21 = vadd.s32 16, %v932_v18  ;;  %v935_v22 = vadd.s32 24, %v932_v18  ;;  %v936_v23 = vadd.s32 32, %v932_v18  ;;  %s2137_s30 = sshll.u32 %s2219_s10, 4  ;;  %s2138_s30 = int_to_ptr.vmem [resolvable:$false] %s2137_s30 }
 0x186   : > { %v937_v24 = vadd.s32 40, %v932_v18  ;;  %v938_v25 = vadd.s32 48, %v932_v18  ;;  %v939_v26 = vadd.s32 56, %v932_v18  ;;  %v940_v27 = vadd.s32 64, %v932_v18  ;;  %p2135_p2 = pnand %p2134_p1, %p2309_p5  ;;  %s2139_s8 = scalar_lea.vmem %s2138_s30, 64 }
 0x187   : > { %v941_v28 = vadd.s32 72, %v932_v18  ;;  %v942_v29 = vadd.s32 80, %v932_v18  ;;  %v943_v30 = vadd.s32 88, %v932_v18  ;;  %v944_v31 = vadd.s32 96, %v932_v18  ;;  %p2140_p4 = scmp.lt.s32.totalorder %s2980_s9, %s2138_s30  ;;  %p2141_p6 = scmp.lt.s32.totalorder %s2139_s8, %s2133_s1 }
 0x188   : > { %v945_v32 = vadd.s32 104, %v932_v18  ;;  %v946_v33 = vadd.s32 112, %v932_v18  ;;  %v947_v34 = vadd.s32 120, %v932_v18  ;;  %v948_v35 = vadd.s32 128, %v932_v18  ;;  %p2136_p3 = pneg %p2135_p2 }
 0x189   : > { %v949_v36 = vadd.s32 136, %v932_v18  ;;  %v950_v37 = vadd.s32 144, %v932_v18  ;;  %v951_v38 = vadd.s32 152, %v932_v18  ;;  %v952_v39 = vadd.s32 160, %v932_v18  ;;  %p2142_p7 = por %p2141_p6, %p2140_p4 }
 0x18a   : > { %v953_v40 = vadd.s32 168, %v932_v18  ;;  %v954_v41 = vadd.s32 176, %v932_v18  ;;  %v955_v42 = vadd.s32 184, %v932_v18  ;;  %v956_v43 = vadd.s32 192, %v932_v18 }
 0x18b   : > { %v957_v44 = vadd.s32 200, %v932_v18  ;;  %v958_v45 = vadd.s32 208, %v932_v18  ;;  %v959_v46 = vadd.s32 216, %v932_v18  ;;  %v960_v47 = vadd.s32 224, %v932_v18  ;;  %p2143_p8 = pnand %p2142_p7, %p2136_p3 }
 0x18c   : > { %v961_v48 = vadd.s32 232, %v932_v18  ;;  %v962_v49 = vadd.s32 240, %v932_v18  ;;  %v963_v50 = vadd.s32 248, %v932_v18  ;;  %v2412_v51 = vadd.s32 %v2409_v20, %v932_v18  ;;  %v2480_v18 = vld [vmem:[%s3032_s5] ss:$0 sm:$0xff] }
 0x18d   : > { %v2415_v52 = vadd.s32 %v2409_v20, %v933_v19  ;;  %v2418_v53 = vadd.s32 %v2409_v20, %v934_v21  ;;  %v2421_v54 = vadd.s32 %v2409_v20, %v935_v22  ;;  %v2424_v55 = vadd.s32 %v2409_v20, %v936_v23 }
 0x18e   : > { %v2427_v56 = vadd.s32 %v2409_v20, %v937_v24  ;;  %v2430_v57 = vadd.s32 %v2409_v20, %v938_v25  ;;  %v2433_v58 = vadd.s32 %v2409_v20, %v939_v26  ;;  %v2436_v59 = vadd.s32 %v2409_v20, %v940_v27  ;;  %v1006_v24 = vld [vmem:[#allocation2 + $0x48] sm:$0xff]  ;;  %v1007_v25 = vld [vmem:[#allocation2 + $0x50] sm:$0xff]  ;;  %v1008_v26 = vld [vmem:[#allocation2 + $0x58] sm:$0xff] }
 0x18f   : > { %v2439_v60 = vadd.s32 %v2409_v20, %v941_v28  ;;  %v2442_v61 = vadd.s32 %v2409_v20, %v942_v29  ;;  %v2445_v62 = vadd.s32 %v2409_v20, %v943_v30  ;;  %v2448_v63 = vadd.s32 %v2409_v20, %v944_v31  ;;  %v1009_v31 = vld [vmem:[#allocation2 + $0x60] sm:$0xff] }
 0x190   : > { %v2451_v0 = vadd.s32 %v2409_v20, %v945_v32  ;;  %v2454_v3 = vadd.s32 %v2409_v20, %v946_v33  ;;  %v2457_v4 = vadd.s32 %v2409_v20, %v947_v34  ;;  %v2460_v5 = vadd.s32 %v2409_v20, %v948_v35  ;;  %v1010_v32 = vld [vmem:[#allocation2 + $0x68] sm:$0xff]  ;;  %v1011_v33 = vld [vmem:[#allocation2 + $0x70] sm:$0xff] }
 0x191   : > { %v2463_v6 = vadd.s32 %v2409_v20, %v949_v36  ;;  %v2466_v11 = vadd.s32 %v2409_v20, %v950_v37  ;;  %v2469_v12 = vadd.s32 %v2409_v20, %v951_v38  ;;  %v2472_v13 = vadd.s32 %v2409_v20, %v952_v39  ;;  %v1012_v36 = vld [vmem:[#allocation2 + $0x78] sm:$0xff]  ;;  %v1013_v37 = vld [vmem:[#allocation2 + $0x80] sm:$0xff]  ;;  %v1014_v38 = vld [vmem:[#allocation2 + $0x88] sm:$0xff] }
 0x192   : > { %v2475_v14 = vadd.s32 %v2409_v20, %v953_v40  ;;  %v2483_v19 = vadd.s32 %v2409_v20, %v954_v41  ;;  %v2486_v21 = vadd.s32 %v2409_v20, %v955_v42  ;;  %v2489_v22 = vadd.s32 %v2409_v20, %v956_v43  ;;  %v1015_v41 = vld [vmem:[#allocation2 + $0x90] sm:$0xff]  ;;  %v1016_v42 = vld [vmem:[#allocation2 + $0x98] sm:$0xff]  ;;  %v1017_v43 = vld [vmem:[#allocation2 + $0xa0] sm:$0xff] }
 0x193   : > { %v2492_v23 = vadd.s32 %v2409_v20, %v957_v44  ;;  %v2495_v27 = vadd.s32 %v2409_v20, %v958_v45  ;;  %v2498_v28 = vadd.s32 %v2409_v20, %v959_v46  ;;  %v2501_v29 = vadd.s32 %v2409_v20, %v960_v47  ;;  %v1018_v47 = vld [vmem:[#allocation2 + $0xa8] sm:$0xff] }
 0x194   : > { %3055 = vst [vmem:[#allocation11_spill] sm:$0xff] %v2475_v14  ;;  %3056 = vst [vmem:[#allocation12_spill] sm:$0xff] %v2483_v19  ;;  %v2504_v30 = vadd.s32 %v2409_v20, %v961_v48  ;;  %v2507_v34 = vadd.s32 %v2409_v20, %v962_v49  ;;  %v2510_v35 = vadd.s32 %v2409_v20, %v963_v50  ;;  %v1019_v48 = vld [vmem:[#allocation2 + $0xb0] sm:$0xff]  ;;  %v1020_v49 = vld [vmem:[#allocation2 + $0xb8] sm:$0xff]  ;;  %vm1100_vm0 = vcmp.lt.s32.totalorder %v2412_v51, 316 }
 0x195   : > { %3057 = vst [vmem:[#allocation13_spill] sm:$0xff] %v2486_v21  ;;  %3058 = vst [vmem:[#allocation14_spill] sm:$0xff] %v2489_v22  ;;  %v2513_v39 = vadd.f32 %v2480_v18, %v997_v1  ;;  %v2516_v40 = vadd.f32 %v2480_v18, %v998_v2  ;;  %v2519_v44 = vadd.f32 %v2480_v18, %v999_v7  ;;  %vm1101_vm1 = vcmp.lt.s32.totalorder %v2415_v52, 316 }
 0x196   : > { %3059 = vst [vmem:[#allocation15_spill] sm:$0xff] %v2492_v23  ;;  %3060 = vst [vmem:[#allocation16_spill] sm:$0xff] %v2495_v27  ;;  %v2522_v45 = vadd.f32 %v2480_v18, %v1000_v8  ;;  %v2525_v20 = vadd.f32 %v2480_v18, %v1001_v9  ;;  %v2528_v46 = vadd.f32 %v2480_v18, %v1002_v10  ;;  %v1021_v8 = vld [vmem:[#allocation2 + $0xc0] sm:$0xff]  ;;  %v1022_v9 = vld [vmem:[#allocation2 + $0xc8] sm:$0xff]  ;;  %vm1102_vm2 = vcmp.lt.s32.totalorder %v2418_v53, 316 }
 0x197   : > { %3061 = vst [vmem:[#allocation17_spill] sm:$0xff] %v2498_v28  ;;  %3062 = vst [vmem:[#allocation18_spill] sm:$0xff] %v2501_v29  ;;  %v2531_v50 = vadd.f32 %v2480_v18, %v1003_v15  ;;  %v2534_v1 = vadd.f32 %v2480_v18, %v1004_v16  ;;  %v2537_v2 = vadd.f32 %v2480_v18, %v1005_v17  ;;  %v1024_v17 = vld [vmem:[#allocation2 + $0xd8] sm:$0xff]  ;;  %v1026_v29 = vld [vmem:[#allocation2 + $0xe8] sm:$0xff]  ;;  %vm1103_vm3 = vcmp.lt.s32.totalorder %v2421_v54, 316 }
 0x198   : > { %3063 = vst [vmem:[#allocation19_spill] sm:$0xff] %v2504_v30  ;;  %3064 = vst [vmem:[#allocation20_spill] sm:$0xff] %v2507_v34  ;;  %v2540_v7 = vadd.f32 %v2480_v18, %v1006_v24  ;;  %v2543_v10 = vadd.f32 %v2480_v18, %v1007_v25  ;;  %v2546_v34 = vadd.f32 %v2480_v18, %v1008_v26  ;;  %v1025_v30 = vld [vmem:[#allocation2 + $0xe0] sm:$0xff]  ;;  %v1028_v27 = vld [vmem:[#allocation2 + $0xf8] sm:$0xff]  ;;  %vm1104_vm4 = vcmp.lt.s32.totalorder %v2424_v55, 316 }
 0x199   : > { %3065 = vst [vmem:[#allocation21_spill] sm:$0xff] %v2510_v35  ;;  %v1023_v35 = vld [vmem:[#allocation2 + $0xd0] sm:$0xff]  ;;  %v2549_v15 = vadd.f32 %v2480_v18, %v1009_v31  ;;  %v2552_v16 = vadd.f32 %v2480_v18, %v1010_v32  ;;  %v2555_v24 = vadd.f32 %v2480_v18, %v1011_v33  ;;  %v2558_v28 = vadd.f32 %v2480_v18, %v1012_v36 }
 0x19a   : > { %v2561_v25 = vadd.f32 %v2480_v18, %v1013_v37  ;;  %v2564_v26 = vadd.f32 %v2480_v18, %v1014_v38  ;;  %v1027_v31 = vld [vmem:[#allocation2 + $0xf0] sm:$0xff]  ;;  %v2567_v32 = vadd.f32 %v2480_v18, %v1015_v41  ;;  %v2570_v23 = vadd.f32 %v2480_v18, %v1016_v42 }
 0x19b   : > { %v2573_v33 = vadd.f32 %v2480_v18, %v1017_v43  ;;  %v2576_v36 = vadd.f32 %v2480_v18, %v1018_v47  ;;  %v2579_v37 = vadd.f32 %v2480_v18, %v1019_v48  ;;  %v2582_v38 = vadd.f32 %v2480_v18, %v1020_v49 }
 0x19c   : > { %v2585_v22 = vadd.f32 %v2480_v18, %v1021_v8  ;;  %v2588_v41 = vadd.f32 %v2480_v18, %v1022_v9  ;;  %v2591_v42 = vadd.f32 %v2480_v18, %v1023_v35  ;;  %v2594_v43 = vadd.f32 %v2480_v18, %v1024_v17 }
 0x19d   : > { %v2597_v47 = vadd.f32 %v2480_v18, %v1025_v30  ;;  %v2600_v48 = vadd.f32 %v2480_v18, %v1026_v29  ;;  %v2603_v49 = vadd.f32 %v2480_v18, %v1027_v31  ;;  %v2606_v8 = vadd.f32 %v2480_v18, %v1028_v27  ;;  %v3074_v31 = vld [vmem:[#allocation15_spill] sm:$0xff]  ;;  %v3075_v29 = vld [vmem:[#allocation16_spill] sm:$0xff] }
 0x19e   : > { %vm1105_vm5 = vcmp.lt.s32.totalorder %v2427_v56, 316  ;;  %v3070_v35 = vmov %v2475_v14  ;;  %v3071_v27 = vmov %v2483_v19  ;;  %v3072_v18 = vmov %v2486_v21  ;;  %v3073_v14 = vld [vmem:[#allocation14_spill] sm:$0xff]  ;;  %v3076_v19 = vld [vmem:[#allocation17_spill] sm:$0xff] }
 0x19f   : > { %3066 = vst [vmem:[#allocation22_spill] sm:$0xff] %v2597_v47  ;;  %3067 = vst [vmem:[#allocation23_spill] sm:$0xff] %v2600_v48  ;;  %vm1122_vm12 = vcmp.lt.s32.totalorder %v3071_v27, 316  ;;  %vm1123_vm13 = vcmp.lt.s32.totalorder %v3072_v18, 316  ;;  %vm1124_vm14 = vcmp.lt.s32.totalorder %v3073_v14, 316  ;;  %vm1125_vm15 = vcmp.lt.s32.totalorder %v3074_v31, 316 }
 0x1a0   : > { %3068 = vst [vmem:[#allocation24_spill] sm:$0xff] %v2603_v49  ;;  %3069 = vst [vmem:[#allocation25_spill] sm:$0xff] %v2606_v8  ;;  %vm1126_vm6 = vcmp.lt.s32.totalorder %v3075_v29, 316  ;;  %vm1127_vm7 = vcmp.lt.s32.totalorder %v3076_v19, 316  ;;  %v3077_v30 = vld [vmem:[#allocation18_spill] sm:$0xff]  ;;  %v3078_v17 = vld [vmem:[#allocation19_spill] sm:$0xff] }
 0x1a1   : > { %vm1128_vm8 = vcmp.lt.s32.totalorder %v3077_v30, 316  ;;  %vm1129_vm9 = vcmp.lt.s32.totalorder %v3078_v17, 316  ;;  %v3079_v21 = vld [vmem:[#allocation20_spill] sm:$0xff]  ;;  %v3080_v9 = vld [vmem:[#allocation21_spill] sm:$0xff]  ;;  %v3081_v8 = vmax.f32 %v2513_v39, 0.0  ;;  %v3082_v48 = vmax.f32 %v2516_v40, 0.0 }
 0x1a2   : > { %vm1130_vm10 = vcmp.lt.s32.totalorder %v3079_v21, 316  ;;  %vm1131_vm11 = vcmp.lt.s32.totalorder %v3080_v9, 316  ;;  %v3083_v19 = vmax.f32 %v2519_v44, 0.0  ;;  %v3084_v17 = vmax.f32 %v2522_v45, 0.0 }
 0x1a3   : > { %v1196_v49 = vsel %vm1100_vm0, %v3081_v8, 0.0  ;;  %v1197_v47 = vsel %vm1101_vm1, %v3082_v48, 0.0  ;;  %v3085_v39 = vmax.f32 %v2525_v20, 0.0  ;;  %v3086_v40 = vmax.f32 %v2528_v46, 0.0 }
 0x1a4   : > { %v1198_v30 = vsel %vm1102_vm2, %v3083_v19, 0.0  ;;  %v1199_v9 = vsel %vm1103_vm3, %v3084_v17, 0.0  ;;  %v1388_v8 = vadd.f32 %v1197_v47, %v1196_v49  ;;  %v3087_v44 = vmax.f32 %v2531_v50, 0.0 }
 0x1a5   : > { %v1200_v51 = vsel %vm1104_vm4, %v3085_v39, 0.0  ;;  %v1201_v52 = vsel %vm1105_vm5, %v3086_v40, 0.0  ;;  %vm3088_vm0 = vcmp.lt.s32.totalorder %v2430_v57, 316  ;;  %v3089_v54 = vmax.f32 %v2534_v1, 0.0 }
 0x1a6   : > { %v2700_v53 = vsel %vm3088_vm0, %v3087_v44, 0.0  ;;  %vm3090_vm1 = vcmp.lt.s32.totalorder %v2433_v58, 316  ;;  %v3091_v55 = vmax.f32 %v2537_v2, 0.0  ;;  %vm3092_vm2 = vcmp.lt.s32.totalorder %v2436_v59, 316  ;;  %v3126_v14 = vld [vmem:[#allocation22_spill] sm:$0xff]  ;;  %v3129_v31 = vld [vmem:[#allocation23_spill] sm:$0xff] }
 0x1a7   : > { %v2706_v19 = vsel %vm3090_vm1, %v3089_v54, 0.0  ;;  %v3093_v56 = vmax.f32 %v2540_v7, 0.0  ;;  %vm3094_vm3 = vcmp.lt.s32.totalorder %v2439_v60, 316  ;;  %v3095_v57 = vmax.f32 %v2543_v10, 0.0 }
 0x1a8   : > { %v2712_v45 = vsel %vm3092_vm2, %v3091_v55, 0.0  ;;  %vm3096_vm4 = vcmp.lt.s32.totalorder %v2442_v61, 316  ;;  %v3097_v58 = vmax.f32 %v2546_v34, 0.0  ;;  %vm3098_vm5 = vcmp.lt.s32.totalorder %v2445_v62, 316 }
 0x1a9   : > { %v2718_v20 = vsel %vm3094_vm3, %v3093_v56, 0.0  ;;  %v2724_v46 = vsel %vm3096_vm4, %v3095_v57, 0.0  ;;  %v1389_v59 = vadd.f32 %v1388_v8, %v1198_v30  ;;  %v3099_v1 = vmax.f32 %v2549_v15, 0.0 }
 0x1aa   : > { %v2730_v50 = vsel %vm3098_vm5, %v3097_v58, 0.0  ;;  %vm3100_vm0 = vcmp.lt.s32.totalorder %v2448_v63, 316  ;;  %v3101_v2 = vmax.f32 %v2552_v16, 0.0  ;;  %vm3102_vm1 = vcmp.lt.s32.totalorder %v2451_v0, 316 }
 0x1ab   : > { %v2736_v60 = vsel %vm3100_vm0, %v3099_v1, 0.0  ;;  %v3103_v7 = vmax.f32 %v2555_v24, 0.0  ;;  %vm3104_vm2 = vcmp.lt.s32.totalorder %v2454_v3, 316  ;;  %v3105_v34 = vmax.f32 %v2558_v28, 0.0 }
 0x1ac   : > { %v2742_v61 = vsel %vm3102_vm1, %v3101_v2, 0.0  ;;  %vm3106_vm3 = vcmp.lt.s32.totalorder %v2457_v4, 316  ;;  %v3107_v63 = vmax.f32 %v2561_v25, 0.0  ;;  %vm3108_vm4 = vcmp.lt.s32.totalorder %v2460_v5, 316 }
 0x1ad   : > { %v2748_v62 = vsel %vm3104_vm2, %v3103_v7, 0.0  ;;  %v2754_v10 = vsel %vm3106_vm3, %v3105_v34, 0.0  ;;  %v3109_v0 = vmax.f32 %v2564_v26, 0.0  ;;  %vm3110_vm5 = vcmp.lt.s32.totalorder %v2463_v6, 316 }
 0x1ae   : > { %v2760_v15 = vsel %vm3108_vm4, %v3107_v63, 0.0  ;;  %v3111_v3 = vmax.f32 %v2567_v32, 0.0  ;;  %vm3112_vm0 = vcmp.lt.s32.totalorder %v2466_v11, 316  ;;  %v1390_v4 = vadd.f32 %v1389_v59, %v1199_v9  ;;  %v3134_v59 = vld [vmem:[#allocation25_spill] sm:$0xff] }
 0x1af   : > { %v2766_v16 = vsel %vm3110_vm5, %v3109_v0, 0.0  ;;  %v3113_v24 = vmax.f32 %v2570_v23, 0.0  ;;  %vm3114_vm1 = vcmp.lt.s32.totalorder %v2469_v12, 316  ;;  %v3115_v25 = vmax.f32 %v2573_v33, 0.0 }
 0x1b0   : > { %v2772_v28 = vsel %vm3112_vm0, %v3111_v3, 0.0  ;;  %vm3116_vm2 = vcmp.lt.s32.totalorder %v2472_v13, 316  ;;  %v3117_v26 = vmax.f32 %v2576_v36, 0.0  ;;  %vm3118_vm3 = vcmp.lt.s32.totalorder %v3070_v35, 316 }
 0x1b1   : > { %v2778_v5 = vsel %vm3114_vm1, %v3113_v24, 0.0  ;;  %v2784_v6 = vsel %vm3116_vm2, %v3115_v25, 0.0  ;;  %v3119_v32 = vmax.f32 %v2579_v37, 0.0  ;;  %v3120_v12 = vmax.f32 %v2582_v38, 0.0 }
 0x1b2   : > { %v2790_v11 = vsel %vm3118_vm3, %v3117_v26, 0.0  ;;  %v1391_v13 = vadd.f32 %v1390_v4, %v1200_v51  ;;  %v1425_v48 = vmul.f32 %v1196_v49, %v1196_v49  ;;  %v1426_v17 = vmul.f32 %v1197_v47, %v1197_v47 }
 0x1b3   : > { %v2796_v23 = vsel %vm1122_vm12, %v3119_v32, 0.0  ;;  %v2802_v33 = vsel %vm1123_vm13, %v3120_v12, 0.0  ;;  %v3121_v36 = vmax.f32 %v2585_v22, 0.0  ;;  %v3122_v37 = vmax.f32 %v2588_v41, 0.0 }
 0x1b4   : > { %v3123_v38 = vmax.f32 %v2591_v42, 0.0  ;;  %v3124_v39 = vmax.f32 %v2594_v43, 0.0  ;;  %v3127_v40 = vmax.f32 %v3126_v14, 0.0  ;;  %v3130_v54 = vmax.f32 %v3129_v31, 0.0  ;;  %v3132_v43 = vld [vmem:[#allocation24_spill] sm:$0xff] }
 0x1b5   : > { %v2808_v35 = vsel %vm1124_vm14, %v3121_v36, 0.0  ;;  %v2814_v27 = vsel %vm1125_vm15, %v3122_v37, 0.0  ;;  %v1392_v29 = vadd.f32 %v1391_v13, %v1201_v52  ;;  %v1427_v56 = vmul.f32 %v1198_v30, %v1198_v30 }
 0x1b6   : > { %v2820_v18 = vsel %vm1126_vm6, %v3123_v38, 0.0  ;;  %v2826_v22 = vsel %vm1127_vm7, %v3124_v39, 0.0  ;;  %v2832_v41 = vsel %vm1128_vm8, %v3127_v40, 0.0  ;;  %v2838_v42 = vsel %vm1129_vm9, %v3130_v54, 0.0 }
 0x1b7   : > { %v3133_v57 = vmax.f32 %v3132_v43, 0.0  ;;  %v3135_v1 = vmax.f32 %v3134_v59, 0.0  ;;  %v1428_v34 = vmul.f32 %v1199_v9, %v1199_v9  ;;  %v1429_v63 = vmul.f32 %v1200_v51, %v1200_v51 }
 0x1b8   : > { %v1393_v0 = vadd.f32 %v1392_v29, %v2700_v53  ;;  %v1430_v3 = vmul.f32 %v1201_v52, %v1201_v52  ;;  %v1457_v4 = vadd.f32 %v1426_v17, %v1425_v48  ;;  %v1754_v24 = vpack.c.bf16 %v1197_v47, %v1196_v49 }
 0x1b9   : > { %v2844_v58 = vsel %vm1130_vm10, %v3133_v57, 0.0  ;;  %v2850_v7 = vsel %vm1131_vm11, %v3135_v1, 0.0  ;;  %v1759_v21 = vpack.c.bf16 %v1199_v9, %v1198_v30  ;;  %v1764_v25 = vpack.c.bf16 %v1201_v52, %v1200_v51 }
 0x1ba   : > { %v1769_v26 = vpack.c.bf16 %v2706_v19, %v2700_v53  ;;  %v1774_v32 = vpack.c.bf16 %v2718_v20, %v2712_v45  ;;  %v1394_v12 = vadd.f32 %v1393_v0, %v2706_v19  ;;  %v1458_v13 = vadd.f32 %v1457_v4, %v1427_v56  ;;  %1755 = vst [vmem:[%s2344_s12] sm:$0xff] %v1754_v24  }
 0x1bb   : > { %v1779_v36 = vpack.c.bf16 %v2730_v50, %v2724_v46  ;;  %v1784_v47 = vpack.c.bf16 %v2742_v61, %v2736_v60  ;;  %1831 = vst [vmem:[%s2344_s12 + $0x8] sm:$0xff] %v1759_v21   ;;  %1832 = vst [vmem:[%s2344_s12 + $0x10] sm:$0xff] %v1764_v25   ;;  %v1789_v49 = vpack.c.bf16 %v2754_v10, %v2748_v62  ;;  %vm1494_vm6 = vcmask 1040384  }
 0x1bc   : > { %1833 = vst [vmem:[%s2344_s12 + $0x18] sm:$0xff] %v1769_v26   ;;  %1834 = vst [vmem:[%s2344_s12 + $0x20] sm:$0xff] %v1774_v32   ;;  %v1794_v9 = vpack.c.bf16 %v2766_v16, %v2760_v15  ;;  %v1799_v30 = vpack.c.bf16 %v2778_v5, %v2772_v28  ;;  %v1804_v51 = vpack.c.bf16 %v2790_v11, %v2784_v6 }
 0x1bd   : > { %v1395_v52 = vadd.f32 %v1394_v12, %v2712_v45  ;;  %v1459_v48 = vadd.f32 %v1458_v13, %v1428_v34  ;;  %1835 = vst [vmem:[%s2344_s12 + $0x28] sm:$0xff] %v1779_v36   ;;  %1836 = vst [vmem:[%s2344_s12 + $0x30] sm:$0xff] %v1784_v47   ;;  %v1809_v17 = vpack.c.bf16 %v2802_v33, %v2796_v23 }
 0x1be   : > { %v1814_v37 = vpack.c.bf16 %v2814_v27, %v2808_v35  ;;  %1837 = vst [vmem:[%s2344_s12 + $0x38] sm:$0xff] %v1789_v49   ;;  %1838 = vst [vmem:[%s2344_s12 + $0x40] sm:$0xff] %v1794_v9   ;;  %v1819_v38 = vpack.c.bf16 %v2826_v22, %v2820_v18  ;;  %v1824_v39 = vpack.c.bf16 %v2838_v42, %v2832_v41 }
 0x1bf   : > { %1839 = vst [vmem:[%s2344_s12 + $0x48] sm:$0xff] %v1799_v30   ;;  %1840 = vst [vmem:[%s2344_s12 + $0x50] sm:$0xff] %v1804_v51   ;;  %v1829_v8 = vpack.c.bf16 %v2850_v7, %v2844_v58  ;;  %v1396_v14 = vadd.f32 %v1395_v52, %v2718_v20  ;;  %v1431_v40 = vmul.f32 %v2700_v53, %v2700_v53 }
 0x1c0   : > { %v1460_v44 = vadd.f32 %v1459_v48, %v1429_v63  ;;  %1841 = vst [vmem:[%s2344_s12 + $0x58] sm:$0xff] %v1809_v17   ;;  %1842 = vst [vmem:[%s2344_s12 + $0x60] sm:$0xff] %v1814_v37   ;;  %v1432_v54 = vmul.f32 %v2706_v19, %v2706_v19  ;;  %v1433_v56 = vmul.f32 %v2712_v45, %v2712_v45 }
 0x1c1   : > { %1843 = vst [vmem:[%s2344_s12 + $0x68] sm:$0xff] %v1819_v38   ;;  %1844 = vst [vmem:[%s2344_s12 + $0x70] sm:$0xff] %v1824_v39   ;;  %v1397_v31 = vadd.f32 %v1396_v14, %v2724_v46  ;;  %v1434_v57 = vmul.f32 %v2718_v20, %v2718_v20  ;;  %v1435_v2 = vmul.f32 %v2724_v46, %v2724_v46 }
 0x1c2   : > { %1845 = vst [vmem:[%s2344_s12 + $0x78] sm:$0xff] %v1829_v8   ;;  %v1461_v55 = vadd.f32 %v1460_v44, %v1430_v3  ;;  %v1436_v63 = vmul.f32 %v2730_v50, %v2730_v50  ;;  %v1437_v3 = vmul.f32 %v2736_v60, %v2736_v60  ;;  %v1438_v24 = vmul.f32 %v2742_v61, %v2742_v61 }
 0x1c3   : > { %v1398_v29 = vadd.f32 %v1397_v31, %v2730_v50  ;;  %v1439_v25 = vmul.f32 %v2748_v62, %v2748_v62  ;;  %v1440_v32 = vmul.f32 %v2754_v10, %v2754_v10  ;;  %v1441_v13 = vmul.f32 %v2760_v15, %v2760_v15 }
 0x1c4   : > { %v1462_v43 = vadd.f32 %v1461_v55, %v1431_v40  ;;  %v1442_v47 = vmul.f32 %v2766_v16, %v2766_v16  ;;  %v1443_v9 = vmul.f32 %v2772_v28, %v2772_v28  ;;  %v1444_v51 = vmul.f32 %v2778_v5, %v2778_v5 }
 0x1c5   : > { %v1399_v53 = vadd.f32 %v1398_v29, %v2736_v60  ;;  %v1445_v48 = vmul.f32 %v2784_v6, %v2784_v6  ;;  %v1446_v37 = vmul.f32 %v2790_v11, %v2790_v11  ;;  %v1447_v39 = vmul.f32 %v2796_v23, %v2796_v23 }
 0x1c6   : > { %v1463_v59 = vadd.f32 %v1462_v43, %v1432_v54  ;;  %v1448_v14 = vmul.f32 %v2802_v33, %v2802_v33  ;;  %v1449_v44 = vmul.f32 %v2808_v35, %v2808_v35  ;;  %v1450_v54 = vmul.f32 %v2814_v27, %v2814_v27 }
 0x1c7   : > { %v1400_v1 = vadd.f32 %v1399_v53, %v2742_v61  ;;  %v1451_v29 = vmul.f32 %v2820_v18, %v2820_v18  ;;  %v1452_v43 = vmul.f32 %v2826_v22, %v2826_v22 }
 0x1c8   : > { %v1464_v34 = vadd.f32 %v1463_v59, %v1433_v56 }
 0x1c9   : > { %v1401_v19 = vadd.f32 %v1400_v1, %v2748_v62  ;;  %v1454_v1 = vmul.f32 %v2838_v42, %v2838_v42 }
 0x1ca   : > { %v1465_v0 = vadd.f32 %v1464_v34, %v1434_v57  ;;  %v1453_v57 = vmul.f32 %v2832_v41, %v2832_v41 }
 0x1cb   : > { %v1402_v45 = vadd.f32 %v1401_v19, %v2754_v10 }
 0x1cc   : > { %v1466_v4 = vadd.f32 %v1465_v0, %v1435_v2 }
 0x1cd   : > { %v1403_v20 = vadd.f32 %v1402_v45, %v2760_v15 }
 0x1ce   : > { %v1467_v21 = vadd.f32 %v1466_v4, %v1436_v63 }
 0x1cf   : > { %v1404_v46 = vadd.f32 %v1403_v20, %v2766_v16 }
 0x1d0   : > { %v1468_v26 = vadd.f32 %v1467_v21, %v1437_v3 }
 0x1d1   : > { %v1405_v50 = vadd.f32 %v1404_v46, %v2772_v28 }
 0x1d2   : > { %v1469_v12 = vadd.f32 %v1468_v26, %v1438_v24 }
 0x1d3   : > { %v1406_v60 = vadd.f32 %v1405_v50, %v2778_v5 }
 0x1d4   : > { %v1470_v36 = vadd.f32 %v1469_v12, %v1439_v25 }
 0x1d5   : > { %v1407_v61 = vadd.f32 %v1406_v60, %v2784_v6 }
 0x1d6   : > { %v1471_v49 = vadd.f32 %v1470_v36, %v1440_v32 }
 0x1d7   : > { %v1408_v62 = vadd.f32 %v1407_v61, %v2790_v11 }
 0x1d8   : > { %v1472_v30 = vadd.f32 %v1471_v49, %v1441_v13 }
 0x1d9   : > { %v1409_v10 = vadd.f32 %v1408_v62, %v2796_v23 }
 0x1da   : > { %v1473_v52 = vadd.f32 %v1472_v30, %v1442_v47 }
 0x1db   : > { %v1410_v15 = vadd.f32 %v1409_v10, %v2802_v33 }
 0x1dc   : > { %v1474_v17 = vadd.f32 %v1473_v52, %v1443_v9 }
 0x1dd   : > { %v1411_v16 = vadd.f32 %v1410_v15, %v2808_v35 }
 0x1de   : > { %v1475_v38 = vadd.f32 %v1474_v17, %v1444_v51 }
 0x1df   : > { %v1412_v28 = vadd.f32 %v1411_v16, %v2814_v27 }
 0x1e0   : > { %v1476_v8 = vadd.f32 %v1475_v38, %v1445_v48 }
 0x1e1   : > { %v1413_v5 = vadd.f32 %v1412_v28, %v2820_v18  ;;  %v1455_v18 = vmul.f32 %v2844_v58, %v2844_v58 }
 0x1e2   : > { %v1477_v40 = vadd.f32 %v1476_v8, %v1446_v37 }
 0x1e3   : > { %v1414_v6 = vadd.f32 %v1413_v5, %v2826_v22  ;;  %v1456_v22 = vmul.f32 %v2850_v7, %v2850_v7 }
 0x1e4   : > { %v1478_v31 = vadd.f32 %v1477_v40, %v1447_v39 }
 0x1e5   : > { %v1415_v11 = vadd.f32 %v1414_v6, %v2832_v41 }
 0x1e6   : > { %v1479_v55 = vadd.f32 %v1478_v31, %v1448_v14 }
 0x1e7   : > { %v1416_v23 = vadd.f32 %v1415_v11, %v2838_v42 }
 0x1e8   : > { %v1480_v56 = vadd.f32 %v1479_v55, %v1449_v44 }
 0x1e9   : > { %v1417_v33 = vadd.f32 %v1416_v23, %v2844_v58 }
 0x1ea   : > { %v1481_v53 = vadd.f32 %v1480_v56, %v1450_v54 }
 0x1eb   : > { %v1418_v35 = vadd.f32 %v1417_v33, %v2850_v7 }
 0x1ec   : > { %v1482_v59 = vadd.f32 %v1481_v53, %v1451_v29 }
 0x1ed   : > { %v1419_v27 = vrot.slane %v1418_v35, 4 }
 0x1ee   : > { %v1483_v2 = vadd.f32 %v1482_v59, %v1452_v43 }
 0x1ef   : > { %v1420_v34 = vadd.f32 %v1419_v27, %v1418_v35 }
 0x1f0   : > { %v1484_v19 = vadd.f32 %v1483_v2, %v1453_v57 }
 0x1f1   : > { %v1421_v0 = vrot.slane %v1420_v34, 2 }
 0x1f2   : > { %v1485_v63 = vadd.f32 %v1484_v19, %v1454_v1 }
 0x1f3   : > { %v1422_v3 = vadd.f32 %v1421_v0, %v1420_v34 }
 0x1f4   : > { %v1486_v45 = vadd.f32 %v1485_v63, %v1455_v18 }
 0x1f5   : > { %v1423_v20 = vrot.slane %v1422_v3, 1 }
 0x1f6   : > { %v1487_v41 = vadd.f32 %v1486_v45, %v1456_v22 }
 0x1f7   : > { %v1424_v46 = vadd.f32 %v1423_v20, %v1422_v3 }
 0x1f8   : > { %v1488_v4 = vrot.slane %v1487_v41, 4 }
 0x1fa   : > { %v1489_v42 = vadd.f32 %v1488_v4, %v1487_v41 }
 0x1fc   : > { %v1490_v24 = vrot.slane %v1489_v42, 2 }
 0x1fe   : > { %v1491_v21 = vadd.f32 %v1490_v24, %v1489_v42 }
 0x200   : > { %v1492_v58 = vrot.slane %v1491_v21, 1 }
 0x202   : > { %v1493_v7 = vadd.f32 %v1492_v58, %v1491_v21 }
 0x204   : > { %v1495_v25 = vsel %vm1494_vm6, %v1424_v46, %v1493_v7 }
 0x205   : > { %1496 = vst [vmem:[%s267_s24] sm:$0x3] %v1495_v25 }
 0x206   : > { %2146 = shalt.err (!%p2143_p8)
}
 0x207   : > { %s2147_s29 = scalar_lea.hbm %s2978_s20, 32  ;;  %s2151_s13 = scalar_lea.hbm %s3034_s7, 64 }
 0x208   : > { %p2148_p10 = scmp.ne.s32.totalorder %s2978_s20, %s2147_s29  ;;  %p2152_p13 = scmp.lt.u32.totalorder %s2978_s20, %s3034_s7 }
 0x209   : > { %p2153_p0 = scmp.lt.u32.totalorder %s2151_s13, %s2147_s29  ;;  %p2155_p2 = scmp.lt.u32.totalorder %s2147_s29, %s2978_s20 }
 0x20a   : > { %p2149_p11 = pnand %p2148_p10, %p2309_p5 }
 0x20b   : > { %p2154_p1 = por %p2153_p0, %p2152_p13 }
 0x20c   : > { %p2150_p12 = pneg %p2149_p11 }
 0x20d   : > { %p2156_p3 = por %p2155_p2, %p2154_p1 }
 0x20f   : > { %p2157_p4 = pnand %p2156_p3, %p2150_p12 }
 0x211   : > { %2160 = shalt.err (!%p2157_p4)
}
 0x212   : > { %1974 = dma.vmem_to_hbm [thread:$0]  (%p2309_p5), %s2980_s9, 32, %s2978_s20, %s1503_s0  }
 0x213 PF: > { %p1980_p6 = scmp.ge.s32.totalorder %s2213_s18, 2  ;;  %s1540_s28 = sand.u32 1, %s2193_s14  }
 0x214   : > { %s1541_s12 = scalar_lea.sflag [#allocation8], %s1540_s28 }
 0x215   : > { %p1977_p7 = pnand %p1980_p6, %p2316_p9 }
 0x217   : > { %2188 = dma.done.wait (!%p1977_p7), %s1541_s12, 32  }
 0x218   : > { %2190 = vsyncadd (!%p1977_p7), %s1541_s12, 4294967264  ;;  %s35_s18 = sadd.s32 1, %s2213_s18   ;;  %s3138_s14 = smov %s2197_s15 }
 0x219   : > { %p32_p8 = scmp.ge.s32.totalorder %s35_s18, 4   ;;  %s3139_s15 = smov %s2201_s2 }
 0x21a   : > { %s3140_s2 = smov %s2322_s26  ;;  %s3141_s16 = smov %s2209_s17 }
 0x21b   : > { %s3142_s17 = smov %s3144_s21  ;;  %34 = sbr.rel (!%p32_p8) target bundleno = 39 (0x27), region = 92 }
 0x222   :  { %1546 = vsyncpa [#allocation8], 1 }
 0x223   :  { %1548 = vsyncpa [#allocation8 + $0x1], 1 }

// kernel: resgcn_forward.17
= control target key start
LH: loop header
LB: loop body
LE: loop exit
PB: predicated region body
PF: predicated region fallthrough
CT: control target
= control target key end

     0   :  { %13 = vsyncpa [#allocation4], 0  ;;  %s989_s27 = smov 0   ;;  %s1092_s0 = inlined_call_operand.vmem [shape: bf16[8,512], index: 0, kind: input, shape index: {}]   ;;  %s1093_s1 = inlined_call_operand.vmem [shape: bf16[512,128], index: 1, kind: input, shape index: {}]   ;;  %s1094_s2 = inlined_call_operand.vmem [shape: f32[1,128], index: 2, kind: input, shape index: {}]   ;;  %s1095_s3 = inlined_call_operand.vmem [shape: f32[1,128], index: 3, kind: input, shape index: {}]   ;;  %s1096_s4 = inlined_call_operand.vmem [shape: bf16[128,128], index: 4, kind: input, shape index: {}]   ;;  %s1097_s5 = inlined_call_operand.vmem [shape: f32[1,128], index: 5, kind: input, shape index: {}]   ;;  %s1098_s6 = inlined_call_operand.vmem [shape: f32[1,128], index: 6, kind: input, shape index: {}]   ;;  %s1099_s7 = inlined_call_operand.vmem [shape: f32[1,128], index: 7, kind: input, shape index: {}]   ;;  %s1100_s8 = inlined_call_operand.hbm [shape: f32[8,128], index: 8, kind: output, shape index: {}]  }
   0x1 LB: > { %s995_s28 = sadd.s32 4294967295, %s938_s27   ;;  %p765_p0 = scmp.ge.s32.totalorder %s938_s27, 1  ;;  %s938_s27 = sphi %s989_s27, %s19_s27  }
   0x2   : > { %p270_p1 = scmp.lt.s32.totalorder %s938_s27, 3 }
   0x4   : > { %p271_p2 = pnand %p765_p0, %p270_p1 }
   0x5   : > { %s766_s29 = sshll.u32 (!%p271_p2), %s995_s28, 1  ;;  %s768_s30 = sshll.u32 (!%p271_p2), %s995_s28, 5 }
   0x6   : > { %274 = sbr.rel (%p271_p2) target bundleno = 612 (0x264), region = 52  ;;  %p305_p3 = scmp.lt.s32.totalorder (!%p271_p2), %s766_s29, 3 }
   0x7   : > { %p311_p4 = scmp.lt.s32.totalorder (!%p271_p2), %s768_s30, 63  ;;  %p770_p5 = scmp.ne.s32.totalorder (!%p271_p2), %s995_s28, 0 }
   0xd   : > { %s1102_s29 = smov (!%p305_p3, %s766_s29), 3  ;;  %s1104_s30 = smov (!%p311_p4, %s768_s30), 63 }
   0xe   : > { %s767_s9 = sshll.u32 %s1102_s29, 2  ;;  %s769_s13 = sshll.u32 %s1104_s30, 2  ;;  %v940_v0 = vmov (!%p770_p5), 0.0  }
   0xf   : > { %s308_s12 = scalar_lea.vmem %s1092_s0, %s767_s9  ;;  %s1007_s16 = scalar_lea.vmem %s1093_s1, %s769_s13  ;;  %321 = vst [vmem:[#allocation2] sm:$0xff] (!%p770_p5), %v940_v0 }
  0x10   : > { %320 = sbr.rel (%p770_p5) target bundleno = 23 (0x17), region = 56 }
  0x17 PF: > { %v872_v1 = vld [vmem:[%s1007_s16 + $0x40] sm:$0xff]   ;;  %v874_v3 = vld [vmem:[%s1007_s16 + $0x48] sm:$0xff]   ;;  %v876_v5 = vld [vmem:[%s1007_s16 + $0x50] sm:$0xff]   ;;  %p789_p6 = scmp.ne.s32.totalorder %s995_s28, 1 }
  0x18   : > { %v873_v2 = vld [vmem:[%s1007_s16] sm:$0xff]   ;;  %803 = vmatprep.subr.bf16.mxu0 %v872_v1  ;;  %v875_v4 = vld [vmem:[%s1007_s16 + $0x8] sm:$0xff]   ;;  %v877_v6 = vld [vmem:[%s1007_s16 + $0x10] sm:$0xff]   ;;  %v941_v28 = vmov (!%p789_p6), 0.0   ;;  %vm942_vm0 = vmmov (!%p789_p6), 0   ;;  %v505_v56 = vlaneseq (!%p789_p6) }
  0x19   : > { %804 = vmatpush3.bf16.msra.mxu0 %v873_v2  ;;  %v878_v7 = vld [vmem:[%s1007_s16 + $0x58] sm:$0xff]   ;;  %v880_v9 = vld [vmem:[%s1007_s16 + $0x60] sm:$0xff]   ;;  %v882_v11 = vld [vmem:[%s1007_s16 + $0x68] sm:$0xff]  }
  0x1a   : > { %805 = vmatprep.subr.bf16.mxu0 %v874_v3  ;;  %v879_v8 = vld [vmem:[%s1007_s16 + $0x18] sm:$0xff]   ;;  %v881_v10 = vld [vmem:[%s1007_s16 + $0x20] sm:$0xff]   ;;  %v883_v14 = vld [vmem:[%s1007_s16 + $0x28] sm:$0xff]   ;;  %v506_v57 = vshrl.u32 (!%p789_p6), %v505_v56, 7 }
  0x1b   : > { %v323_v12 = vld [vmem:[%s308_s12] sm:$0xff]  ;;  %v884_v15 = vld [vmem:[%s1007_s16 + $0x70] sm:$0xff]   ;;  %v886_v17 = vld [vmem:[%s1007_s16 + $0x78] sm:$0xff]  }
  0x1c   : > { %v772_v13 = vcombine.high %v323_v12, %v323_v12  ;;  %v885_v16 = vld [vmem:[%s1007_s16 + $0x30] sm:$0xff]   ;;  %v887_v18 = vld [vmem:[%s1007_s16 + $0x38] sm:$0xff]   ;;  %v771_v19 = vcombine.low %v323_v12, %v323_v12  ;;  %v322_v21 = vld [vmem:[#allocation2] sm:$0xff]  ;;  %v534_v59 = vsub.s32 (!%p789_p6), 0, %v506_v57  ;;  %vm660_vm1 = vcmp.lt.s32.totalorder (!%p789_p6), %v506_v57, 3 }
  0x1d   : > { %806 = vmatpush3.bf16.msra.mxu0 %v875_v4  ;;  %v890_v27 = vld [vmem:[%s1096_s4] sm:$0xff] (!%p789_p6)   ;;  %v891_v29 = vld [vmem:[%s1096_s4 + $0x8] sm:$0xff] (!%p789_p6)   ;;  %v892_v30 = vld [vmem:[%s1096_s4 + $0x10] sm:$0xff] (!%p789_p6)  }
  0x1e   : > { %807 = vmatprep.subr.bf16.mxu0 %v876_v5  ;;  %491 = vmatprep.mubr.bf16.mxu0 %v772_v13  ;;  %v893_v34 = vld [vmem:[%s1096_s4 + $0x18] sm:$0xff] (!%p789_p6)   ;;  %v894_v39 = vld [vmem:[%s1096_s4 + $0x20] sm:$0xff] (!%p789_p6)   ;;  %v895_v44 = vld [vmem:[%s1096_s4 + $0x28] sm:$0xff] (!%p789_p6)  }
  0x1f   : > { %v896_v49 = vld [vmem:[%s1096_s4 + $0x30] sm:$0xff] (!%p789_p6)   ;;  %v897_v53 = vld [vmem:[%s1096_s4 + $0x38] sm:$0xff] (!%p789_p6)   ;;  %v508_v58 = vld [vmem:[%s1094_s2] sm:$0x1] (!%p789_p6) }
  0x20   : > { %v509_v62 = vld [vmem:[%s1095_s3] sm:$0x1] (!%p789_p6) }
  0x21   : > { %808 = vmatpush3.bf16.msra.mxu0 %v877_v6  ;;  %v790_v6 = vld [vmem:[%s1097_s5] ss:$0 sm:$0xff] (!%p789_p6) }
  0x22   : > { %809 = vmatprep.subr.bf16.mxu0 %v878_v7 }
  0x25   : > { %810 = vmatpush3.bf16.msra.mxu0 %v879_v8 }
  0x26   : > { %811 = vmatprep.subr.bf16.mxu0 %v880_v9 }
  0x29   : > { %812 = vmatpush3.bf16.msra.mxu0 %v881_v10 }
  0x2a   : > { %813 = vmatprep.subr.bf16.mxu0 %v882_v11 }
  0x2d   : > { %814 = vmatpush3.bf16.msra.mxu0 %v883_v14 }
  0x2e   : > { %815 = vmatprep.subr.bf16.mxu0 %v884_v15 }
  0x31   : > { %816 = vmatpush3.bf16.msra.mxu0 %v885_v16 }
  0x32   : > { %817 = vmatprep.subr.bf16.mxu0 %v886_v17 }
  0x35   : > { %818 = vmatpush3.bf16.msra.mxu0 %v887_v18 }
  0x36   : > { %834 = vmatprep.subr.bf16.mxu0 (!%p789_p6), %v941_v28 }
  0x38   : > { %492 = vmatmul.mubr.bf16.vlgmr.msra.gmra.mrb[0].mxu0 %v771_v19 }
  0x39   : > { %835 = vmatpush3.bf16.msra.mxu0 (!%p789_p6), %v890_v27  ;;  %850 = vmatprep.mubr.msk.bf16.mxu0 (!%p789_p6), %vm942_vm0, %v941_v28 }
  0x3a   : > { %836 = vmatprep.subr.bf16.mxu0 (!%p789_p6), %v941_v28 }
  0x3d   : > { %837 = vmatpush3.bf16.msra.mxu0 (!%p789_p6), %v891_v29 }
  0x3e   : > { %838 = vmatprep.subr.bf16.mxu0 (!%p789_p6), %v941_v28 }
  0x41   : > { %839 = vmatpush3.bf16.msra.mxu0 (!%p789_p6), %v892_v30 }
  0x42   : > { %840 = vmatprep.subr.bf16.mxu0 (!%p789_p6), %v941_v28 }
  0x45   : > { %841 = vmatpush3.bf16.msra.mxu0 (!%p789_p6), %v893_v34 }
  0x46   : > { %842 = vmatprep.subr.bf16.mxu0 (!%p789_p6), %v941_v28 }
  0x49   : > { %843 = vmatpush3.bf16.msra.mxu0 (!%p789_p6), %v894_v39 }
  0x4a   : > { %844 = vmatprep.subr.bf16.mxu0 (!%p789_p6), %v941_v28 }
  0x4d   : > { %845 = vmatpush3.bf16.msra.mxu0 (!%p789_p6), %v895_v44 }
  0x4e   : > { %846 = vmatprep.subr.bf16.mxu0 (!%p789_p6), %v941_v28 }
  0x51   : > { %847 = vmatpush3.bf16.msra.mxu0 (!%p789_p6), %v896_v49 }
  0x52   : > { %848 = vmatprep.subr.bf16.mxu0 (!%p789_p6), %v941_v28 }
  0x55   : > { %849 = vmatpush3.bf16.msra.mxu0 (!%p789_p6), %v897_v53 }
 0x10b   : > { %v819_v20 = vpop.f32.mrb[0].mxu0  ;;  %504 = sbr.rel (%p789_p6) target bundleno = 587 (0x24b), region = 60 }
 0x10c   : > { %v820_v22 = vpop.f32.mrb[1].mxu0 }
 0x10d   : > { %v821_v23 = vadd.f32 %v820_v22, %v819_v20  ;;  %v822_v24 = vpop.f32.mrb[2].mxu0 }
 0x10e   : > { %v823_v25 = vpop.f32.mrb[3].mxu0 }
 0x10f   : > { %v499_v26 = vadd.f32 %v821_v23, %v322_v21 }
 0x111   : > { %500 = vst [vmem:[#allocation2] sm:$0xff] %v499_v26 }
 0x118   : > { %v507_v31 = vld [vmem:[#allocation2] sm:$0xff] }
 0x119   : > { %v510_v32 = vrot.slane %v507_v31, 4  ;;  %v517_v33 = vmul.f32 %v507_v31, %v507_v31 }
 0x11b   : > { %v511_v35 = vadd.f32 %v510_v32, %v507_v31  ;;  %v518_v36 = vrot.slane %v517_v33, 4 }
 0x11d   : > { %v512_v37 = vrot.slane %v511_v35, 2  ;;  %v519_v38 = vadd.f32 %v518_v36, %v517_v33  ;;  %v664_v33 = vld [vmem:[%s1098_s6] sm:$0x1] }
 0x11e   : > { %v665_v36 = vld [vmem:[%s1099_s7] sm:$0x1] }
 0x11f   : > { %v513_v40 = vadd.f32 %v512_v37, %v511_v35  ;;  %v520_v41 = vrot.slane %v519_v38, 2 }
 0x121   : > { %v514_v42 = vrot.slane %v513_v40, 1  ;;  %v521_v43 = vadd.f32 %v520_v41, %v519_v38 }
 0x123   : > { %v515_v45 = vadd.f32 %v514_v42, %v513_v40  ;;  %v522_v46 = vrot.slane %v521_v43, 1 }
 0x125   : > { %v516_v47 = vmul.f32 0.33333334, %v515_v45  ;;  %v523_v48 = vadd.f32 %v522_v46, %v521_v43 }
 0x127   : > { %v524_v50 = vmul.f32 0.33333334, %v523_v48  ;;  %v525_v51 = vmul.f32 %v516_v47, %v516_v47 }
 0x129   : > { %v526_v52 = vsub.f32 %v524_v50, %v525_v51 }
 0x12b   : > { %v527_v54 = vmax.f32 %v526_v52, 0.0 }
 0x12d   : > { %v528_v55 = vadd.f32 1e-05, %v527_v54 }
 0x12f   : > { %898 = vrsqrt.f32 %v528_v55 }
 0x139   : > { %v899_v60 = vpop.eup %898 }
 0x13a   : > { %v530_v61 = vmul.f32 %v899_v60, %v508_v58 }
 0x13c   : > { %v535_v63 = vrot.slane %v530_v61, %v534_v59  ;;  %v538_v0 = vmul.f32 %v530_v61, %v516_v47 }
 0x13e   : > { %v537_v1 = vmul.f32 %v535_v63, %v507_v31  ;;  %v539_v2 = vsub.f32 %v509_v62, %v538_v0 }
 0x140   : > { %v544_v3 = vrot.slane %v539_v2, %v534_v59 }
 0x142   : > { %v546_v4 = vadd.f32 %v544_v3, %v537_v1 }
 0x144   : > { %v547_v5 = vpack.c.bf16 %v546_v4, %v546_v4 }
 0x146   : > { %851 = vmatmul.mubr.bf16.vlgmr.msra.gmra.mrb[0].mxu0 %v547_v5 }
 0x219   : > { %v653_v7 = vpop.f32.mrb[0].mxu0 }
 0x21a   : > { %v654_v8 = vadd.f32 %v790_v6, %v653_v7  ;;  %v852_v9 = vpop.f32.mrb[1].mxu0 }
 0x21b   : > { %v656_v10 = vpop.f32.mrb[2].mxu0 }
 0x21c   : > { %v659_v11 = vmax.f32 %v654_v8, 0.0  ;;  %v853_v12 = vpop.f32.mrb[3].mxu0 }
 0x21e   : > { %v663_v13 = vsel %vm660_vm1, %v659_v11, 0.0 }
 0x21f   : > { %v666_v14 = vrot.slane %v663_v13, 4  ;;  %v673_v15 = vmul.f32 %v663_v13, %v663_v13 }
 0x221   : > { %v667_v16 = vadd.f32 %v666_v14, %v663_v13  ;;  %v674_v17 = vrot.slane %v673_v15, 4 }
 0x223   : > { %v668_v18 = vrot.slane %v667_v16, 2  ;;  %v675_v19 = vadd.f32 %v674_v17, %v673_v15 }
 0x225   : > { %v669_v20 = vadd.f32 %v668_v18, %v667_v16  ;;  %v676_v21 = vrot.slane %v675_v19, 2 }
 0x227   : > { %v670_v22 = vrot.slane %v669_v20, 1  ;;  %v677_v23 = vadd.f32 %v676_v21, %v675_v19 }
 0x229   : > { %v671_v24 = vadd.f32 %v670_v22, %v669_v20  ;;  %v678_v25 = vrot.slane %v677_v23, 1 }
 0x22b   : > { %v672_v26 = vmul.f32 0.33333334, %v671_v24  ;;  %v679_v27 = vadd.f32 %v678_v25, %v677_v23 }
 0x22d   : > { %v680_v28 = vmul.f32 0.33333334, %v679_v27  ;;  %v681_v29 = vmul.f32 %v672_v26, %v672_v26 }
 0x22f   : > { %v682_v30 = vsub.f32 %v680_v28, %v681_v29 }
 0x231   : > { %v683_v31 = vmax.f32 %v682_v30, 0.0 }
 0x233   : > { %v684_v32 = vadd.f32 1e-05, %v683_v31 }
 0x235   : > { %900 = vrsqrt.f32 %v684_v32 }
 0x23f   : > { %v901_v34 = vpop.eup %900 }
 0x240   : > { %v686_v35 = vmul.f32 %v901_v34, %v664_v33 }
 0x242   : > { %v691_v37 = vrot.slane %v686_v35, %v534_v59  ;;  %v694_v38 = vmul.f32 %v686_v35, %v672_v26 }
 0x244   : > { %v695_v39 = vsub.f32 %v665_v36, %v694_v38  ;;  %v693_v40 = vmul.f32 %v691_v37, %v663_v13 }
 0x246   : > { %v700_v41 = vrot.slane %v695_v39, %v534_v59 }
 0x248   : > { %v702_v42 = vadd.f32 %v700_v41, %v693_v40 }
 0x24a   : > { %703 = vst [vmem:[#allocation3] sm:$0xff] %v702_v42 }
 0x24b PF: > { %p858_p7 = scmp.eq.s32.totalorder %s995_s28, 1  ;;  %s943_s23 = smov [#allocation3]  }
 0x24c   : > { %s711_s24 = sshll.u32 %s943_s23, 4  ;;  %s712_s24 = int_to_ptr.vmem [resolvable:$true] %s711_s24 }
 0x24d   : > { %s902_s25 = scalar_lea.vmem %s712_s24, 128  ;;  %p909_p11 = scmp.lt.s32.totalorder %s712_s24, %s712_s24 }
 0x24e   : > { %p903_p8 = scmp.ne.s32.totalorder %s712_s24, %s902_s25  ;;  %p910_p12 = scmp.lt.s32.totalorder %s902_s25, %s902_s25 }
 0x250   : > { %p904_p9 = pnand %p903_p8, %p858_p7  ;;  %p911_p13 = por %p910_p12, %p909_p11 }
 0x252   : > { %p905_p10 = pneg %p904_p9 }
 0x254   : > { %p912_p0 = pnand %p911_p13, %p905_p10 }
 0x256   : > { %915 = shalt.err (!%p912_p0)
}
 0x257   : > { %s916_s30 = scalar_lea.hbm %s1100_s8, 128 }
 0x258   : > { %p917_p1 = scmp.ne.s32.totalorder %s1100_s8, %s916_s30  ;;  %p922_p4 = scmp.lt.u32.totalorder %s916_s30, %s1100_s8 }
 0x25a   : > { %p918_p2 = pnand %p917_p1, %p858_p7 }
 0x25c   : > { %p919_p3 = pneg %p918_p2 }
 0x25e   : > { %p924_p5 = pnand %p922_p4, %p919_p3 }
 0x260   : > { %927 = shalt.err (!%p924_p5)
}
 0x261   : > { %855 = dma.vmem_to_hbm [thread:$0]  (%p858_p7), %s712_s24, 128, %s1100_s8, [#allocation4]  }
 0x262   : > { %933 = dma.done.wait (%p858_p7), [#allocation4], 128  }
 0x263   : > { %935 = vsyncadd (%p858_p7), [#allocation4], 4294967168 }
 0x264 PF: > { %s19_s27 = sadd.s32 1, %s938_s27  }
 0x265   : > { %p16_p6 = scmp.ge.s32.totalorder %s19_s27, 4  }
 0x267   :  { %18 = sbr.rel (!%p16_p6) target bundleno = 1 (0x1), region = 90 }
 0x26e   :  { %724 = vsyncpa [#allocation4], 1 }
 0x26f   :  { %726 = vsyncpa [#allocation4 + $0x1], 1 }

</bundles_post_ra>
